<compile_context>
chip_gen: v7x
topology: tpu7x:2x2x1
jax: 0.10.0
libtpu: 0.0.40
codegen_flags: <defaults>
</compile_context>

<pallas_src>
import functools

import jax
import jax.numpy as jnp
from jax import lax
from jax.experimental import pallas as pl
from jax.experimental.pallas import tpu as pltpu


# ----------------------------------------------------------------------------
# Fused matmul (+ BN affine + optional residual + activation) Pallas kernel
# ----------------------------------------------------------------------------

def _apply_epilogue(acc, scale, bias, res, act):
    y = acc * scale + bias
    if res is not None:
        y = y + res.astype(jnp.float32)
    if act == "relu":
        y = jnp.maximum(y, 0.0)
    elif act == "hswish":                      # x * relu6(x+3) / 6
        y = y * (jnp.clip(y + 3.0, 0.0, 6.0) * (1.0 / 6.0))
    elif act == "sigmoid":
        y = jax.nn.sigmoid(y)
    return y


def _mm_kernel(a_ref, b_ref, s_ref, c_ref, o_ref, acc_ref, *, act):
    @pl.when(pl.program_id(2) == 0)
    def _():
        acc_ref[...] = jnp.zeros_like(acc_ref)

    acc_ref[...] += jnp.dot(a_ref[...], b_ref[...],
                            preferred_element_type=jnp.float32)

    @pl.when(pl.program_id(2) == pl.num_programs(2) - 1)
    def _():
        o_ref[...] = _apply_epilogue(acc_ref[...], s_ref[...], c_ref[...],
                                     None, act).astype(o_ref.dtype)


def _mm_res_kernel(a_ref, b_ref, s_ref, c_ref, r_ref, o_ref, acc_ref, *, act):
    @pl.when(pl.program_id(2) == 0)
    def _():
        acc_ref[...] = jnp.zeros_like(acc_ref)

    acc_ref[...] += jnp.dot(a_ref[...], b_ref[...],
                            preferred_element_type=jnp.float32)

    @pl.when(pl.program_id(2) == pl.num_programs(2) - 1)
    def _():
        o_ref[...] = _apply_epilogue(acc_ref[...], s_ref[...], c_ref[...],
                                     r_ref[...], act).astype(o_ref.dtype)


def _pick_tm(m, n):
    # Bigger M tiles when the output is narrow (cheap in VMEM, fewer grid
    # steps and fewer B re-reads); full-dim block when m itself is small.
    cap = 1024 if n < 256 else 512
    return m if m <= cap else cap


def _pick_tn(n, cap=512):
    if n % 128 != 0:
        return n                               # ragged Cout (mip, num_classes, 64)
    t = min(cap, n)
    return t if n % t == 0 else 128


def _pick_tk(k):
    for cand in (512, 384, 256, 128):
        if k % cand == 0:
            return cand
    return k                                   # ragged K (147, 576, <128): single step


def matmul_fused(a, b, scale, bias, *, residual=None, act="none",
                 out_dtype=jnp.bfloat16):
    """out = act((a @ b) * scale + bias [+ residual]); bf16 MXU, f32 accum."""
    m, k = a.shape
    k2, n = b.shape
    assert k == k2
    tn, tk = _pick_tn(n), _pick_tk(k)
    tm = _pick_tm(m, n)
    grid = (pl.cdiv(m, tm), n // tn, k // tk)

    a = a.astype(jnp.bfloat16)
    b = b.astype(jnp.bfloat16)
    scale2 = scale.reshape(1, n).astype(jnp.float32)
    bias2 = bias.reshape(1, n).astype(jnp.float32)

    in_specs = [pl.BlockSpec((tm, tk), lambda i, j, kk: (i, kk)),
                pl.BlockSpec((tk, tn), lambda i, j, kk: (kk, j)),
                pl.BlockSpec((1, tn), lambda i, j, kk: (0, j)),
                pl.BlockSpec((1, tn), lambda i, j, kk: (0, j))]
    args = [a, b, scale2, bias2]
    if residual is not None:
        kern = functools.partial(_mm_res_kernel, act=act)
        # k-invariant index map -> fetched once per (i, j) output tile.
        in_specs.append(pl.BlockSpec((tm, tn), lambda i, j, kk: (i, j)))
        args.append(residual.astype(jnp.bfloat16))
    else:
        kern = functools.partial(_mm_kernel, act=act)

    out_bytes = jnp.dtype(out_dtype).itemsize
    cost = pl.CostEstimate(
        flops=2 * m * n * k,
        transcendentals=m * n if act == "sigmoid" else 0,
        bytes_accessed=(2 * (m * k + k * n) + out_bytes * m * n
                        + (2 * m * n if residual is not None else 0)))

    return pl.pallas_call(
        kern,
        out_shape=jax.ShapeDtypeStruct((m, n), out_dtype),
        grid_spec=pltpu.PrefetchScalarGridSpec(
            num_scalar_prefetch=0,
            grid=grid,
            in_specs=in_specs,
            out_specs=pl.BlockSpec((tm, tn), lambda i, j, kk: (i, j)),
            scratch_shapes=[pltpu.VMEM((tm, tn), jnp.float32)]),
        compiler_params=pltpu.CompilerParams(
            dimension_semantics=("parallel", "parallel", "arbitrary")),
        cost_estimate=cost,
    )(*args)


# ----------------------------------------------------------------------------
# Conv wrapper (JAX glue: im2col / reshape only; all math in the fused matmul)
# ----------------------------------------------------------------------------

def conv_bn_act(x, cp, *, stride, padding, act, residual=None):
    """x: (N,H,W,Cin) bf16 NHWC. cp: {'w':(kh*kw*Cin,Cout) bf16, 'scale','shift','kh','kw'}."""
    n, h, w, cin = x.shape
    kh, kw = cp["kh"], cp["kw"]
    cout = cp["w"].shape[1]
    ho = (h + 2 * padding - kh) // stride + 1
    wo = (w + 2 * padding - kw) // stride + 1
    if kh == 1 and kw == 1 and padding == 0:
        if stride > 1:
            x = x[:, ::stride, ::stride, :]
        a = x.reshape(n * ho * wo, cin)
    else:
        # TODO(synk): im2col still materializes kh*kw shifted copies in HBM; a
        #             haloed image-tile conv kernel would read x only once.
        xp = jnp.pad(x, ((0, 0), (padding, padding), (padding, padding), (0, 0)))
        taps = []
        for i in range(kh):
            for j in range(kw):
                taps.append(lax.slice(
                    xp, (0, i, j, 0),
                    (n, i + (ho - 1) * stride + 1, j + (wo - 1) * stride + 1, cin),
                    (1, stride, stride, 1)))
        a = jnp.concatenate(taps, axis=-1).reshape(n * ho * wo, kh * kw * cin)
    res2 = residual.reshape(n * ho * wo, cout) if residual is not None else None
    out = matmul_fused(a, cp["w"], cp["scale"], cp["shift"],
                       residual=res2, act=act)
    return out.reshape(n, ho, wo, cout)


# ----------------------------------------------------------------------------
# Elementwise / pooling Pallas kernels (tiled, parallel grids)
# ----------------------------------------------------------------------------

def _max9_kernel(*refs):
    o_ref = refs[-1]
    m = refs[0][...]
    for r in refs[1:-1]:
        m = jnp.maximum(m, r[...])
    o_ref[...] = m


def maxpool_3x3_s2(x):
    n, h, w, c = x.shape
    ho = (h + 2 - 3) // 2 + 1
    wo = (w + 2 - 3) // 2 + 1
    xp = jnp.pad(x, ((0, 0), (1, 1), (1, 1), (0, 0)),
                 constant_values=-jnp.inf)
    views = []
    for i in range(3):
        for j in range(3):
            views.append(lax.slice(
                xp, (0, i, j, 0),
                (n, i + (ho - 1) * 2 + 1, j + (wo - 1) * 2 + 1, c),
                (1, 2, 2, 1)).reshape(n * ho * wo, c))
    m = n * ho * wo
    tr = m if m <= 1024 else 1024
    spec = pl.BlockSpec((tr, c), lambda i: (i, 0))
    out = pl.pallas_call(
        _max9_kernel,
        out_shape=jax.ShapeDtypeStruct((m, c), x.dtype),
        grid=(pl.cdiv(m, tr),),
        in_specs=[spec] * 9,
        out_specs=spec,
        compiler_params=pltpu.CompilerParams(
            dimension_semantics=("parallel",)),
    )(*views)
    return out.reshape(n, ho, wo, c)


def _ca_pool_kernel(x_ref, xh_ref, xw_ref):
    xb = x_ref[...].astype(jnp.float32)              # (1, H, W, tc)
    xh_ref[...] = jnp.mean(xb, axis=2).astype(xh_ref.dtype)
    xw_ref[...] = jnp.mean(xb, axis=1).astype(xw_ref.dtype)


def _ca_apply_kernel(x_ref, ah_ref, aw_ref, o_ref):
    o_ref[...] = (x_ref[...].astype(jnp.float32)
                  * aw_ref[...].astype(jnp.float32)
                  * ah_ref[...].astype(jnp.float32)).astype(o_ref.dtype)


def _pick_tc(c):
    for cand in (512, 256, 128):
        if c % cand == 0:
            return cand
    return c


def coord_att(x, ca):
    n, h, w, c = x.shape
    tc = _pick_tc(c)
    grid = (n, c // tc)

    xh, xw = pl.pallas_call(
        _ca_pool_kernel,
        out_shape=(jax.ShapeDtypeStruct((n, h, c), x.dtype),
                   jax.ShapeDtypeStruct((n, w, c), x.dtype)),
        grid=grid,
        in_specs=[pl.BlockSpec((1, h, w, tc), lambda b, cc: (b, 0, 0, cc))],
        out_specs=(pl.BlockSpec((1, h, tc), lambda b, cc: (b, 0, cc)),
                   pl.BlockSpec((1, w, tc), lambda b, cc: (b, 0, cc))),
        compiler_params=pltpu.CompilerParams(
            dimension_semantics=("parallel", "parallel")),
    )(x)

    mip = ca["w1"].shape[1]
    y = jnp.concatenate([xh, xw], axis=1).reshape(n * (h + w), c)
    # 1x1 conv + (conv bias folded into) BN + h_swish, all in the matmul epilogue.
    y = matmul_fused(y, ca["w1"], ca["scale1"], ca["shift1"], act="hswish")
    y = y.reshape(n, h + w, mip)
    yh = y[:, :h].reshape(n * h, mip)
    yw = y[:, h:].reshape(n * w, mip)
    a_h = matmul_fused(yh, ca["wh"], ca["ones"], ca["bh"],
                       act="sigmoid").reshape(n, h, 1, c)
    a_w = matmul_fused(yw, ca["ww"], ca["ones"], ca["bw"],
                       act="sigmoid").reshape(n, 1, w, c)

    return pl.pallas_call(
        _ca_apply_kernel,
        out_shape=jax.ShapeDtypeStruct(x.shape, x.dtype),
        grid=grid,
        in_specs=[pl.BlockSpec((1, h, w, tc), lambda b, cc: (b, 0, 0, cc)),
                  pl.BlockSpec((1, h, 1, tc), lambda b, cc: (b, 0, 0, cc)),
                  pl.BlockSpec((1, 1, w, tc), lambda b, cc: (b, 0, 0, cc))],
        out_specs=pl.BlockSpec((1, h, w, tc), lambda b, cc: (b, 0, 0, cc)),
        compiler_params=pltpu.CompilerParams(
            dimension_semantics=("parallel", "parallel")),
    )(x, a_h, a_w)


def _gap_kernel(x_ref, o_ref):
    o_ref[...] = jnp.mean(x_ref[...].astype(jnp.float32),
                          axis=1, keepdims=True).astype(o_ref.dtype)


def global_avg_pool(x):
    n, h, w, c = x.shape
    xr = x.reshape(n, h * w, c)
    out = pl.pallas_call(
        _gap_kernel,
        out_shape=jax.ShapeDtypeStruct((n, 1, c), x.dtype),
        grid=(n,),
        in_specs=[pl.BlockSpec((1, h * w, c), lambda b: (b, 0, 0))],
        out_specs=pl.BlockSpec((1, 1, c), lambda b: (b, 0, 0)),
        compiler_params=pltpu.CompilerParams(
            dimension_semantics=("parallel",)),
    )(xr)
    return out.reshape(n, c)


# ----------------------------------------------------------------------------
# Blocks
# ----------------------------------------------------------------------------

def bottleneck(x, blk):
    identity = x
    y = conv_bn_act(x, blk["c1"], stride=1, padding=0, act="relu")
    y = conv_bn_act(y, blk["c2"], stride=blk["stride"], padding=1, act="relu")
    if "down" in blk:
        identity = conv_bn_act(x, blk["down"], stride=blk["stride"],
                               padding=0, act="none")
    # conv3 + BN3 + residual add + ReLU fused into the matmul epilogue.
    return conv_bn_act(y, blk["c3"], stride=1, padding=0, act="relu",
                       residual=identity)


# ----------------------------------------------------------------------------
# Parameter construction (deterministic, synthetic) + one-time weight prep
# ----------------------------------------------------------------------------

class ParamGen:
    def __init__(self, seed=0):
        self.key = jax.random.PRNGKey(seed)

    def _next(self):
        self.key, sub = jax.random.split(self.key)
        return sub

    def conv(self, cout, cin, kh, kw):
        fan_in = cin * kh * kw
        return (jax.random.normal(self._next(), (cout, cin, kh, kw), jnp.float32)
                * (1.0 / jnp.sqrt(jnp.float32(fan_in))))

    def bn(self, c):
        gamma = 1.0 + 0.1 * jax.random.normal(self._next(), (c,), jnp.float32)
        beta = 0.1 * jax.random.normal(self._next(), (c,), jnp.float32)
        mean = 0.1 * jax.random.normal(self._next(), (c,), jnp.float32)
        var = 1.0 + 0.1 * jax.random.uniform(self._next(), (c,), jnp.float32)
        return (gamma, beta, mean, var)

    def bias(self, c):
        return 0.1 * jax.random.normal(self._next(), (c,), jnp.float32)


def _prep_conv_w(w):
    """(Cout,Cin,kh,kw) PyTorch layout -> (kh*kw*Cin, Cout) bf16, done once at init."""
    cout, cin, kh, kw = w.shape
    return (jnp.transpose(w, (2, 3, 1, 0))
            .reshape(kh * kw * cin, cout).astype(jnp.bfloat16))


def _fold_bn(bn, conv_bias=None, eps=1e-5):
    gamma, beta, mean, var = bn
    scale = gamma * lax.rsqrt(var + eps)
    base = (conv_bias - mean) if conv_bias is not None else -mean
    shift = beta + base * scale
    return scale.astype(jnp.float32), shift.astype(jnp.float32)


def _conv_entry(pg, cout, cin, kh, kw):
    w = pg.conv(cout, cin, kh, kw)
    scale, shift = _fold_bn(pg.bn(cout))
    return {"w": _prep_conv_w(w), "scale": scale, "shift": shift,
            "kh": kh, "kw": kw}


def make_params(num_classes, seed=0):
    pg = ParamGen(seed)
    p = {"stem": _conv_entry(pg, 64, 3, 7, 7)}
    cfg = [(64, 256, 3, 1), (128, 512, 4, 2), (256, 1024, 6, 2), (512, 2048, 3, 2)]
    in_c = 64
    layers = []
    for width, out_c, nblocks, stride in cfg:
        blocks = []
        for b in range(nblocks):
            blk = {
                "c1": _conv_entry(pg, width, in_c, 1, 1),
                "c2": _conv_entry(pg, width, width, 3, 3),
                "c3": _conv_entry(pg, out_c, width, 1, 1),
                "stride": stride if b == 0 else 1,
            }
            if b == 0:
                blk["down"] = _conv_entry(pg, out_c, in_c, 1, 1)
            blocks.append(blk)
            in_c = out_c
        layers.append(blocks)
    p["layers"] = layers

    cas = []
    for c in (256, 512, 1024, 2048):
        mip = max(8, c // 32)
        w1 = pg.conv(mip, c, 1, 1)
        b1 = pg.bias(mip)
        scale1, shift1 = _fold_bn(pg.bn(mip), conv_bias=b1)  # conv1 bias folded in
        cas.append({
            "w1": _prep_conv_w(w1), "scale1": scale1, "shift1": shift1,
            "wh": _prep_conv_w(pg.conv(c, mip, 1, 1)), "bh": pg.bias(c),
            "ww": _prep_conv_w(pg.conv(c, mip, 1, 1)), "bw": pg.bias(c),
            "ones": jnp.ones((c,), jnp.float32),
        })
    p["ca"] = cas

    fc_w = (jax.random.normal(pg._next(), (num_classes, 2048), jnp.float32)
            / jnp.sqrt(jnp.float32(2048)))
    p["fc_w"] = jnp.transpose(fc_w).astype(jnp.bfloat16)   # (2048, num_classes)
    p["fc_b"] = pg.bias(num_classes)
    p["fc_ones"] = jnp.ones((num_classes,), jnp.float32)
    return p


# ----------------------------------------------------------------------------
# Forward pass (ResNet50 + CoordAtt after each stage + fc)
# ----------------------------------------------------------------------------

def forward(x_nchw, params):
    x = jnp.transpose(x_nchw, (0, 2, 3, 1)).astype(jnp.bfloat16)   # NCHW -> NHWC
    x = conv_bn_act(x, params["stem"], stride=2, padding=3, act="relu")
    x = maxpool_3x3_s2(x)
    for blocks, ca in zip(params["layers"], params["ca"]):
        for blk in blocks:
            x = bottleneck(x, blk)
        x = coord_att(x, ca)
    pooled = global_avg_pool(x)                                    # (N, 2048)
    logits = matmul_fused(pooled, params["fc_w"], params["fc_ones"],
                          params["fc_b"], act="none", out_dtype=jnp.float32)
    return logits


# ----------------------------------------------------------------------------

if __name__ == "__main__":
    num_classes = 10
    batch, in_ch, hw = 2, 3, 64          # small spatial size for a quick run
    key = jax.random.PRNGKey(0)
    x = jax.random.normal(key, (batch, in_ch, hw, hw), jnp.float32)

    params = make_params(num_classes, seed=0)
    logits = forward(x, params)
    logits = jax.block_until_ready(logits)
    assert logits.shape == (batch, num_classes)
    assert bool(jnp.all(jnp.isfinite(logits)))
    print("KERNEL_OK")
</pallas_src>

<mosaic_0001>
module attributes {stable_mosaic.version = 11 : i64} {
  func.func @_mm_kernel(%arg0: i32, %arg1: i32, %arg2: i32, %arg3: memref<1024x147xbf16, #tpu.memory_space<vmem>>, %arg4: memref<147x64xbf16, #tpu.memory_space<vmem>>, %arg5: memref<1x64xf32, #tpu.memory_space<vmem>>, %arg6: memref<1x64xf32, #tpu.memory_space<vmem>>, %arg7: memref<1024x64xbf16, #tpu.memory_space<vmem>>, %arg8: memref<1024x64xf32, #tpu.memory_space<vmem>>) attributes {dimension_semantics = [#tpu.dimension_semantics<parallel>, #tpu.dimension_semantics<parallel>, #tpu.dimension_semantics<arbitrary>], iteration_bounds = array<i64: 2, 1, 1>, scalar_prefetch = 0 : i64, scratch_operands = 1 : i64, tpu.core_type = #tpu.core_type<tc>, window_params = [{transform_indices = @transform_0, window_bounds = array<i64: 1024, 147>}, {transform_indices = @transform_1, window_bounds = array<i64: 147, 64>}, {transform_indices = @transform_2, window_bounds = array<i64: 1, 64>}, {transform_indices = @transform_3, window_bounds = array<i64: 1, 64>}, {transform_indices = @transform_4, window_bounds = array<i64: 1024, 64>}]} {
    %c0_i32 = arith.constant 0 : i32
    %0 = arith.cmpi eq, %arg2, %c0_i32 : i32
    %1 = arith.extui %0 : i1 to i32
    %c0_i32_0 = arith.constant 0 : i32
    %2 = arith.cmpi ne, %1, %c0_i32_0 : i32
    scf.if %2 {
      %cst_10 = arith.constant 0.000000e+00 : f32
      %12 = vector.broadcast %cst_10 : f32 to vector<1024x64xf32>
      %c0_11 = arith.constant 0 : index
      %c0_12 = arith.constant 0 : index
      %13 = vector.load %arg8[%c0_11, %c0_12] : memref<1024x64xf32, #tpu.memory_space<vmem>>, vector<1024x64xf32>
      tpu.vector_store %arg8[%c0_11, %c0_12], %12 {strides = array<i32>} : memref<1024x64xf32, #tpu.memory_space<vmem>>, vector<1024x64xf32>,
    } else {
    }
    %c0 = arith.constant 0 : index
    %c0_1 = arith.constant 0 : index
    %3 = vector.load %arg8[%c0, %c0_1] : memref<1024x64xf32, #tpu.memory_space<vmem>>, vector<1024x64xf32>
    %c0_2 = arith.constant 0 : index
    %c0_3 = arith.constant 0 : index
    %4 = vector.load %arg3[%c0_2, %c0_3] : memref<1024x147xbf16, #tpu.memory_space<vmem>>, vector<1024x147xbf16>
    %c0_4 = arith.constant 0 : index
    %c0_5 = arith.constant 0 : index
    %5 = vector.load %arg4[%c0_4, %c0_5] : memref<147x64xbf16, #tpu.memory_space<vmem>>, vector<147x64xbf16>
    %cst = arith.constant dense<0.000000e+00> : vector<1024x64xf32>
    %6 = tpu.matmul %4, %5, %cst {dimension_numbers = #tpu.dot_dimension_numbers<[1], [0], [0], [1], [0, 0, 1, 1], [], []>} : vector<1024x147xbf16>, vector<147x64xbf16>, vector<1024x64xf32> -> vector<1024x64xf32>
    %7 = arith.addf %3, %6 : vector<1024x64xf32>
    %c0_6 = arith.constant 0 : index
    %c0_7 = arith.constant 0 : index
    %8 = vector.load %arg8[%c0_6, %c0_7] : memref<1024x64xf32, #tpu.memory_space<vmem>>, vector<1024x64xf32>
    tpu.vector_store %arg8[%c0_6, %c0_7], %7 {strides = array<i32>} : memref<1024x64xf32, #tpu.memory_space<vmem>>, vector<1024x64xf32>,
    %c0_i32_8 = arith.constant 0 : i32
    %9 = arith.cmpi eq, %arg2, %c0_i32_8 : i32
    %10 = arith.extui %9 : i1 to i32
    %c0_i32_9 = arith.constant 0 : i32
    %11 = arith.cmpi ne, %10, %c0_i32_9 : i32
    scf.if %11 {
      %c0_10 = arith.constant 0 : index
      %c0_11 = arith.constant 0 : index
      %12 = vector.load %arg8[%c0_10, %c0_11] : memref<1024x64xf32, #tpu.memory_space<vmem>>, vector<1024x64xf32>
      %c0_12 = arith.constant 0 : index
      %c0_13 = arith.constant 0 : index
      %13 = vector.load %arg5[%c0_12, %c0_13] : memref<1x64xf32, #tpu.memory_space<vmem>>, vector<1x64xf32>
      %c0_14 = arith.constant 0 : index
      %c0_15 = arith.constant 0 : index
      %14 = vector.load %arg6[%c0_14, %c0_15] : memref<1x64xf32, #tpu.memory_space<vmem>>, vector<1x64xf32>
      %15 = vector.broadcast %13 : vector<1x64xf32> to vector<1024x64xf32>
      %16 = arith.mulf %12, %15 : vector<1024x64xf32>
      %17 = vector.broadcast %14 : vector<1x64xf32> to vector<1024x64xf32>
      %18 = arith.addf %16, %17 : vector<1024x64xf32>
      %cst_16 = arith.constant 0.000000e+00 : f32
      %19 = vector.broadcast %cst_16 : f32 to vector<1024x64xf32>
      %20 = arith.maximumf %18, %19 : vector<1024x64xf32>
      %21 = arith.truncf %20 : vector<1024x64xf32> to vector<1024x64xbf16>
      %c0_17 = arith.constant 0 : index
      %c0_18 = arith.constant 0 : index
      %22 = vector.load %arg7[%c0_17, %c0_18] : memref<1024x64xbf16, #tpu.memory_space<vmem>>, vector<1024x64xbf16>
      tpu.vector_store %arg7[%c0_17, %c0_18], %21 {strides = array<i32>} : memref<1024x64xbf16, #tpu.memory_space<vmem>>, vector<1024x64xbf16>,
    } else {
    }
    return
  }
  func.func @transform_0(%arg0: i32, %arg1: i32, %arg2: i32) -> (i32, i32) {
    %c0_i32 = arith.constant 0 : i32
    return %arg0, %arg2 : i32, i32
  }
  func.func @transform_1(%arg0: i32, %arg1: i32, %arg2: i32) -> (i32, i32) {
    %c0_i32 = arith.constant 0 : i32
    return %arg2, %arg1 : i32, i32
  }
  func.func @transform_2(%arg0: i32, %arg1: i32, %arg2: i32) -> (i32, i32) {
    %c0_i32 = arith.constant 0 : i32
    %c0_i32_0 = arith.constant 0 : i32
    return %c0_i32, %arg1 : i32, i32
  }
  func.func @transform_3(%arg0: i32, %arg1: i32, %arg2: i32) -> (i32, i32) {
    %c0_i32 = arith.constant 0 : i32
    %c0_i32_0 = arith.constant 0 : i32
    return %c0_i32, %arg1 : i32, i32
  }
  func.func @transform_4(%arg0: i32, %arg1: i32, %arg2: i32) -> (i32, i32) {
    %c0_i32 = arith.constant 0 : i32
    return %arg0, %arg1 : i32, i32
  }
}

</mosaic_0001>

<bundles_post_ra>
// kernel: tpu_custom_call.1
= control target key start
LH: loop header
LB: loop body
LE: loop exit
PB: predicated region body
PF: predicated region fallthrough
CT: control target
= control target key end

     0   :  { %s4429_s15 = smov 0   ;;  %s4431_s16 = smov 0   ;;  %s5624_s0 = inlined_call_operand.vmem [shape: bf16[2048,147], index: 0, kind: input, shape index: {}]   ;;  %s5625_s1 = inlined_call_operand.vmem [shape: bf16[147,64], index: 1, kind: input, shape index: {}]   ;;  %s5626_s2 = inlined_call_operand.vmem [shape: f32[1,64], index: 2, kind: input, shape index: {}]   ;;  %s5627_s3 = inlined_call_operand.vmem [shape: f32[1,64], index: 3, kind: input, shape index: {}]   ;;  %s5628_s4 = inlined_call_operand.vmem [shape: bf16[2048,64], index: 4, kind: output, shape index: {}]  }
   0x1   :  { %s4433_s17 = smov 0  }
   0x2 LB: > { %s33_s18 = sadd.s32 1, %s4395_s16  ;;  %p3655_p0 = scmp.ge.s32.totalorder %s4399_s17, 1  ;;  %s4399_s17 = sphi %s4433_s17, %s14_s17   ;;  %s4395_s16 = sphi %s4431_s16, %s5630_s16   ;;  %s4391_s15 = sphi %s4429_s15, %s5629_s15  }
   0x3   : > { %p35_p1 = scmp.ge.s32.totalorder %s33_s18, 2  ;;  %p224_p2 = scmp.lt.s32.totalorder %s4399_s17, 3 }
   0x5   : > { %s5632_s18 = smov (%p35_p1, %s33_s18), 0  ;;  %p225_p3 = pnand %p3655_p0, %p224_p2 }
   0x6   : > { %v4171_v0 = vld [vmem:[%s5625_s1] sm:$0xff] (!%p225_p3)   ;;  %v4401_v1 = vmov (!%p225_p3), 0   ;;  %v4172_v2 = vld [vmem:[%s5625_s1 + $0x8] sm:$0xff] (!%p225_p3)   ;;  %v4173_v3 = vld [vmem:[%s5625_s1 + $0x10] sm:$0xff] (!%p225_p3)   ;;  %s3656_s25 = sshll.u32 (!%p225_p3), %s4391_s15, 7  ;;  %vm1350_vm0 = vcmask (!%p225_p3), 154624  }
   0x7   : > { %228 = sbr.rel (%p225_p3) target bundleno = 530 (0x212), region = 36  ;;  %1550 = vmatprep.subr.bf16.mxu0 (!%p225_p3), %v4401_v1  ;;  %4124 = vmatprep.subr.bf16.mxu1 (!%p225_p3), %v4401_v1  ;;  %p274_p4 = scmp.lt.s32.totalorder (!%p225_p3), %s3656_s25, 255  ;;  %v4174_v4 = vld [vmem:[%s5625_s1 + $0x18] sm:$0xff] (!%p225_p3)   ;;  %v4175_v5 = vld [vmem:[%s5625_s1 + $0x20] sm:$0xff] (!%p225_p3)   ;;  %v4176_v8 = vld [vmem:[%s5625_s1 + $0x28] sm:$0xff] (!%p225_p3)   ;;  %vm1543_vm1 = vcmask (!%p225_p3), 1040384  }
   0x8   : > { %1551 = vmatpush1.bf16.msra.mxu0 (!%p225_p3), %v4171_v0  ;;  %4134 = vmatpush1.bf16.msra.mxu1 (!%p225_p3), %v4171_v0  ;;  %v4177_v9 = vld [vmem:[%s5625_s1 + $0x30] sm:$0xff] (!%p225_p3)   ;;  %v4178_v10 = vld [vmem:[%s5625_s1 + $0x38] sm:$0xff] (!%p225_p3)   ;;  %vm1544_vm2 = vcmask (!%p225_p3), 1041408   ;;  %v4402_v11 = vmov (!%p225_p3), 65535   ;;  %v4179_v13 = vld [vmem:[%s5625_s1 + $0x40] sm:$0xff] (!%p225_p3)   ;;  %vm313_vm3 = vcmask (!%p225_p3), 523264  }
   0x9   : > { %1552 = vmatprep.subr.bf16.mxu0 (!%p225_p3), %v4401_v1  ;;  %4125 = vmatprep.subr.bf16.mxu1 (!%p225_p3), %v4401_v1  ;;  %v1545_v12 = vsel (!%p225_p3), %vm1543_vm1, 4294967295, %v4402_v11  ;;  %v4180_v14 = vld [vmem:[%s5625_s1 + $0x48] ss:$0 sps:$4 sm:$0x33] (!%p225_p3)   ;;  %v4403_v59 = vmov (!%p225_p3), 0.0   ;;  %vm3393_vm4 = vcmask (!%p225_p3), 519168  }
   0xa   : > { %v1546_v15 = vsel (!%p225_p3), %vm1544_vm2, %v1545_v12, 0  ;;  %314 = vst.msk [vmem:[#allocation2] sm:$0xff] (!%p225_p3), %vm313_vm3, %v4403_v59  ;;  %315 = vst.msk [vmem:[#allocation2 + $0x8] sm:$0xff] (!%p225_p3), %vm313_vm3, %v4403_v59 }
   0xb   : > { %v1548_v16 = vand.u32 (!%p225_p3), %v4180_v14, %v1546_v15  ;;  %316 = vst.msk [vmem:[#allocation2 + $0x10] sm:$0xff] (!%p225_p3), %vm313_vm3, %v4403_v59  ;;  %317 = vst.msk [vmem:[#allocation2 + $0x18] sm:$0xff] (!%p225_p3), %vm313_vm3, %v4403_v59 }
   0xc   : > { %1553 = vmatpush1.bf16.msra.mxu0 (!%p225_p3), %v4172_v2  ;;  %4135 = vmatpush1.bf16.msra.mxu1 (!%p225_p3), %v4172_v2  ;;  %318 = vst.msk [vmem:[#allocation2 + $0x20] sm:$0xff] (!%p225_p3), %vm313_vm3, %v4403_v59  ;;  %319 = vst.msk [vmem:[#allocation2 + $0x28] sm:$0xff] (!%p225_p3), %vm313_vm3, %v4403_v59 }
   0xd   : > { %1554 = vmatprep.subr.bf16.mxu0 (!%p225_p3), %v4401_v1  ;;  %4126 = vmatprep.subr.bf16.mxu1 (!%p225_p3), %v4401_v1  ;;  %320 = vst.msk [vmem:[#allocation2 + $0x30] sm:$0xff] (!%p225_p3), %vm313_vm3, %v4403_v59  ;;  %321 = vst.msk [vmem:[#allocation2 + $0x38] sm:$0xff] (!%p225_p3), %vm313_vm3, %v4403_v59 }
   0xe   : > { %s5634_s25 = smov (!%p274_p4, %s3656_s25), 255  ;;  %322 = vst.msk [vmem:[#allocation2 + $0x40] sm:$0xff] %vm313_vm3, %v4403_v59  ;;  %323 = vst.msk [vmem:[#allocation2 + $0x48] sm:$0xff] %vm313_vm3, %v4403_v59 }
   0xf   : > { %s3995_s28 = sshll.u32 %s5634_s25, 3  ;;  %324 = vst.msk [vmem:[#allocation2 + $0x50] sm:$0xff] %vm313_vm3, %v4403_v59  ;;  %325 = vst.msk [vmem:[#allocation2 + $0x58] sm:$0xff] %vm313_vm3, %v4403_v59  ;;  %s3660_s26 = sshll.u32 %s5634_s25, 2 }
  0x10   : > { %1555 = vmatpush1.bf16.msra.mxu0 %v4173_v3  ;;  %4136 = vmatpush1.bf16.msra.mxu1 %v4173_v3  ;;  %s4465_s5 = scalar_lea.vmem %s5624_s0, %s3995_s28  ;;  %326 = vst.msk [vmem:[#allocation2 + $0x60] sm:$0xff] %vm313_vm3, %v4403_v59  ;;  %327 = vst.msk [vmem:[#allocation2 + $0x68] sm:$0xff] %vm313_vm3, %v4403_v59  ;;  %s4955_s28 = scalar_lea.vmem %s5628_s4, %s3660_s26 }
  0x11   : > { %1556 = vmatprep.subr.bf16.mxu0 %v4401_v1  ;;  %4127 = vmatprep.subr.bf16.mxu1 %v4401_v1  ;;  %v4183_v6 = vld [vmem:[%s4465_s5 + $0x4] ss:$8 sps:$4 sm:$0xff]   ;;  %v4181_v17 = vld [vmem:[%s4465_s5] ss:$8 sps:$4 sm:$0xff]   ;;  %v4187_v19 = vld [vmem:[%s4465_s5 + $0x14] ss:$8 sps:$4 sm:$0xff]  }
  0x12   : > { %v4186_v7 = vld [vmem:[%s4465_s5 + $0x204] ss:$8 sps:$4 sm:$0xff]   ;;  %3799 = vmatprep.mubr.msk.bf16.mxu0 %vm1350_vm0, %v4183_v6  ;;  %v4184_v18 = vld [vmem:[%s4465_s5 + $0x200] ss:$8 sps:$4 sm:$0xff]   ;;  %v4189_v20 = vld [vmem:[%s4465_s5 + $0x214] ss:$8 sps:$4 sm:$0xff]  }
  0x13   : > { %3831 = vmatprep.mubr.msk.bf16.mxu1 %vm1350_vm0, %v4186_v7  ;;  %v4191_v21 = vld [vmem:[%s4465_s5 + $0x10] ss:$8 sps:$4 sm:$0xff]   ;;  %v4193_v23 = vld [vmem:[%s4465_s5 + $0x24] ss:$8 sps:$4 sm:$0xff]   ;;  %v4197_v25 = vld [vmem:[%s4465_s5 + $0x20] ss:$8 sps:$4 sm:$0xff]  }
  0x14   : > { %1557 = vmatpush1.bf16.msra.mxu0 %v4174_v4  ;;  %4137 = vmatpush1.bf16.msra.mxu1 %v4174_v4  ;;  %v4192_v22 = vld [vmem:[%s4465_s5 + $0x210] ss:$8 sps:$4 sm:$0xff]   ;;  %v4195_v24 = vld [vmem:[%s4465_s5 + $0x224] ss:$8 sps:$4 sm:$0xff]   ;;  %v4198_v26 = vld [vmem:[%s4465_s5 + $0x220] ss:$8 sps:$4 sm:$0xff]  }
  0x15   : > { %1558 = vmatprep.subr.bf16.mxu0 %v4401_v1  ;;  %4128 = vmatprep.subr.bf16.mxu1 %v4401_v1  ;;  %v4199_v27 = vld [vmem:[%s4465_s5 + $0x34] ss:$8 sps:$4 sm:$0xff]   ;;  %v4203_v29 = vld [vmem:[%s4465_s5 + $0x30] ss:$8 sps:$4 sm:$0xff]   ;;  %v4205_v31 = vld [vmem:[%s4465_s5 + $0x44] ss:$8 sps:$4 sm:$0xff]  }
  0x16   : > { %v4201_v28 = vld [vmem:[%s4465_s5 + $0x234] ss:$8 sps:$4 sm:$0xff]   ;;  %v4204_v30 = vld [vmem:[%s4465_s5 + $0x230] ss:$8 sps:$4 sm:$0xff]   ;;  %v4207_v32 = vld [vmem:[%s4465_s5 + $0x244] ss:$8 sps:$4 sm:$0xff]  }
  0x17   : > { %v4209_v33 = vld [vmem:[%s4465_s5 + $0x40] ss:$8 sps:$4 sm:$0xff]   ;;  %v4211_v35 = vld [vmem:[%s4465_s5 + $0x54] ss:$8 sps:$4 sm:$0xff]   ;;  %v4215_v37 = vld [vmem:[%s4465_s5 + $0x50] ss:$8 sps:$4 sm:$0xff]  }
  0x18   : > { %1559 = vmatpush1.bf16.msra.mxu0 %v4175_v5  ;;  %4138 = vmatpush1.bf16.msra.mxu1 %v4175_v5  ;;  %v4210_v34 = vld [vmem:[%s4465_s5 + $0x240] ss:$8 sps:$4 sm:$0xff]   ;;  %v4213_v36 = vld [vmem:[%s4465_s5 + $0x254] ss:$8 sps:$4 sm:$0xff]   ;;  %v4216_v38 = vld [vmem:[%s4465_s5 + $0x250] ss:$8 sps:$4 sm:$0xff]  }
  0x19   : > { %1560 = vmatprep.subr.bf16.mxu0 %v4401_v1  ;;  %4129 = vmatprep.subr.bf16.mxu1 %v4401_v1  ;;  %v4217_v39 = vld [vmem:[%s4465_s5 + $0x64] ss:$8 sps:$4 sm:$0xff]   ;;  %v4221_v41 = vld [vmem:[%s4465_s5 + $0x60] ss:$8 sps:$4 sm:$0xff]   ;;  %v4223_v43 = vld [vmem:[%s4465_s5 + $0x74] ss:$8 sps:$4 sm:$0xff]  }
  0x1a   : > { %v4219_v40 = vld [vmem:[%s4465_s5 + $0x264] ss:$8 sps:$4 sm:$0xff]   ;;  %v4222_v42 = vld [vmem:[%s4465_s5 + $0x260] ss:$8 sps:$4 sm:$0xff]   ;;  %v4225_v44 = vld [vmem:[%s4465_s5 + $0x274] ss:$8 sps:$4 sm:$0xff]  }
  0x1b   : > { %v4227_v45 = vld [vmem:[%s4465_s5 + $0x70] ss:$8 sps:$4 sm:$0xff]   ;;  %v4229_v47 = vld [vmem:[%s4465_s5 + $0x84] ss:$8 sps:$4 sm:$0xff]   ;;  %v4233_v49 = vld [vmem:[%s4465_s5 + $0x80] ss:$8 sps:$4 sm:$0xff]  }
  0x1c   : > { %1561 = vmatpush1.bf16.msra.mxu0 %v4176_v8  ;;  %4139 = vmatpush1.bf16.msra.mxu1 %v4176_v8  ;;  %v4228_v46 = vld [vmem:[%s4465_s5 + $0x270] ss:$8 sps:$4 sm:$0xff]   ;;  %v4231_v48 = vld [vmem:[%s4465_s5 + $0x284] ss:$8 sps:$4 sm:$0xff]   ;;  %v4234_v50 = vld [vmem:[%s4465_s5 + $0x280] ss:$8 sps:$4 sm:$0xff]  }
  0x1d   : > { %1562 = vmatprep.subr.bf16.mxu0 %v4401_v1  ;;  %4130 = vmatprep.subr.bf16.mxu1 %v4401_v1  ;;  %v4235_v51 = vld [vmem:[%s4465_s5 + $0x94] ss:$8 sps:$4 sm:$0xff]   ;;  %v4239_v53 = vld [vmem:[%s4465_s5 + $0x90] ss:$8 sps:$4 sm:$0xff]   ;;  %v4241_v55 = vld [vmem:[%s4465_s5 + $0xa4] ss:$8 sps:$4 sm:$0xff]  }
  0x1e   : > { %v4237_v52 = vld [vmem:[%s4465_s5 + $0x294] ss:$8 sps:$4 sm:$0xff]   ;;  %v4240_v54 = vld [vmem:[%s4465_s5 + $0x290] ss:$8 sps:$4 sm:$0xff]   ;;  %v4243_v56 = vld [vmem:[%s4465_s5 + $0x2a4] ss:$8 sps:$4 sm:$0xff]  }
  0x1f   : > { %v4550_v57 = vld [vmem:[%s4465_s5 + $0xa0] ss:$8 sps:$4 sm:$0xff]   ;;  %328 = vst.msk [vmem:[#allocation2 + $0x70] sm:$0xff] %vm313_vm3, %v4403_v59  ;;  %329 = vst.msk [vmem:[#allocation2 + $0x78] sm:$0xff] %vm313_vm3, %v4403_v59  ;;  %v4247_v60 = vld [vmem:[%s4465_s5 + $0xb4] ss:$8 sps:$4 sm:$0xff]  }
  0x20   : > { %1563 = vmatpush1.bf16.msra.mxu0 %v4177_v9  ;;  %4140 = vmatpush1.bf16.msra.mxu1 %v4177_v9  ;;  %v4553_v58 = vld [vmem:[%s4465_s5 + $0x2a0] ss:$8 sps:$4 sm:$0xff]   ;;  %330 = vst.msk [vmem:[#allocation2 + $0x80] sm:$0xff] %vm313_vm3, %v4403_v59  ;;  %331 = vst.msk [vmem:[#allocation2 + $0x88] sm:$0xff] %vm313_vm3, %v4403_v59  ;;  %v4249_v61 = vld [vmem:[%s4465_s5 + $0x2b4] ss:$8 sps:$4 sm:$0xff]  }
  0x21   : > { %1564 = vmatprep.subr.bf16.mxu0 %v4401_v1  ;;  %4131 = vmatprep.subr.bf16.mxu1 %v4401_v1  ;;  %332 = vst.msk [vmem:[#allocation2 + $0x90] sm:$0xff] %vm313_vm3, %v4403_v59  ;;  %333 = vst.msk [vmem:[#allocation2 + $0x98] sm:$0xff] %vm313_vm3, %v4403_v59  ;;  %v4251_v62 = vld [vmem:[%s4465_s5 + $0xb0] ss:$8 sps:$4 sm:$0xff]   ;;  %v4253_v0 = vld [vmem:[%s4465_s5 + $0xc4] ss:$8 sps:$4 sm:$0xff]  }
  0x22   : > { %334 = vst.msk [vmem:[#allocation2 + $0xa0] sm:$0xff] %vm313_vm3, %v4403_v59  ;;  %335 = vst.msk [vmem:[#allocation2 + $0xa8] sm:$0xff] %vm313_vm3, %v4403_v59  ;;  %v4252_v63 = vld [vmem:[%s4465_s5 + $0x2b0] ss:$8 sps:$4 sm:$0xff]   ;;  %v4257_v2 = vld [vmem:[%s4465_s5 + $0xc0] ss:$8 sps:$4 sm:$0xff]  }
  0x23   : > { %336 = vst.msk [vmem:[#allocation2 + $0xb0] sm:$0xff] %vm313_vm3, %v4403_v59  ;;  %337 = vst.msk [vmem:[#allocation2 + $0xb8] sm:$0xff] %vm313_vm3, %v4403_v59  ;;  %v4258_v3 = vld [vmem:[%s4465_s5 + $0x2c0] ss:$8 sps:$4 sm:$0xff]   ;;  %v4259_v4 = vld [vmem:[%s4465_s5 + $0xd4] ss:$8 sps:$4 sm:$0xff]  }
  0x24   : > { %1565 = vmatpush1.bf16.msra.mxu0 %v4178_v10  ;;  %4141 = vmatpush1.bf16.msra.mxu1 %v4178_v10  ;;  %338 = vst.msk [vmem:[#allocation2 + $0xc0] sm:$0xff] %vm313_vm3, %v4403_v59  ;;  %339 = vst.msk [vmem:[#allocation2 + $0xc8] sm:$0xff] %vm313_vm3, %v4403_v59  ;;  %v4261_v5 = vld [vmem:[%s4465_s5 + $0x2d4] ss:$8 sps:$4 sm:$0xff]   ;;  %v4263_v6 = vld [vmem:[%s4465_s5 + $0xd0] ss:$8 sps:$4 sm:$0xff]  }
  0x25   : > { %1566 = vmatprep.subr.bf16.mxu0 %v4401_v1  ;;  %4132 = vmatprep.subr.bf16.mxu1 %v4401_v1  ;;  %340 = vst.msk [vmem:[#allocation2 + $0xd0] sm:$0xff] %vm313_vm3, %v4403_v59  ;;  %341 = vst.msk [vmem:[#allocation2 + $0xd8] sm:$0xff] %vm313_vm3, %v4403_v59  ;;  %v4264_v7 = vld [vmem:[%s4465_s5 + $0x2d0] ss:$8 sps:$4 sm:$0xff]   ;;  %v4265_v8 = vld [vmem:[%s4465_s5 + $0xe4] ss:$8 sps:$4 sm:$0xff]  }
  0x26   : > { %342 = vst.msk [vmem:[#allocation2 + $0xe0] sm:$0xff] %vm313_vm3, %v4403_v59  ;;  %343 = vst.msk [vmem:[#allocation2 + $0xe8] sm:$0xff] %vm313_vm3, %v4403_v59  ;;  %v4267_v9 = vld [vmem:[%s4465_s5 + $0x2e4] ss:$8 sps:$4 sm:$0xff]   ;;  %v4269_v10 = vld [vmem:[%s4465_s5 + $0xe0] ss:$8 sps:$4 sm:$0xff]  }
  0x27   : > { %344 = vst.msk [vmem:[#allocation2 + $0xf0] sm:$0xff] %vm313_vm3, %v4403_v59  ;;  %345 = vst.msk [vmem:[#allocation2 + $0xf8] sm:$0xff] %vm313_vm3, %v4403_v59  ;;  %v4270_v11 = vld [vmem:[%s4465_s5 + $0x2e0] ss:$8 sps:$4 sm:$0xff]   ;;  %v4271_v12 = vld [vmem:[%s4465_s5 + $0xf4] ss:$8 sps:$4 sm:$0xff]  }
  0x28   : > { %1567 = vmatpush1.bf16.msra.mxu0 %v4179_v13  ;;  %4142 = vmatpush1.bf16.msra.mxu1 %v4179_v13  ;;  %346 = vst.msk [vmem:[#allocation2 + $0x100] sm:$0xff] %vm313_vm3, %v4403_v59  ;;  %347 = vst.msk [vmem:[#allocation2 + $0x108] sm:$0xff] %vm313_vm3, %v4403_v59  ;;  %v4273_v13 = vld [vmem:[%s4465_s5 + $0x2f4] ss:$8 sps:$4 sm:$0xff]   ;;  %v4275_v14 = vld [vmem:[%s4465_s5 + $0xf0] ss:$8 sps:$4 sm:$0xff]  }
  0x29   : > { %1568 = vmatprep.subr.bf16.mxu0 %v4401_v1  ;;  %4133 = vmatprep.subr.bf16.mxu1 %v4401_v1  ;;  %348 = vst.msk [vmem:[#allocation2 + $0x110] sm:$0xff] %vm313_vm3, %v4403_v59  ;;  %349 = vst.msk [vmem:[#allocation2 + $0x118] sm:$0xff] %vm313_vm3, %v4403_v59  ;;  %v4255_v1 = vld [vmem:[%s4465_s5 + $0x2c4] ss:$8 sps:$4 sm:$0xff]   ;;  %v4276_v15 = vld [vmem:[%s4465_s5 + $0x2f0] ss:$8 sps:$4 sm:$0xff]  }
  0x2a   : > { %350 = vst.msk [vmem:[#allocation2 + $0x120] sm:$0xff] %vm313_vm3, %v4403_v59  ;;  %351 = vst.msk [vmem:[#allocation2 + $0x128] sm:$0xff] %vm313_vm3, %v4403_v59 }
  0x2b   : > { %352 = vst.msk [vmem:[#allocation2 + $0x130] sm:$0xff] %vm313_vm3, %v4403_v59  ;;  %353 = vst.msk [vmem:[#allocation2 + $0x138] sm:$0xff] %vm313_vm3, %v4403_v59 }
  0x2c   : > { %1569 = vmatpush1.bf16.msra.mxu0 %v1548_v16  ;;  %4143 = vmatpush1.bf16.msra.mxu1 %v1548_v16  ;;  %354 = vst.msk [vmem:[#allocation2 + $0x140] sm:$0xff] %vm313_vm3, %v4403_v59  ;;  %355 = vst.msk [vmem:[#allocation2 + $0x148] sm:$0xff] %vm313_vm3, %v4403_v59  ;;  %v4277_v16 = vld [vmem:[%s4465_s5 + $0x104] ss:$8 sps:$4 sm:$0xff]  }
  0x2d   : > { %356 = vst.msk [vmem:[#allocation2 + $0x150] sm:$0xff] %vm313_vm3, %v4403_v59  ;;  %357 = vst.msk [vmem:[#allocation2 + $0x158] sm:$0xff] %vm313_vm3, %v4403_v59 }
  0x2e   : > { %358 = vst.msk [vmem:[#allocation2 + $0x160] sm:$0xff] %vm313_vm3, %v4403_v59  ;;  %359 = vst.msk [vmem:[#allocation2 + $0x168] sm:$0xff] %vm313_vm3, %v4403_v59 }
  0x2f   : > { %1583 = vmatmul.mubr.bf16.vlgmr.msra.gmra.mrb[0].mxu0 %v4181_v17  ;;  %1839 = vmatmul.mubr.bf16.vlgmr.msra.gmra.mrb[0].mxu1 %v4184_v18  ;;  %360 = vst.msk [vmem:[#allocation2 + $0x170] sm:$0xff] %vm313_vm3, %v4403_v59  ;;  %361 = vst.msk [vmem:[#allocation2 + $0x178] sm:$0xff] %vm313_vm3, %v4403_v59  ;;  %v4279_v17 = vld [vmem:[%s4465_s5 + $0x304] ss:$8 sps:$4 sm:$0xff]   ;;  %v4281_v18 = vld [vmem:[%s4465_s5 + $0x100] ss:$8 sps:$4 sm:$0xff]  }
  0x30   : > { %3800 = vmatprep.mubr.msk.bf16.mxu0 %vm1350_vm0, %v4187_v19  ;;  %3832 = vmatprep.mubr.msk.bf16.mxu1 %vm1350_vm0, %v4189_v20  ;;  %362 = vst.msk [vmem:[#allocation2 + $0x180] sm:$0xff] %vm313_vm3, %v4403_v59  ;;  %363 = vst.msk [vmem:[#allocation2 + $0x188] sm:$0xff] %vm313_vm3, %v4403_v59  ;;  %v4282_v19 = vld [vmem:[%s4465_s5 + $0x300] ss:$8 sps:$4 sm:$0xff]   ;;  %v4283_v20 = vld [vmem:[%s4465_s5 + $0x114] ss:$8 sps:$4 sm:$0xff]  }
  0x31   : > { %364 = vst.msk [vmem:[#allocation2 + $0x190] sm:$0xff] %vm313_vm3, %v4403_v59  ;;  %365 = vst.msk [vmem:[#allocation2 + $0x198] sm:$0xff] %vm313_vm3, %v4403_v59 }
  0x32   : > { %366 = vst.msk [vmem:[#allocation2 + $0x1a0] sm:$0xff] %vm313_vm3, %v4403_v59  ;;  %367 = vst.msk [vmem:[#allocation2 + $0x1a8] sm:$0xff] %vm313_vm3, %v4403_v59 }
  0x33   : > { %368 = vst.msk [vmem:[#allocation2 + $0x1b0] sm:$0xff] %vm313_vm3, %v4403_v59  ;;  %369 = vst.msk [vmem:[#allocation2 + $0x1b8] sm:$0xff] %vm313_vm3, %v4403_v59 }
  0x34   : > { %370 = vst.msk [vmem:[#allocation2 + $0x1c0] sm:$0xff] %vm313_vm3, %v4403_v59  ;;  %371 = vst.msk [vmem:[#allocation2 + $0x1c8] sm:$0xff] %vm313_vm3, %v4403_v59 }
  0x35   : > { %372 = vst.msk [vmem:[#allocation2 + $0x1d0] sm:$0xff] %vm313_vm3, %v4403_v59  ;;  %373 = vst.msk [vmem:[#allocation2 + $0x1d8] sm:$0xff] %vm313_vm3, %v4403_v59 }
  0x36   : > { %374 = vst.msk [vmem:[#allocation2 + $0x1e0] sm:$0xff] %vm313_vm3, %v4403_v59  ;;  %375 = vst.msk [vmem:[#allocation2 + $0x1e8] sm:$0xff] %vm313_vm3, %v4403_v59 }
  0x37   : > { %1591 = vmatmul.mubr.bf16.gmra.mrb[4].mxu0 %v4191_v21  ;;  %1847 = vmatmul.mubr.bf16.gmra.mrb[4].mxu1 %v4192_v22  ;;  %376 = vst.msk [vmem:[#allocation2 + $0x1f0] sm:$0xff] %vm313_vm3, %v4403_v59  ;;  %377 = vst.msk [vmem:[#allocation2 + $0x1f8] sm:$0xff] %vm313_vm3, %v4403_v59  ;;  %v4285_v21 = vld [vmem:[%s4465_s5 + $0x314] ss:$8 sps:$4 sm:$0xff]   ;;  %v4287_v22 = vld [vmem:[%s4465_s5 + $0x110] ss:$8 sps:$4 sm:$0xff]  }
  0x38   : > { %3801 = vmatprep.mubr.msk.bf16.mxu0 %vm1350_vm0, %v4193_v23  ;;  %3833 = vmatprep.mubr.msk.bf16.mxu1 %vm1350_vm0, %v4195_v24  ;;  %378 = vst.msk [vmem:[#allocation2 + $0x200] sm:$0xff] %vm313_vm3, %v4403_v59  ;;  %379 = vst.msk [vmem:[#allocation2 + $0x208] sm:$0xff] %vm313_vm3, %v4403_v59  ;;  %v4288_v23 = vld [vmem:[%s4465_s5 + $0x310] ss:$8 sps:$4 sm:$0xff]   ;;  %v4289_v24 = vld [vmem:[%s4465_s5 + $0x124] ss:$8 sps:$4 sm:$0xff]  }
  0x39   : > { %380 = vst.msk [vmem:[#allocation2 + $0x210] sm:$0xff] %vm313_vm3, %v4403_v59  ;;  %381 = vst.msk [vmem:[#allocation2 + $0x218] sm:$0xff] %vm313_vm3, %v4403_v59 }
  0x3a   : > { %382 = vst.msk [vmem:[#allocation2 + $0x220] sm:$0xff] %vm313_vm3, %v4403_v59  ;;  %383 = vst.msk [vmem:[#allocation2 + $0x228] sm:$0xff] %vm313_vm3, %v4403_v59 }
  0x3b   : > { %384 = vst.msk [vmem:[#allocation2 + $0x230] sm:$0xff] %vm313_vm3, %v4403_v59  ;;  %385 = vst.msk [vmem:[#allocation2 + $0x238] sm:$0xff] %vm313_vm3, %v4403_v59 }
  0x3c   : > { %386 = vst.msk [vmem:[#allocation2 + $0x240] sm:$0xff] %vm313_vm3, %v4403_v59  ;;  %387 = vst.msk [vmem:[#allocation2 + $0x248] sm:$0xff] %vm313_vm3, %v4403_v59 }
  0x3d   : > { %388 = vst.msk [vmem:[#allocation2 + $0x250] sm:$0xff] %vm313_vm3, %v4403_v59  ;;  %389 = vst.msk [vmem:[#allocation2 + $0x258] sm:$0xff] %vm313_vm3, %v4403_v59 }
  0x3e   : > { %390 = vst.msk [vmem:[#allocation2 + $0x260] sm:$0xff] %vm313_vm3, %v4403_v59  ;;  %391 = vst.msk [vmem:[#allocation2 + $0x268] sm:$0xff] %vm313_vm3, %v4403_v59 }
  0x3f   : > { %1599 = vmatmul.mubr.bf16.gmra.mrb[8].mxu0 %v4197_v25  ;;  %1855 = vmatmul.mubr.bf16.gmra.mrb[8].mxu1 %v4198_v26  ;;  %392 = vst.msk [vmem:[#allocation2 + $0x270] sm:$0xff] %vm313_vm3, %v4403_v59  ;;  %393 = vst.msk [vmem:[#allocation2 + $0x278] sm:$0xff] %vm313_vm3, %v4403_v59  ;;  %v4291_v25 = vld [vmem:[%s4465_s5 + $0x324] ss:$8 sps:$4 sm:$0xff]   ;;  %v4293_v26 = vld [vmem:[%s4465_s5 + $0x120] ss:$8 sps:$4 sm:$0xff]  }
  0x40   : > { %3802 = vmatprep.mubr.msk.bf16.mxu0 %vm1350_vm0, %v4199_v27  ;;  %3834 = vmatprep.mubr.msk.bf16.mxu1 %vm1350_vm0, %v4201_v28  ;;  %394 = vst.msk [vmem:[#allocation2 + $0x280] sm:$0xff] %vm313_vm3, %v4403_v59  ;;  %395 = vst.msk [vmem:[#allocation2 + $0x288] sm:$0xff] %vm313_vm3, %v4403_v59  ;;  %v4294_v27 = vld [vmem:[%s4465_s5 + $0x320] ss:$8 sps:$4 sm:$0xff]   ;;  %v4295_v28 = vld [vmem:[%s4465_s5 + $0x134] ss:$8 sps:$4 sm:$0xff]  }
  0x41   : > { %396 = vst.msk [vmem:[#allocation2 + $0x290] sm:$0xff] %vm313_vm3, %v4403_v59  ;;  %397 = vst.msk [vmem:[#allocation2 + $0x298] sm:$0xff] %vm313_vm3, %v4403_v59 }
  0x42   : > { %398 = vst.msk [vmem:[#allocation2 + $0x2a0] sm:$0xff] %vm313_vm3, %v4403_v59  ;;  %399 = vst.msk [vmem:[#allocation2 + $0x2a8] sm:$0xff] %vm313_vm3, %v4403_v59 }
  0x43   : > { %400 = vst.msk [vmem:[#allocation2 + $0x2b0] sm:$0xff] %vm313_vm3, %v4403_v59  ;;  %401 = vst.msk [vmem:[#allocation2 + $0x2b8] sm:$0xff] %vm313_vm3, %v4403_v59 }
  0x44   : > { %402 = vst.msk [vmem:[#allocation2 + $0x2c0] sm:$0xff] %vm313_vm3, %v4403_v59  ;;  %403 = vst.msk [vmem:[#allocation2 + $0x2c8] sm:$0xff] %vm313_vm3, %v4403_v59 }
  0x45   : > { %404 = vst.msk [vmem:[#allocation2 + $0x2d0] sm:$0xff] %vm313_vm3, %v4403_v59  ;;  %405 = vst.msk [vmem:[#allocation2 + $0x2d8] sm:$0xff] %vm313_vm3, %v4403_v59 }
  0x46   : > { %406 = vst.msk [vmem:[#allocation2 + $0x2e0] sm:$0xff] %vm313_vm3, %v4403_v59  ;;  %407 = vst.msk [vmem:[#allocation2 + $0x2e8] sm:$0xff] %vm313_vm3, %v4403_v59 }
  0x47   : > { %1607 = vmatmul.mubr.bf16.gmra.mrb[12].mxu0 %v4203_v29  ;;  %1863 = vmatmul.mubr.bf16.gmra.mrb[12].mxu1 %v4204_v30  ;;  %408 = vst.msk [vmem:[#allocation2 + $0x2f0] sm:$0xff] %vm313_vm3, %v4403_v59  ;;  %409 = vst.msk [vmem:[#allocation2 + $0x2f8] sm:$0xff] %vm313_vm3, %v4403_v59  ;;  %v4297_v29 = vld [vmem:[%s4465_s5 + $0x334] ss:$8 sps:$4 sm:$0xff]   ;;  %v4299_v30 = vld [vmem:[%s4465_s5 + $0x130] ss:$8 sps:$4 sm:$0xff]  }
  0x48   : > { %3803 = vmatprep.mubr.msk.bf16.mxu0 %vm1350_vm0, %v4205_v31  ;;  %3835 = vmatprep.mubr.msk.bf16.mxu1 %vm1350_vm0, %v4207_v32  ;;  %410 = vst.msk [vmem:[#allocation2 + $0x300] sm:$0xff] %vm313_vm3, %v4403_v59  ;;  %411 = vst.msk [vmem:[#allocation2 + $0x308] sm:$0xff] %vm313_vm3, %v4403_v59  ;;  %v4300_v31 = vld [vmem:[%s4465_s5 + $0x330] ss:$8 sps:$4 sm:$0xff]   ;;  %v4301_v32 = vld [vmem:[%s4465_s5 + $0x144] ss:$8 sps:$4 sm:$0xff]  }
  0x49   : > { %412 = vst.msk [vmem:[#allocation2 + $0x310] sm:$0xff] %vm313_vm3, %v4403_v59  ;;  %413 = vst.msk [vmem:[#allocation2 + $0x318] sm:$0xff] %vm313_vm3, %v4403_v59 }
  0x4a   : > { %414 = vst.msk [vmem:[#allocation2 + $0x320] sm:$0xff] %vm313_vm3, %v4403_v59  ;;  %415 = vst.msk [vmem:[#allocation2 + $0x328] sm:$0xff] %vm313_vm3, %v4403_v59 }
  0x4b   : > { %416 = vst.msk [vmem:[#allocation2 + $0x330] sm:$0xff] %vm313_vm3, %v4403_v59  ;;  %417 = vst.msk [vmem:[#allocation2 + $0x338] sm:$0xff] %vm313_vm3, %v4403_v59 }
  0x4c   : > { %418 = vst.msk [vmem:[#allocation2 + $0x340] sm:$0xff] %vm313_vm3, %v4403_v59  ;;  %419 = vst.msk [vmem:[#allocation2 + $0x348] sm:$0xff] %vm313_vm3, %v4403_v59 }
  0x4d   : > { %420 = vst.msk [vmem:[#allocation2 + $0x350] sm:$0xff] %vm313_vm3, %v4403_v59  ;;  %421 = vst.msk [vmem:[#allocation2 + $0x358] sm:$0xff] %vm313_vm3, %v4403_v59 }
  0x4e   : > { %422 = vst.msk [vmem:[#allocation2 + $0x360] sm:$0xff] %vm313_vm3, %v4403_v59  ;;  %423 = vst.msk [vmem:[#allocation2 + $0x368] sm:$0xff] %vm313_vm3, %v4403_v59 }
  0x4f   : > { %1615 = vmatmul.mubr.bf16.gmra.mrb[16].mxu0 %v4209_v33  ;;  %1871 = vmatmul.mubr.bf16.gmra.mrb[16].mxu1 %v4210_v34  ;;  %424 = vst.msk [vmem:[#allocation2 + $0x370] sm:$0xff] %vm313_vm3, %v4403_v59  ;;  %425 = vst.msk [vmem:[#allocation2 + $0x378] sm:$0xff] %vm313_vm3, %v4403_v59  ;;  %v4303_v33 = vld [vmem:[%s4465_s5 + $0x344] ss:$8 sps:$4 sm:$0xff]   ;;  %v4305_v34 = vld [vmem:[%s4465_s5 + $0x140] ss:$8 sps:$4 sm:$0xff]  }
  0x50   : > { %3804 = vmatprep.mubr.msk.bf16.mxu0 %vm1350_vm0, %v4211_v35  ;;  %3836 = vmatprep.mubr.msk.bf16.mxu1 %vm1350_vm0, %v4213_v36  ;;  %426 = vst.msk [vmem:[#allocation2 + $0x380] sm:$0xff] %vm313_vm3, %v4403_v59  ;;  %427 = vst.msk [vmem:[#allocation2 + $0x388] sm:$0xff] %vm313_vm3, %v4403_v59  ;;  %v4306_v35 = vld [vmem:[%s4465_s5 + $0x340] ss:$8 sps:$4 sm:$0xff]   ;;  %v4307_v36 = vld [vmem:[%s4465_s5 + $0x154] ss:$8 sps:$4 sm:$0xff]  }
  0x51   : > { %428 = vst.msk [vmem:[#allocation2 + $0x390] sm:$0xff] %vm313_vm3, %v4403_v59  ;;  %429 = vst.msk [vmem:[#allocation2 + $0x398] sm:$0xff] %vm313_vm3, %v4403_v59 }
  0x52   : > { %430 = vst.msk [vmem:[#allocation2 + $0x3a0] sm:$0xff] %vm313_vm3, %v4403_v59  ;;  %431 = vst.msk [vmem:[#allocation2 + $0x3a8] sm:$0xff] %vm313_vm3, %v4403_v59 }
  0x53   : > { %432 = vst.msk [vmem:[#allocation2 + $0x3b0] sm:$0xff] %vm313_vm3, %v4403_v59  ;;  %433 = vst.msk [vmem:[#allocation2 + $0x3b8] sm:$0xff] %vm313_vm3, %v4403_v59 }
  0x54   : > { %434 = vst.msk [vmem:[#allocation2 + $0x3c0] sm:$0xff] %vm313_vm3, %v4403_v59  ;;  %435 = vst.msk [vmem:[#allocation2 + $0x3c8] sm:$0xff] %vm313_vm3, %v4403_v59 }
  0x55   : > { %436 = vst.msk [vmem:[#allocation2 + $0x3d0] sm:$0xff] %vm313_vm3, %v4403_v59  ;;  %437 = vst.msk [vmem:[#allocation2 + $0x3d8] sm:$0xff] %vm313_vm3, %v4403_v59 }
  0x56   : > { %438 = vst.msk [vmem:[#allocation2 + $0x3e0] sm:$0xff] %vm313_vm3, %v4403_v59  ;;  %439 = vst.msk [vmem:[#allocation2 + $0x3e8] sm:$0xff] %vm313_vm3, %v4403_v59 }
  0x57   : > { %1623 = vmatmul.mubr.bf16.gmra.mrb[20].mxu0 %v4215_v37  ;;  %1879 = vmatmul.mubr.bf16.gmra.mrb[20].mxu1 %v4216_v38  ;;  %440 = vst.msk [vmem:[#allocation2 + $0x3f0] sm:$0xff] %vm313_vm3, %v4403_v59  ;;  %441 = vst.msk [vmem:[#allocation2 + $0x3f8] sm:$0xff] %vm313_vm3, %v4403_v59  ;;  %v4309_v37 = vld [vmem:[%s4465_s5 + $0x354] ss:$8 sps:$4 sm:$0xff]   ;;  %v4311_v38 = vld [vmem:[%s4465_s5 + $0x150] ss:$8 sps:$4 sm:$0xff]  }
  0x58   : > { %3805 = vmatprep.mubr.msk.bf16.mxu0 %vm1350_vm0, %v4217_v39  ;;  %3837 = vmatprep.mubr.msk.bf16.mxu1 %vm1350_vm0, %v4219_v40  ;;  %v4312_v39 = vld [vmem:[%s4465_s5 + $0x350] ss:$8 sps:$4 sm:$0xff]   ;;  %v4313_v40 = vld [vmem:[%s4465_s5 + $0x164] ss:$8 sps:$4 sm:$0xff]   ;;  %v4342_v59 = vld [vmem:[%s4465_s5 + $0x3a0] ss:$8 sps:$4 sm:$0xff]  }
  0x5f   : > { %1631 = vmatmul.mubr.bf16.gmra.mrb[24].mxu0 %v4221_v41  ;;  %1887 = vmatmul.mubr.bf16.gmra.mrb[24].mxu1 %v4222_v42  ;;  %v4315_v41 = vld [vmem:[%s4465_s5 + $0x364] ss:$8 sps:$4 sm:$0xff]   ;;  %v4317_v42 = vld [vmem:[%s4465_s5 + $0x160] ss:$8 sps:$4 sm:$0xff]  }
  0x60   : > { %3806 = vmatprep.mubr.msk.bf16.mxu0 %vm1350_vm0, %v4223_v43  ;;  %3838 = vmatprep.mubr.msk.bf16.mxu1 %vm1350_vm0, %v4225_v44  ;;  %v4318_v43 = vld [vmem:[%s4465_s5 + $0x360] ss:$8 sps:$4 sm:$0xff]   ;;  %v4319_v44 = vld [vmem:[%s4465_s5 + $0x174] ss:$8 sps:$4 sm:$0xff]  }
  0x67   : > { %1639 = vmatmul.mubr.bf16.gmra.mrb[28].mxu0 %v4227_v45  ;;  %1895 = vmatmul.mubr.bf16.gmra.mrb[28].mxu1 %v4228_v46  ;;  %v4321_v45 = vld [vmem:[%s4465_s5 + $0x374] ss:$8 sps:$4 sm:$0xff]   ;;  %v4323_v46 = vld [vmem:[%s4465_s5 + $0x170] ss:$8 sps:$4 sm:$0xff]  }
  0x68   : > { %3807 = vmatprep.mubr.msk.bf16.mxu0 %vm1350_vm0, %v4229_v47  ;;  %3839 = vmatprep.mubr.msk.bf16.mxu1 %vm1350_vm0, %v4231_v48  ;;  %v4324_v47 = vld [vmem:[%s4465_s5 + $0x370] ss:$8 sps:$4 sm:$0xff]   ;;  %v4325_v48 = vld [vmem:[%s4465_s5 + $0x184] ss:$8 sps:$4 sm:$0xff]  }
  0x6f   : > { %1647 = vmatmul.mubr.bf16.gmra.mrb[32].mxu0 %v4233_v49  ;;  %1903 = vmatmul.mubr.bf16.gmra.mrb[32].mxu1 %v4234_v50  ;;  %v4327_v49 = vld [vmem:[%s4465_s5 + $0x384] ss:$8 sps:$4 sm:$0xff]   ;;  %v4329_v50 = vld [vmem:[%s4465_s5 + $0x180] ss:$8 sps:$4 sm:$0xff]  }
  0x70   : > { %3808 = vmatprep.mubr.msk.bf16.mxu0 %vm1350_vm0, %v4235_v51  ;;  %3840 = vmatprep.mubr.msk.bf16.mxu1 %vm1350_vm0, %v4237_v52  ;;  %v4330_v51 = vld [vmem:[%s4465_s5 + $0x380] ss:$8 sps:$4 sm:$0xff]   ;;  %v4331_v52 = vld [vmem:[%s4465_s5 + $0x194] ss:$8 sps:$4 sm:$0xff]  }
  0x77   : > { %1655 = vmatmul.mubr.bf16.gmra.mrb[36].mxu0 %v4239_v53  ;;  %1911 = vmatmul.mubr.bf16.gmra.mrb[36].mxu1 %v4240_v54  ;;  %v4333_v53 = vld [vmem:[%s4465_s5 + $0x394] ss:$8 sps:$4 sm:$0xff]   ;;  %v4335_v54 = vld [vmem:[%s4465_s5 + $0x190] ss:$8 sps:$4 sm:$0xff]  }
  0x78   : > { %3809 = vmatprep.mubr.msk.bf16.mxu0 %vm1350_vm0, %v4241_v55  ;;  %3841 = vmatprep.mubr.msk.bf16.mxu1 %vm1350_vm0, %v4243_v56  ;;  %v4336_v55 = vld [vmem:[%s4465_s5 + $0x390] ss:$8 sps:$4 sm:$0xff]   ;;  %v4337_v56 = vld [vmem:[%s4465_s5 + $0x1a4] ss:$8 sps:$4 sm:$0xff]  }
  0x7f   : > { %1663 = vmatmul.mubr.bf16.gmra.mrb[40].mxu0 %v4550_v57  ;;  %1919 = vmatmul.mubr.bf16.gmra.mrb[40].mxu1 %v4553_v58  ;;  %v4339_v57 = vld [vmem:[%s4465_s5 + $0x3a4] ss:$8 sps:$4 sm:$0xff]   ;;  %v4341_v58 = vld [vmem:[%s4465_s5 + $0x1a0] ss:$8 sps:$4 sm:$0xff]  }
  0x80   : > { %3810 = vmatprep.mubr.msk.bf16.mxu0 %vm1350_vm0, %v4247_v60  ;;  %3842 = vmatprep.mubr.msk.bf16.mxu1 %vm1350_vm0, %v4249_v61  ;;  %v4343_v60 = vld [vmem:[%s4465_s5 + $0x1b4] ss:$8 sps:$4 sm:$0xff]  }
  0x81   : > { %v4345_v61 = vld [vmem:[%s4465_s5 + $0x3b4] ss:$8 sps:$4 sm:$0xff]  }
  0x87   : > { %1671 = vmatmul.mubr.bf16.gmra.mrb[44].mxu0 %v4251_v62  ;;  %1927 = vmatmul.mubr.bf16.gmra.mrb[44].mxu1 %v4252_v63  ;;  %v442_v62 = vld [vmem:[#allocation2] sm:$0xff] }
  0x88   : > { %3811 = vmatprep.mubr.msk.bf16.mxu0 %vm1350_vm0, %v4253_v0  ;;  %3843 = vmatprep.mubr.msk.bf16.mxu1 %vm1350_vm0, %v4255_v1  ;;  %v506_v63 = vld [vmem:[#allocation2 + $0x200] sm:$0xff] }
  0x8f   : > { %1679 = vmatmul.mubr.bf16.gmra.mrb[48].mxu0 %v4257_v2  ;;  %1935 = vmatmul.mubr.bf16.gmra.mrb[48].mxu1 %v4258_v3  ;;  %v443_v2 = vld [vmem:[#allocation2 + $0x8] sm:$0xff] }
  0x90   : > { %3812 = vmatprep.mubr.msk.bf16.mxu0 %vm1350_vm0, %v4259_v4  ;;  %3844 = vmatprep.mubr.msk.bf16.mxu1 %vm1350_vm0, %v4261_v5  ;;  %v507_v3 = vld [vmem:[#allocation2 + $0x208] sm:$0xff] }
  0x97   : > { %1687 = vmatmul.mubr.bf16.gmra.mrb[52].mxu0 %v4263_v6  ;;  %1943 = vmatmul.mubr.bf16.gmra.mrb[52].mxu1 %v4264_v7 }
  0x98   : > { %3813 = vmatprep.mubr.msk.bf16.mxu0 %vm1350_vm0, %v4265_v8  ;;  %3845 = vmatprep.mubr.msk.bf16.mxu1 %vm1350_vm0, %v4267_v9  ;;  %v4347_v8 = vld [vmem:[%s4465_s5 + $0x1b0] ss:$8 sps:$4 sm:$0xff]  }
  0x99   : > { %v4348_v9 = vld [vmem:[%s4465_s5 + $0x3b0] ss:$8 sps:$4 sm:$0xff]  }
  0x9f   : > { %1695 = vmatmul.mubr.bf16.gmra.mrb[56].mxu0 %v4269_v10  ;;  %1951 = vmatmul.mubr.bf16.gmra.mrb[56].mxu1 %v4270_v11 }
  0xa0   : > { %3814 = vmatprep.mubr.msk.bf16.mxu0 %vm1350_vm0, %v4271_v12  ;;  %3846 = vmatprep.mubr.msk.bf16.mxu1 %vm1350_vm0, %v4273_v13  ;;  %v4349_v12 = vld [vmem:[%s4465_s5 + $0x1c4] ss:$8 sps:$4 sm:$0xff]  }
  0xa1   : > { %v4351_v13 = vld [vmem:[%s4465_s5 + $0x3c4] ss:$8 sps:$4 sm:$0xff]  }
  0xa7   : > { %1703 = vmatmul.mubr.bf16.gmra.mrb[60].mxu0 %v4275_v14  ;;  %1959 = vmatmul.mubr.bf16.gmra.mrb[60].mxu1 %v4276_v15 }
  0xa8   : > { %3815 = vmatprep.mubr.msk.bf16.mxu0 %vm1350_vm0, %v4277_v16  ;;  %3847 = vmatprep.mubr.msk.bf16.mxu1 %vm1350_vm0, %v4279_v17 }
  0xaf   : > { %1711 = vmatmul.mubr.bf16.gmra.mrb[64].mxu0 %v4281_v18  ;;  %1967 = vmatmul.mubr.bf16.gmra.mrb[64].mxu1 %v4282_v19  ;;  %v444_v18 = vld [vmem:[#allocation2 + $0x10] sm:$0xff] }
  0xb0   : > { %3816 = vmatprep.mubr.msk.bf16.mxu0 %vm1350_vm0, %v4283_v20  ;;  %3848 = vmatprep.mubr.msk.bf16.mxu1 %vm1350_vm0, %v4285_v21  ;;  %v508_v19 = vld [vmem:[#allocation2 + $0x210] sm:$0xff]  ;;  %v4926_v20 = vld [vmem:[%s5626_s2] ss:$0 sm:$0xff] }
  0xb1   : > { %v4931_v21 = vld [vmem:[%s5627_s3] ss:$0 sm:$0xff] }
  0xb7   : > { %1719 = vmatmul.mubr.bf16.gmra.mrb[68].mxu0 %v4287_v22  ;;  %1975 = vmatmul.mubr.bf16.gmra.mrb[68].mxu1 %v4288_v23 }
  0xb8   : > { %3817 = vmatprep.mubr.msk.bf16.mxu0 %vm1350_vm0, %v4289_v24  ;;  %3849 = vmatprep.mubr.msk.bf16.mxu1 %vm1350_vm0, %v4291_v25  ;;  %v445_v24 = vld [vmem:[#allocation2 + $0x18] sm:$0xff] }
  0xb9   : > { %v509_v25 = vld [vmem:[#allocation2 + $0x218] sm:$0xff] }
  0xbf   : > { %1727 = vmatmul.mubr.bf16.gmra.mrb[72].mxu0 %v4293_v26  ;;  %1983 = vmatmul.mubr.bf16.gmra.mrb[72].mxu1 %v4294_v27 }
  0xc0   : > { %3818 = vmatprep.mubr.msk.bf16.mxu0 %vm1350_vm0, %v4295_v28  ;;  %3850 = vmatprep.mubr.msk.bf16.mxu1 %vm1350_vm0, %v4297_v29 }
  0xc7   : > { %1735 = vmatmul.mubr.bf16.gmra.mrb[76].mxu0 %v4299_v30  ;;  %1991 = vmatmul.mubr.bf16.gmra.mrb[76].mxu1 %v4300_v31  ;;  %v4353_v30 = vld [vmem:[%s4465_s5 + $0x1c0] ss:$8 sps:$4 sm:$0xff]  }
  0xc8   : > { %3819 = vmatprep.mubr.msk.bf16.mxu0 %vm1350_vm0, %v4301_v32  ;;  %3851 = vmatprep.mubr.msk.bf16.mxu1 %vm1350_vm0, %v4303_v33  ;;  %v4354_v31 = vld [vmem:[%s4465_s5 + $0x3c0] ss:$8 sps:$4 sm:$0xff]  }
  0xcf   : > { %1743 = vmatmul.mubr.bf16.gmra.mrb[80].mxu0 %v4305_v34  ;;  %1999 = vmatmul.mubr.bf16.gmra.mrb[80].mxu1 %v4306_v35 }
  0xd0   : > { %3820 = vmatprep.mubr.msk.bf16.mxu0 %vm1350_vm0, %v4307_v36  ;;  %3852 = vmatprep.mubr.msk.bf16.mxu1 %vm1350_vm0, %v4309_v37  ;;  %v4355_v36 = vld [vmem:[%s4465_s5 + $0x1d4] ss:$8 sps:$4 sm:$0xff]  }
  0xd7   : > { %1751 = vmatmul.mubr.bf16.gmra.mrb[84].mxu0 %v4311_v38  ;;  %2007 = vmatmul.mubr.bf16.gmra.mrb[84].mxu1 %v4312_v39 }
  0xd8   : > { %3821 = vmatprep.mubr.msk.bf16.mxu0 %vm1350_vm0, %v4313_v40  ;;  %3853 = vmatprep.mubr.msk.bf16.mxu1 %vm1350_vm0, %v4315_v41 }
  0xdf   : > { %1759 = vmatmul.mubr.bf16.gmra.mrb[88].mxu0 %v4317_v42  ;;  %2015 = vmatmul.mubr.bf16.gmra.mrb[88].mxu1 %v4318_v43  ;;  %v4357_v43 = vld [vmem:[%s4465_s5 + $0x3d4] ss:$8 sps:$4 sm:$0xff]  }
  0xe0   : > { %3822 = vmatprep.mubr.msk.bf16.mxu0 %vm1350_vm0, %v4319_v44  ;;  %3854 = vmatprep.mubr.msk.bf16.mxu1 %vm1350_vm0, %v4321_v45 }
  0xe7   : > { %1767 = vmatmul.mubr.bf16.gmra.mrb[92].mxu0 %v4323_v46  ;;  %2023 = vmatmul.mubr.bf16.gmra.mrb[92].mxu1 %v4324_v47 }
  0xe8   : > { %3823 = vmatprep.mubr.msk.bf16.mxu0 %vm1350_vm0, %v4325_v48  ;;  %3855 = vmatprep.mubr.msk.bf16.mxu1 %vm1350_vm0, %v4327_v49 }
  0xef   : > { %1775 = vmatmul.mubr.bf16.gmra.mrb[96].mxu0 %v4329_v50  ;;  %2031 = vmatmul.mubr.bf16.gmra.mrb[96].mxu1 %v4330_v51 }
  0xf0   : > { %3824 = vmatprep.mubr.msk.bf16.mxu0 %vm1350_vm0, %v4331_v52  ;;  %3856 = vmatprep.mubr.msk.bf16.mxu1 %vm1350_vm0, %v4333_v53 }
  0xf7   : > { %1783 = vmatmul.mubr.bf16.gmra.mrb[100].mxu0 %v4335_v54  ;;  %2039 = vmatmul.mubr.bf16.gmra.mrb[100].mxu1 %v4336_v55  ;;  %v446_v54 = vld [vmem:[#allocation2 + $0x20] sm:$0xff] }
  0xf8   : > { %3825 = vmatprep.mubr.msk.bf16.mxu0 %vm1350_vm0, %v4337_v56  ;;  %3857 = vmatprep.mubr.msk.bf16.mxu1 %vm1350_vm0, %v4339_v57  ;;  %v510_v55 = vld [vmem:[#allocation2 + $0x220] sm:$0xff] }
  0xff   : > { %1791 = vmatmul.mubr.bf16.gmra.mrb[104].mxu0 %v4341_v58  ;;  %2047 = vmatmul.mubr.bf16.gmra.mrb[104].mxu1 %v4342_v59  ;;  %v447_v58 = vld [vmem:[#allocation2 + $0x28] sm:$0xff] }
 0x100   : > { %3826 = vmatprep.mubr.msk.bf16.mxu0 %vm1350_vm0, %v4343_v60  ;;  %3858 = vmatprep.mubr.msk.bf16.mxu1 %vm1350_vm0, %v4345_v61  ;;  %v511_v59 = vld [vmem:[#allocation2 + $0x228] sm:$0xff]  ;;  %v4359_v60 = vld [vmem:[%s4465_s5 + $0x1d0] ss:$8 sps:$4 sm:$0xff]  }
 0x102   : > { %v1584_v0 = vpop.f32.mrb[0].mxu0  ;;  %v1840_v1 = vpop.f32.mrb[0].mxu1 }
 0x103   : > { %v2095_v4 = vadd.f32 %v1584_v0, %v442_v62  ;;  %v2159_v5 = vadd.f32 %v1840_v1, %v506_v63  ;;  %v1586_v6 = vpop.f32.mrb[1].mxu0  ;;  %v1842_v7 = vpop.f32.mrb[1].mxu1 }
 0x104   : > { %v1587_v10 = vpop.f32.mrb[2].mxu0  ;;  %v1843_v11 = vpop.f32.mrb[2].mxu1 }
 0x105   : > { %2224 = vst.msk [vmem:[#allocation2] sm:$0xff] %vm313_vm3, %v2095_v4  ;;  %2288 = vst.msk [vmem:[#allocation2 + $0x200] sm:$0xff] %vm313_vm3, %v2159_v5  ;;  %v2096_v14 = vadd.f32 %v1587_v10, %v443_v2  ;;  %v2160_v15 = vadd.f32 %v1843_v11, %v507_v3  ;;  %v1589_v16 = vpop.f32.mrb[3].mxu0  ;;  %v1845_v17 = vpop.f32.mrb[3].mxu1  ;;  %v4360_v3 = vld [vmem:[%s4465_s5 + $0x3d0] ss:$8 sps:$4 sm:$0xff]  }
 0x106   : > { %v4361_v10 = vld [vmem:[%s4465_s5 + $0x1e4] ss:$8 sps:$4 sm:$0xff]  }
 0x107   : > { %2225 = vst.msk [vmem:[#allocation2 + $0x8] sm:$0xff] %vm313_vm3, %v2096_v14  ;;  %2289 = vst.msk [vmem:[#allocation2 + $0x208] sm:$0xff] %vm313_vm3, %v2160_v15  ;;  %1799 = vmatmul.mubr.bf16.gmra.mrb[108].mxu0 %v4347_v8  ;;  %2055 = vmatmul.mubr.bf16.gmra.mrb[108].mxu1 %v4348_v9  ;;  %v4363_v17 = vld [vmem:[%s4465_s5 + $0x3e4] ss:$8 sps:$4 sm:$0xff]  }
 0x108   : > { %3827 = vmatprep.mubr.msk.bf16.mxu0 %vm1350_vm0, %v4349_v12  ;;  %3859 = vmatprep.mubr.msk.bf16.mxu1 %vm1350_vm0, %v4351_v13 }
 0x10a   : > { %v1592_v22 = vpop.f32.mrb[4].mxu0  ;;  %v1848_v23 = vpop.f32.mrb[4].mxu1 }
 0x10b   : > { %v2097_v26 = vadd.f32 %v1592_v22, %v444_v18  ;;  %v2161_v27 = vadd.f32 %v1848_v23, %v508_v19  ;;  %v1594_v28 = vpop.f32.mrb[5].mxu0  ;;  %v1850_v29 = vpop.f32.mrb[5].mxu1 }
 0x10c   : > { %v2355_v32 = vld [vmem:[#allocation2] sm:$0xff]  ;;  %v1595_v34 = vpop.f32.mrb[6].mxu0  ;;  %v1851_v35 = vpop.f32.mrb[6].mxu1 }
 0x10d   : > { %v2419_v33 = vld [vmem:[#allocation2 + $0x200] sm:$0xff]  ;;  %v2491_v37 = vmul.f32 %v4926_v20, %v2355_v32  ;;  %2226 = vst.msk [vmem:[#allocation2 + $0x10] sm:$0xff] %vm313_vm3, %v2097_v26  ;;  %2290 = vst.msk [vmem:[#allocation2 + $0x210] sm:$0xff] %vm313_vm3, %v2161_v27  ;;  %v2098_v39 = vadd.f32 %v1595_v34, %v445_v24  ;;  %v2162_v40 = vadd.f32 %v1851_v35, %v509_v25  ;;  %v1597_v41 = vpop.f32.mrb[7].mxu0  ;;  %v1853_v42 = vpop.f32.mrb[7].mxu1  ;;  %v448_v32 = vld [vmem:[#allocation2 + $0x30] sm:$0xff] }
 0x10e   : > { %v2555_v38 = vmul.f32 %v4926_v20, %v2419_v33  ;;  %v2356_v44 = vld [vmem:[#allocation2 + $0x8] sm:$0xff]  ;;  %v512_v33 = vld [vmem:[#allocation2 + $0x230] sm:$0xff] }
 0x10f   : > { %v2420_v45 = vld [vmem:[#allocation2 + $0x208] sm:$0xff]  ;;  %v2625_v46 = vadd.f32 %v4931_v21, %v2491_v37  ;;  %v2492_v48 = vmul.f32 %v4926_v20, %v2356_v44  ;;  %2227 = vst.msk [vmem:[#allocation2 + $0x18] sm:$0xff] %vm313_vm3, %v2098_v39  ;;  %2291 = vst.msk [vmem:[#allocation2 + $0x218] sm:$0xff] %vm313_vm3, %v2162_v40  ;;  %1807 = vmatmul.mubr.bf16.gmra.mrb[112].mxu0 %v4353_v30  ;;  %2063 = vmatmul.mubr.bf16.gmra.mrb[112].mxu1 %v4354_v31  ;;  %v513_v37 = vld [vmem:[#allocation2 + $0x238] sm:$0xff] }
 0x110   : > { %v2689_v47 = vadd.f32 %v4931_v21, %v2555_v38  ;;  %v2556_v49 = vmul.f32 %v4926_v20, %v2420_v45  ;;  %3828 = vmatprep.mubr.msk.bf16.mxu0 %vm1350_vm0, %v4355_v36  ;;  %3860 = vmatprep.mubr.msk.bf16.mxu1 %vm1350_vm0, %v4357_v43  ;;  %v449_v36 = vld [vmem:[#allocation2 + $0x38] sm:$0xff]  ;;  %v4365_v44 = vld [vmem:[%s4465_s5 + $0x1e0] ss:$8 sps:$4 sm:$0xff]  }
 0x111   : > { %v2753_v50 = vmax.f32 %v2625_v46, 0.0  ;;  %v2626_v52 = vadd.f32 %v4931_v21, %v2492_v48 }
 0x112   : > { %v2817_v51 = vmax.f32 %v2689_v47, 0.0  ;;  %v2690_v53 = vadd.f32 %v4931_v21, %v2556_v49  ;;  %v1600_v56 = vpop.f32.mrb[8].mxu0  ;;  %v1856_v57 = vpop.f32.mrb[8].mxu1  ;;  %v4366_v49 = vld [vmem:[%s4465_s5 + $0x3e0] ss:$8 sps:$4 sm:$0xff]  }
 0x113   : > { %v3996_v61 = vpack.c.bf16 %v2753_v50, %v2753_v50  ;;  %v2754_v63 = vmax.f32 %v2626_v52, 0.0  ;;  %v1602_v1 = vpop.f32.mrb[9].mxu0  ;;  %v1858_v2 = vpop.f32.mrb[9].mxu1  ;;  %v2099_v6 = vadd.f32 %v1600_v56, %v446_v54  ;;  %v2163_v7 = vadd.f32 %v1856_v57, %v510_v55  ;;  %v4367_v50 = vld [vmem:[%s4465_s5 + $0x1f4] ss:$8 sps:$4 sm:$0xff]  }
 0x114   : > { %v4060_v62 = vpack.c.bf16 %v2817_v51, %v2817_v51  ;;  %v2818_v0 = vmax.f32 %v2690_v53, 0.0  ;;  %v2357_v4 = vld [vmem:[#allocation2 + $0x10] sm:$0xff]  ;;  %v1603_v8 = vpop.f32.mrb[10].mxu0  ;;  %v1859_v9 = vpop.f32.mrb[10].mxu1 }
 0x115   : > { %v2421_v5 = vld [vmem:[#allocation2 + $0x210] sm:$0xff]  ;;  %3394 = vst.msk [vmem:[%s4955_s28] sm:$0xf] %vm3393_vm4, %v3996_v61  ;;  %v3997_v11 = vpack.c.bf16 %v2754_v63, %v2754_v63  ;;  %v2493_v13 = vmul.f32 %v4926_v20, %v2357_v4  ;;  %v1605_v15 = vpop.f32.mrb[11].mxu0  ;;  %v1861_v16 = vpop.f32.mrb[11].mxu1  ;;  %v2100_v22 = vadd.f32 %v1603_v8, %v447_v58  ;;  %v2164_v23 = vadd.f32 %v1859_v9, %v511_v59  ;;  %v450_v4 = vld [vmem:[#allocation2 + $0x40] sm:$0xff] }
 0x116   : > { %3458 = vst.msk [vmem:[%s4955_s28 + $0x100] sm:$0xf] %vm3393_vm4, %v4060_v62  ;;  %v4061_v12 = vpack.c.bf16 %v2818_v0, %v2818_v0  ;;  %v2557_v14 = vmul.f32 %v4926_v20, %v2421_v5  ;;  %v2358_v18 = vld [vmem:[#allocation2 + $0x18] sm:$0xff]  ;;  %v514_v5 = vld [vmem:[#allocation2 + $0x240] sm:$0xff] }
 0x117   : > { %v2422_v19 = vld [vmem:[#allocation2 + $0x218] sm:$0xff]  ;;  %2228 = vst.msk [vmem:[#allocation2 + $0x20] sm:$0xff] %vm313_vm3, %v2099_v6  ;;  %2292 = vst.msk [vmem:[#allocation2 + $0x220] sm:$0xff] %vm313_vm3, %v2163_v7  ;;  %v2627_v24 = vadd.f32 %v4931_v21, %v2493_v13  ;;  %v2494_v26 = vmul.f32 %v4926_v20, %v2358_v18  ;;  %1815 = vmatmul.mubr.bf16.gmra.mrb[116].mxu0 %v4359_v60  ;;  %2071 = vmatmul.mubr.bf16.gmra.mrb[116].mxu1 %v4360_v3  ;;  %v515_v13 = vld [vmem:[#allocation2 + $0x248] sm:$0xff] }
 0x118   : > { %3395 = vst.msk [vmem:[%s4955_s28 + $0x4] sm:$0xf] %vm3393_vm4, %v3997_v11  ;;  %3459 = vst.msk [vmem:[%s4955_s28 + $0x104] sm:$0xf] %vm3393_vm4, %v4061_v12  ;;  %v2691_v25 = vadd.f32 %v4931_v21, %v2557_v14  ;;  %v2558_v27 = vmul.f32 %v4926_v20, %v2422_v19  ;;  %3829 = vmatprep.mubr.msk.bf16.mxu0 %vm1350_vm0, %v4361_v10  ;;  %3861 = vmatprep.mubr.msk.bf16.mxu1 %vm1350_vm0, %v4363_v17  ;;  %v4369_v59 = vld [vmem:[%s4465_s5 + $0x3f4] ss:$8 sps:$4 sm:$0xff]  }
 0x119   : > { %2229 = vst.msk [vmem:[#allocation2 + $0x28] sm:$0xff] %vm313_vm3, %v2100_v22  ;;  %2293 = vst.msk [vmem:[#allocation2 + $0x228] sm:$0xff] %vm313_vm3, %v2164_v23  ;;  %v2755_v28 = vmax.f32 %v2627_v24, 0.0  ;;  %v2628_v30 = vadd.f32 %v4931_v21, %v2494_v26  ;;  %v451_v12 = vld [vmem:[#allocation2 + $0x48] sm:$0xff]  ;;  %v4371_v18 = vld [vmem:[%s4465_s5 + $0x1f0] ss:$8 sps:$4 sm:$0xff]  }
 0x11a   : > { %v2819_v29 = vmax.f32 %v2691_v25, 0.0  ;;  %v2692_v31 = vadd.f32 %v4931_v21, %v2558_v27  ;;  %v1608_v34 = vpop.f32.mrb[12].mxu0  ;;  %v1864_v35 = vpop.f32.mrb[12].mxu1  ;;  %v4372_v27 = vld [vmem:[%s4465_s5 + $0x3f0] ss:$8 sps:$4 sm:$0xff]  }
 0x11b   : > { %v3998_v38 = vpack.c.bf16 %v2755_v28, %v2755_v28  ;;  %v2756_v40 = vmax.f32 %v2628_v30, 0.0  ;;  %v1610_v42 = vpop.f32.mrb[13].mxu0  ;;  %v1866_v43 = vpop.f32.mrb[13].mxu1  ;;  %v2101_v45 = vadd.f32 %v1608_v34, %v448_v32  ;;  %v2165_v46 = vadd.f32 %v1864_v35, %v512_v33 }
 0x11c   : > { %v4062_v39 = vpack.c.bf16 %v2819_v29, %v2819_v29  ;;  %v2820_v41 = vmax.f32 %v2692_v31, 0.0  ;;  %v1611_v47 = vpop.f32.mrb[14].mxu0  ;;  %v1867_v48 = vpop.f32.mrb[14].mxu1 }
 0x11d   : > { %3396 = vst.msk [vmem:[%s4955_s28 + $0x8] sm:$0xf] %vm3393_vm4, %v3998_v38  ;;  %v3999_v51 = vpack.c.bf16 %v2756_v40, %v2756_v40  ;;  %v2102_v55 = vadd.f32 %v1611_v47, %v449_v36  ;;  %v2166_v56 = vadd.f32 %v1867_v48, %v513_v37  ;;  %v1613_v57 = vpop.f32.mrb[15].mxu0  ;;  %v1869_v58 = vpop.f32.mrb[15].mxu1 }
 0x11e   : > { %3460 = vst.msk [vmem:[%s4955_s28 + $0x108] sm:$0xf] %vm3393_vm4, %v4062_v39  ;;  %v4063_v52 = vpack.c.bf16 %v2820_v41, %v2820_v41  ;;  %v2359_v53 = vld [vmem:[#allocation2 + $0x20] sm:$0xff]  ;;  %v453_v58 = vld [vmem:[#allocation2 + $0x58] sm:$0xff] }
 0x11f   : > { %v2423_v54 = vld [vmem:[#allocation2 + $0x220] sm:$0xff]  ;;  %v2495_v60 = vmul.f32 %v4926_v20, %v2359_v53  ;;  %2230 = vst.msk [vmem:[#allocation2 + $0x30] sm:$0xff] %vm313_vm3, %v2101_v45  ;;  %2294 = vst.msk [vmem:[#allocation2 + $0x230] sm:$0xff] %vm313_vm3, %v2165_v46  ;;  %1823 = vmatmul.mubr.bf16.gmra.mrb[120].mxu0 %v4365_v44  ;;  %2079 = vmatmul.mubr.bf16.gmra.mrb[120].mxu1 %v4366_v49  ;;  %v452_v44 = vld [vmem:[#allocation2 + $0x50] sm:$0xff] }
 0x120   : > { %v2559_v61 = vmul.f32 %v4926_v20, %v2423_v54  ;;  %3397 = vst.msk [vmem:[%s4955_s28 + $0xc] sm:$0xf] %vm3393_vm4, %v3999_v51  ;;  %3461 = vst.msk [vmem:[%s4955_s28 + $0x10c] sm:$0xf] %vm3393_vm4, %v4063_v52  ;;  %v2360_v62 = vld [vmem:[#allocation2 + $0x28] sm:$0xff]  ;;  %3830 = vmatprep.mubr.msk.bf16.mxu0 %vm1350_vm0, %v4367_v50  ;;  %3862 = vmatprep.mubr.msk.bf16.mxu1 %vm1350_vm0, %v4369_v59  ;;  %v516_v45 = vld [vmem:[#allocation2 + $0x250] sm:$0xff] }
 0x121   : > { %v2424_v63 = vld [vmem:[#allocation2 + $0x228] sm:$0xff]  ;;  %2231 = vst.msk [vmem:[#allocation2 + $0x38] sm:$0xff] %vm313_vm3, %v2102_v55  ;;  %2295 = vst.msk [vmem:[#allocation2 + $0x238] sm:$0xff] %vm313_vm3, %v2166_v56  ;;  %v2629_v0 = vadd.f32 %v4931_v21, %v2495_v60  ;;  %v2496_v2 = vmul.f32 %v4926_v20, %v2360_v62  ;;  %v517_v59 = vld [vmem:[#allocation2 + $0x258] sm:$0xff] }
 0x122   : > { %v2693_v1 = vadd.f32 %v4931_v21, %v2559_v61  ;;  %v2560_v3 = vmul.f32 %v4926_v20, %v2424_v63  ;;  %v1616_v10 = vpop.f32.mrb[16].mxu0  ;;  %v1872_v11 = vpop.f32.mrb[16].mxu1 }
 0x123   : > { %v2757_v6 = vmax.f32 %v2629_v0, 0.0  ;;  %v2630_v8 = vadd.f32 %v4931_v21, %v2496_v2  ;;  %v2103_v14 = vadd.f32 %v1616_v10, %v450_v4  ;;  %v2167_v15 = vadd.f32 %v1872_v11, %v514_v5  ;;  %v1618_v16 = vpop.f32.mrb[17].mxu0  ;;  %v1874_v17 = vpop.f32.mrb[17].mxu1 }
 0x124   : > { %v2821_v7 = vmax.f32 %v2693_v1, 0.0  ;;  %v2694_v9 = vadd.f32 %v4931_v21, %v2560_v3  ;;  %v1619_v25 = vpop.f32.mrb[18].mxu0  ;;  %v1875_v26 = vpop.f32.mrb[18].mxu1 }
 0x125   : > { %v4000_v19 = vpack.c.bf16 %v2757_v6, %v2757_v6  ;;  %v2758_v23 = vmax.f32 %v2630_v8, 0.0  ;;  %2232 = vst.msk [vmem:[#allocation2 + $0x40] sm:$0xff] %vm313_vm3, %v2103_v14  ;;  %2296 = vst.msk [vmem:[#allocation2 + $0x240] sm:$0xff] %vm313_vm3, %v2167_v15  ;;  %v2104_v30 = vadd.f32 %v1619_v25, %v451_v12  ;;  %v2168_v31 = vadd.f32 %v1875_v26, %v515_v13  ;;  %v1621_v32 = vpop.f32.mrb[19].mxu0  ;;  %v1877_v33 = vpop.f32.mrb[19].mxu1 }
 0x126   : > { %v4064_v22 = vpack.c.bf16 %v2821_v7, %v2821_v7  ;;  %v2822_v24 = vmax.f32 %v2694_v9, 0.0  ;;  %v2361_v28 = vld [vmem:[#allocation2 + $0x30] sm:$0xff]  ;;  %v455_v32 = vld [vmem:[#allocation2 + $0x68] sm:$0xff] }
 0x127   : > { %v2425_v29 = vld [vmem:[#allocation2 + $0x230] sm:$0xff]  ;;  %3398 = vst.msk [vmem:[%s4955_s28 + $0x10] sm:$0xf] %vm3393_vm4, %v4000_v19  ;;  %v4001_v34 = vpack.c.bf16 %v2758_v23, %v2758_v23  ;;  %v2497_v36 = vmul.f32 %v4926_v20, %v2361_v28  ;;  %1831 = vmatmul.mubr.bf16.gmra.mrb[124].mxu0 %v4371_v18  ;;  %2087 = vmatmul.mubr.bf16.gmra.mrb[124].mxu1 %v4372_v27  ;;  %v518_v23 = vld [vmem:[#allocation2 + $0x260] sm:$0xff]  ;;  %v519_v33 = vld [vmem:[#allocation2 + $0x268] sm:$0xff] }
 0x128   : > { %3462 = vst.msk [vmem:[%s4955_s28 + $0x110] sm:$0xf] %vm3393_vm4, %v4064_v22  ;;  %v4065_v35 = vpack.c.bf16 %v2822_v24, %v2822_v24  ;;  %v2561_v37 = vmul.f32 %v4926_v20, %v2425_v29  ;;  %v2362_v38 = vld [vmem:[#allocation2 + $0x38] sm:$0xff]  ;;  %v454_v22 = vld [vmem:[#allocation2 + $0x60] sm:$0xff] }
 0x129   : > { %v2426_v39 = vld [vmem:[#allocation2 + $0x238] sm:$0xff]  ;;  %v2498_v40 = vmul.f32 %v4926_v20, %v2362_v38  ;;  %2233 = vst.msk [vmem:[#allocation2 + $0x48] sm:$0xff] %vm313_vm3, %v2104_v30  ;;  %2297 = vst.msk [vmem:[#allocation2 + $0x248] sm:$0xff] %vm313_vm3, %v2168_v31  ;;  %v2631_v42 = vadd.f32 %v4931_v21, %v2497_v36 }
 0x12a   : > { %v2562_v41 = vmul.f32 %v4926_v20, %v2426_v39  ;;  %3399 = vst.msk [vmem:[%s4955_s28 + $0x14] sm:$0xf] %vm3393_vm4, %v4001_v34  ;;  %3463 = vst.msk [vmem:[%s4955_s28 + $0x114] sm:$0xf] %vm3393_vm4, %v4065_v35  ;;  %v2695_v43 = vadd.f32 %v4931_v21, %v2561_v37  ;;  %v1624_v50 = vpop.f32.mrb[20].mxu0  ;;  %v1880_v51 = vpop.f32.mrb[20].mxu1 }
 0x12b   : > { %v2632_v46 = vadd.f32 %v4931_v21, %v2498_v40  ;;  %v2759_v48 = vmax.f32 %v2631_v42, 0.0  ;;  %v2105_v54 = vadd.f32 %v1624_v50, %v452_v44  ;;  %v2169_v55 = vadd.f32 %v1880_v51, %v516_v45  ;;  %v1626_v56 = vpop.f32.mrb[21].mxu0  ;;  %v1882_v57 = vpop.f32.mrb[21].mxu1 }
 0x12c   : > { %v2696_v47 = vadd.f32 %v4931_v21, %v2562_v41  ;;  %v2823_v49 = vmax.f32 %v2695_v43, 0.0  ;;  %v2363_v62 = vld [vmem:[#allocation2 + $0x40] sm:$0xff]  ;;  %v1627_v0 = vpop.f32.mrb[22].mxu0  ;;  %v1883_v1 = vpop.f32.mrb[22].mxu1 }
 0x12d   : > { %v2760_v52 = vmax.f32 %v2632_v46, 0.0  ;;  %v4002_v60 = vpack.c.bf16 %v2759_v48, %v2759_v48  ;;  %v2427_v63 = vld [vmem:[#allocation2 + $0x240] sm:$0xff]  ;;  %v2499_v4 = vmul.f32 %v4926_v20, %v2363_v62  ;;  %2234 = vst.msk [vmem:[#allocation2 + $0x50] sm:$0xff] %vm313_vm3, %v2105_v54  ;;  %2298 = vst.msk [vmem:[#allocation2 + $0x250] sm:$0xff] %vm313_vm3, %v2169_v55  ;;  %v1629_v6 = vpop.f32.mrb[23].mxu0  ;;  %v1885_v7 = vpop.f32.mrb[23].mxu1  ;;  %v2106_v10 = vadd.f32 %v1627_v0, %v453_v58 }
 0x12e   : > { %v2824_v53 = vmax.f32 %v2696_v47, 0.0  ;;  %v4066_v61 = vpack.c.bf16 %v2823_v49, %v2823_v49  ;;  %v2563_v5 = vmul.f32 %v4926_v20, %v2427_v63  ;;  %v2170_v11 = vadd.f32 %v1883_v1, %v517_v59  ;;  %v456_v54 = vld [vmem:[#allocation2 + $0x70] sm:$0xff]  ;;  %v457_v62 = vld [vmem:[#allocation2 + $0x78] sm:$0xff] }
 0x12f   : > { %v4003_v2 = vpack.c.bf16 %v2760_v52, %v2760_v52  ;;  %3400 = vst.msk [vmem:[%s4955_s28 + $0x18] sm:$0xf] %vm3393_vm4, %v4002_v60  ;;  %v2633_v12 = vadd.f32 %v4931_v21, %v2499_v4  ;;  %v520_v55 = vld [vmem:[#allocation2 + $0x270] sm:$0xff]  ;;  %v521_v63 = vld [vmem:[#allocation2 + $0x278] sm:$0xff] }
 0x130   : > { %v4067_v3 = vpack.c.bf16 %v2824_v53, %v2824_v53  ;;  %3464 = vst.msk [vmem:[%s4955_s28 + $0x118] sm:$0xf] %vm3393_vm4, %v4066_v61  ;;  %v2364_v8 = vld [vmem:[#allocation2 + $0x48] sm:$0xff]  ;;  %v2697_v13 = vadd.f32 %v4931_v21, %v2563_v5 }
 0x131   : > { %v2428_v9 = vld [vmem:[#allocation2 + $0x248] sm:$0xff]  ;;  %3401 = vst.msk [vmem:[%s4955_s28 + $0x1c] sm:$0xf] %vm3393_vm4, %v4003_v2  ;;  %v2500_v14 = vmul.f32 %v4926_v20, %v2364_v8  ;;  %v2761_v16 = vmax.f32 %v2633_v12, 0.0 }
 0x132   : > { %3465 = vst.msk [vmem:[%s4955_s28 + $0x11c] sm:$0xf] %vm3393_vm4, %v4067_v3  ;;  %v2564_v15 = vmul.f32 %v4926_v20, %v2428_v9  ;;  %v2825_v17 = vmax.f32 %v2697_v13, 0.0  ;;  %v1632_v24 = vpop.f32.mrb[24].mxu0  ;;  %v1888_v25 = vpop.f32.mrb[24].mxu1 }
 0x133   : > { %2235 = vst.msk [vmem:[#allocation2 + $0x58] sm:$0xff] %vm313_vm3, %v2106_v10  ;;  %2299 = vst.msk [vmem:[#allocation2 + $0x258] sm:$0xff] %vm313_vm3, %v2170_v11  ;;  %v2634_v18 = vadd.f32 %v4931_v21, %v2500_v14  ;;  %v4004_v26 = vpack.c.bf16 %v2761_v16, %v2761_v16  ;;  %v1634_v30 = vpop.f32.mrb[25].mxu0  ;;  %v1890_v31 = vpop.f32.mrb[25].mxu1  ;;  %v2107_v36 = vadd.f32 %v1632_v24, %v454_v22 }
 0x134   : > { %v2698_v19 = vadd.f32 %v4931_v21, %v2564_v15  ;;  %v4068_v27 = vpack.c.bf16 %v2825_v17, %v2825_v17  ;;  %v2365_v34 = vld [vmem:[#allocation2 + $0x50] sm:$0xff]  ;;  %v2171_v37 = vadd.f32 %v1888_v25, %v518_v23  ;;  %v1635_v38 = vpop.f32.mrb[26].mxu0  ;;  %v1891_v39 = vpop.f32.mrb[26].mxu1 }
 0x135   : > { %v2762_v28 = vmax.f32 %v2634_v18, 0.0  ;;  %v2429_v35 = vld [vmem:[#allocation2 + $0x250] sm:$0xff]  ;;  %3402 = vst.msk [vmem:[%s4955_s28 + $0x20] sm:$0xf] %vm3393_vm4, %v4004_v26  ;;  %v2501_v42 = vmul.f32 %v4926_v20, %v2365_v34  ;;  %v1637_v44 = vpop.f32.mrb[27].mxu0  ;;  %v1893_v45 = vpop.f32.mrb[27].mxu1  ;;  %v2108_v46 = vadd.f32 %v1635_v38, %v455_v32  ;;  %v2172_v47 = vadd.f32 %v1891_v39, %v519_v33 }
 0x136   : > { %v2826_v29 = vmax.f32 %v2698_v19, 0.0  ;;  %3466 = vst.msk [vmem:[%s4955_s28 + $0x120] sm:$0xf] %vm3393_vm4, %v4068_v27  ;;  %v2565_v43 = vmul.f32 %v4926_v20, %v2429_v35 }
 0x137   : > { %v4005_v40 = vpack.c.bf16 %v2762_v28, %v2762_v28  ;;  %2236 = vst.msk [vmem:[#allocation2 + $0x60] sm:$0xff] %vm313_vm3, %v2107_v36  ;;  %2300 = vst.msk [vmem:[#allocation2 + $0x260] sm:$0xff] %vm313_vm3, %v2171_v37  ;;  %v2635_v48 = vadd.f32 %v4931_v21, %v2501_v42  ;;  %v458_v28 = vld [vmem:[#allocation2 + $0x80] sm:$0xff]  ;;  %v459_v36 = vld [vmem:[#allocation2 + $0x88] sm:$0xff] }
 0x138   : > { %v4069_v41 = vpack.c.bf16 %v2826_v29, %v2826_v29  ;;  %v2699_v49 = vadd.f32 %v4931_v21, %v2565_v43  ;;  %2237 = vst.msk [vmem:[#allocation2 + $0x68] sm:$0xff] %vm313_vm3, %v2108_v46  ;;  %2301 = vst.msk [vmem:[#allocation2 + $0x268] sm:$0xff] %vm313_vm3, %v2172_v47  ;;  %v522_v29 = vld [vmem:[#allocation2 + $0x280] sm:$0xff]  ;;  %v523_v37 = vld [vmem:[#allocation2 + $0x288] sm:$0xff] }
 0x139   : > { %3403 = vst.msk [vmem:[%s4955_s28 + $0x24] sm:$0xf] %vm3393_vm4, %v4005_v40  ;;  %v2763_v56 = vmax.f32 %v2635_v48, 0.0 }
 0x13a   : > { %3467 = vst.msk [vmem:[%s4955_s28 + $0x124] sm:$0xf] %vm3393_vm4, %v4069_v41  ;;  %v2366_v50 = vld [vmem:[#allocation2 + $0x58] sm:$0xff]  ;;  %v2827_v57 = vmax.f32 %v2699_v49, 0.0  ;;  %v1640_v60 = vpop.f32.mrb[28].mxu0  ;;  %v1896_v61 = vpop.f32.mrb[28].mxu1 }
 0x13b   : > { %v2430_v51 = vld [vmem:[#allocation2 + $0x258] sm:$0xff]  ;;  %v2502_v52 = vmul.f32 %v4926_v20, %v2366_v50  ;;  %v4006_v0 = vpack.c.bf16 %v2763_v56, %v2763_v56  ;;  %v2109_v2 = vadd.f32 %v1640_v60, %v456_v54  ;;  %v2173_v3 = vadd.f32 %v1896_v61, %v520_v55  ;;  %v1642_v4 = vpop.f32.mrb[29].mxu0  ;;  %v1898_v5 = vpop.f32.mrb[29].mxu1 }
 0x13c   : > { %v2566_v53 = vmul.f32 %v4926_v20, %v2430_v51  ;;  %v4070_v1 = vpack.c.bf16 %v2827_v57, %v2827_v57  ;;  %v1643_v8 = vpop.f32.mrb[30].mxu0  ;;  %v1899_v9 = vpop.f32.mrb[30].mxu1  ;;  %v460_v4 = vld [vmem:[#allocation2 + $0x90] sm:$0xff] }
 0x13d   : > { %v2636_v58 = vadd.f32 %v4931_v21, %v2502_v52  ;;  %3404 = vst.msk [vmem:[%s4955_s28 + $0x28] sm:$0xf] %vm3393_vm4, %v4006_v0  ;;  %v2110_v12 = vadd.f32 %v1643_v8, %v457_v62  ;;  %v2174_v13 = vadd.f32 %v1899_v9, %v521_v63  ;;  %v1645_v14 = vpop.f32.mrb[31].mxu0  ;;  %v1901_v15 = vpop.f32.mrb[31].mxu1  ;;  %v524_v5 = vld [vmem:[#allocation2 + $0x290] sm:$0xff] }
 0x13e   : > { %v2700_v59 = vadd.f32 %v4931_v21, %v2566_v53  ;;  %3468 = vst.msk [vmem:[%s4955_s28 + $0x128] sm:$0xf] %vm3393_vm4, %v4070_v1  ;;  %v2367_v10 = vld [vmem:[#allocation2 + $0x60] sm:$0xff]  ;;  %v461_v14 = vld [vmem:[#allocation2 + $0x98] sm:$0xff] }
 0x13f   : > { %v2764_v6 = vmax.f32 %v2636_v58, 0.0  ;;  %v2431_v11 = vld [vmem:[#allocation2 + $0x260] sm:$0xff]  ;;  %2238 = vst.msk [vmem:[#allocation2 + $0x70] sm:$0xff] %vm313_vm3, %v2109_v2  ;;  %2302 = vst.msk [vmem:[#allocation2 + $0x270] sm:$0xff] %vm313_vm3, %v2173_v3  ;;  %v2503_v18 = vmul.f32 %v4926_v20, %v2367_v10  ;;  %v2368_v22 = vld [vmem:[#allocation2 + $0x68] sm:$0xff] }
 0x140   : > { %v2828_v7 = vmax.f32 %v2700_v59, 0.0  ;;  %v2567_v19 = vmul.f32 %v4926_v20, %v2431_v11  ;;  %v2432_v23 = vld [vmem:[#allocation2 + $0x268] sm:$0xff]  ;;  %2239 = vst.msk [vmem:[#allocation2 + $0x78] sm:$0xff] %vm313_vm3, %v2110_v12  ;;  %2303 = vst.msk [vmem:[#allocation2 + $0x278] sm:$0xff] %vm313_vm3, %v2174_v13  ;;  %v2504_v26 = vmul.f32 %v4926_v20, %v2368_v22  ;;  %v525_v15 = vld [vmem:[#allocation2 + $0x298] sm:$0xff] }
 0x141   : > { %v4007_v16 = vpack.c.bf16 %v2764_v6, %v2764_v6  ;;  %v2637_v24 = vadd.f32 %v4931_v21, %v2503_v18  ;;  %v2568_v27 = vmul.f32 %v4926_v20, %v2432_v23 }
 0x142   : > { %v4071_v17 = vpack.c.bf16 %v2828_v7, %v2828_v7  ;;  %v2701_v25 = vadd.f32 %v4931_v21, %v2567_v19  ;;  %v2638_v32 = vadd.f32 %v4931_v21, %v2504_v26  ;;  %v1648_v34 = vpop.f32.mrb[32].mxu0  ;;  %v1904_v35 = vpop.f32.mrb[32].mxu1 }
 0x143   : > { %3405 = vst.msk [vmem:[%s4955_s28 + $0x2c] sm:$0xf] %vm3393_vm4, %v4007_v16  ;;  %v2765_v30 = vmax.f32 %v2637_v24, 0.0  ;;  %v2702_v33 = vadd.f32 %v4931_v21, %v2568_v27  ;;  %v2111_v38 = vadd.f32 %v1648_v34, %v458_v28  ;;  %v2175_v39 = vadd.f32 %v1904_v35, %v522_v29  ;;  %v1650_v40 = vpop.f32.mrb[33].mxu0  ;;  %v1906_v41 = vpop.f32.mrb[33].mxu1 }
 0x144   : > { %3469 = vst.msk [vmem:[%s4955_s28 + $0x12c] sm:$0xf] %vm3393_vm4, %v4071_v17  ;;  %v2829_v31 = vmax.f32 %v2701_v25, 0.0  ;;  %v2766_v44 = vmax.f32 %v2638_v32, 0.0  ;;  %v1651_v48 = vpop.f32.mrb[34].mxu0  ;;  %v1907_v49 = vpop.f32.mrb[34].mxu1 }
 0x145   : > { %v4008_v42 = vpack.c.bf16 %v2765_v30, %v2765_v30  ;;  %v2830_v45 = vmax.f32 %v2702_v33, 0.0  ;;  %2240 = vst.msk [vmem:[#allocation2 + $0x80] sm:$0xff] %vm313_vm3, %v2111_v38  ;;  %2304 = vst.msk [vmem:[#allocation2 + $0x280] sm:$0xff] %vm313_vm3, %v2175_v39  ;;  %v2112_v52 = vadd.f32 %v1651_v48, %v459_v36  ;;  %v2176_v53 = vadd.f32 %v1907_v49, %v523_v37  ;;  %v1653_v54 = vpop.f32.mrb[35].mxu0  ;;  %v1909_v55 = vpop.f32.mrb[35].mxu1 }
 0x146   : > { %v4072_v43 = vpack.c.bf16 %v2829_v31, %v2829_v31  ;;  %v2369_v46 = vld [vmem:[#allocation2 + $0x70] sm:$0xff]  ;;  %v4009_v56 = vpack.c.bf16 %v2766_v44, %v2766_v44 }
 0x147   : > { %v2433_v47 = vld [vmem:[#allocation2 + $0x270] sm:$0xff]  ;;  %v2505_v50 = vmul.f32 %v4926_v20, %v2369_v46  ;;  %3406 = vst.msk [vmem:[%s4955_s28 + $0x30] sm:$0xf] %vm3393_vm4, %v4008_v42  ;;  %v4073_v57 = vpack.c.bf16 %v2830_v45, %v2830_v45  ;;  %v2370_v58 = vld [vmem:[#allocation2 + $0x78] sm:$0xff]  ;;  %v462_v42 = vld [vmem:[#allocation2 + $0xa0] sm:$0xff] }
 0x148   : > { %v2569_v51 = vmul.f32 %v4926_v20, %v2433_v47  ;;  %3470 = vst.msk [vmem:[%s4955_s28 + $0x130] sm:$0xf] %vm3393_vm4, %v4072_v43  ;;  %v2434_v59 = vld [vmem:[#allocation2 + $0x278] sm:$0xff]  ;;  %v2506_v62 = vmul.f32 %v4926_v20, %v2370_v58  ;;  %3407 = vst.msk [vmem:[%s4955_s28 + $0x34] sm:$0xf] %vm3393_vm4, %v4009_v56  ;;  %v526_v43 = vld [vmem:[#allocation2 + $0x2a0] sm:$0xff] }
 0x149   : > { %v2639_v60 = vadd.f32 %v4931_v21, %v2505_v50  ;;  %v2570_v63 = vmul.f32 %v4926_v20, %v2434_v59  ;;  %2241 = vst.msk [vmem:[#allocation2 + $0x88] sm:$0xff] %vm313_vm3, %v2112_v52  ;;  %2305 = vst.msk [vmem:[#allocation2 + $0x288] sm:$0xff] %vm313_vm3, %v2176_v53  ;;  %v463_v46 = vld [vmem:[#allocation2 + $0xa8] sm:$0xff] }
 0x14a   : > { %v2703_v61 = vadd.f32 %v4931_v21, %v2569_v51  ;;  %3471 = vst.msk [vmem:[%s4955_s28 + $0x134] sm:$0xf] %vm3393_vm4, %v4073_v57  ;;  %v2640_v2 = vadd.f32 %v4931_v21, %v2506_v62  ;;  %v1656_v6 = vpop.f32.mrb[36].mxu0  ;;  %v1912_v7 = vpop.f32.mrb[36].mxu1  ;;  %v527_v47 = vld [vmem:[#allocation2 + $0x2a8] sm:$0xff] }
 0x14b   : > { %v2767_v0 = vmax.f32 %v2639_v60, 0.0  ;;  %v2704_v3 = vadd.f32 %v4931_v21, %v2570_v63  ;;  %v1658_v12 = vpop.f32.mrb[37].mxu0  ;;  %v1914_v13 = vpop.f32.mrb[37].mxu1  ;;  %v2113_v18 = vadd.f32 %v1656_v6, %v460_v4  ;;  %v2177_v19 = vadd.f32 %v1912_v7, %v524_v5 }
 0x14c   : > { %v2831_v1 = vmax.f32 %v2703_v61, 0.0  ;;  %v2768_v10 = vmax.f32 %v2640_v2, 0.0  ;;  %v2371_v16 = vld [vmem:[#allocation2 + $0x80] sm:$0xff]  ;;  %v1659_v22 = vpop.f32.mrb[38].mxu0  ;;  %v1915_v23 = vpop.f32.mrb[38].mxu1 }
 0x14d   : > { %v4010_v8 = vpack.c.bf16 %v2767_v0, %v2767_v0  ;;  %v2832_v11 = vmax.f32 %v2704_v3, 0.0  ;;  %v2435_v17 = vld [vmem:[#allocation2 + $0x280] sm:$0xff]  ;;  %v2507_v26 = vmul.f32 %v4926_v20, %v2371_v16  ;;  %v1661_v28 = vpop.f32.mrb[39].mxu0  ;;  %v1917_v29 = vpop.f32.mrb[39].mxu1  ;;  %2242 = vst.msk [vmem:[#allocation2 + $0x90] sm:$0xff] %vm313_vm3, %v2113_v18  ;;  %2306 = vst.msk [vmem:[#allocation2 + $0x290] sm:$0xff] %vm313_vm3, %v2177_v19  ;;  %v2114_v32 = vadd.f32 %v1659_v22, %v461_v14 }
 0x14e   : > { %v4074_v9 = vpack.c.bf16 %v2831_v1, %v2831_v1  ;;  %v4011_v24 = vpack.c.bf16 %v2768_v10, %v2768_v10  ;;  %v2571_v27 = vmul.f32 %v4926_v20, %v2435_v17  ;;  %v2178_v33 = vadd.f32 %v1915_v23, %v525_v15  ;;  %v464_v10 = vld [vmem:[#allocation2 + $0xb0] sm:$0xff]  ;;  %v465_v18 = vld [vmem:[#allocation2 + $0xb8] sm:$0xff] }
 0x14f   : > { %3408 = vst.msk [vmem:[%s4955_s28 + $0x38] sm:$0xf] %vm3393_vm4, %v4010_v8  ;;  %v4075_v25 = vpack.c.bf16 %v2832_v11, %v2832_v11  ;;  %v2641_v34 = vadd.f32 %v4931_v21, %v2507_v26  ;;  %v528_v11 = vld [vmem:[#allocation2 + $0x2b0] sm:$0xff]  ;;  %v529_v19 = vld [vmem:[#allocation2 + $0x2b8] sm:$0xff] }
 0x150   : > { %3472 = vst.msk [vmem:[%s4955_s28 + $0x138] sm:$0xf] %vm3393_vm4, %v4074_v9  ;;  %v2372_v30 = vld [vmem:[#allocation2 + $0x88] sm:$0xff]  ;;  %3409 = vst.msk [vmem:[%s4955_s28 + $0x3c] sm:$0xf] %vm3393_vm4, %v4011_v24  ;;  %v2705_v35 = vadd.f32 %v4931_v21, %v2571_v27 }
 0x151   : > { %v2436_v31 = vld [vmem:[#allocation2 + $0x288] sm:$0xff]  ;;  %3473 = vst.msk [vmem:[%s4955_s28 + $0x13c] sm:$0xf] %vm3393_vm4, %v4075_v25  ;;  %v2508_v36 = vmul.f32 %v4926_v20, %v2372_v30  ;;  %v2769_v38 = vmax.f32 %v2641_v34, 0.0 }
 0x152   : > { %v2572_v37 = vmul.f32 %v4926_v20, %v2436_v31  ;;  %2243 = vst.msk [vmem:[#allocation2 + $0x98] sm:$0xff] %vm313_vm3, %v2114_v32  ;;  %2307 = vst.msk [vmem:[#allocation2 + $0x298] sm:$0xff] %vm313_vm3, %v2178_v33  ;;  %v2833_v39 = vmax.f32 %v2705_v35, 0.0  ;;  %v1664_v44 = vpop.f32.mrb[40].mxu0  ;;  %v1920_v45 = vpop.f32.mrb[40].mxu1 }
 0x153   : > { %v2642_v40 = vadd.f32 %v4931_v21, %v2508_v36  ;;  %v4012_v48 = vpack.c.bf16 %v2769_v38, %v2769_v38  ;;  %v1666_v52 = vpop.f32.mrb[41].mxu0  ;;  %v1922_v53 = vpop.f32.mrb[41].mxu1  ;;  %v2115_v54 = vadd.f32 %v1664_v44, %v462_v42  ;;  %v2179_v55 = vadd.f32 %v1920_v45, %v526_v43 }
 0x154   : > { %v2706_v41 = vadd.f32 %v4931_v21, %v2572_v37  ;;  %v4076_v49 = vpack.c.bf16 %v2833_v39, %v2833_v39  ;;  %v1667_v56 = vpop.f32.mrb[42].mxu0  ;;  %v1923_v57 = vpop.f32.mrb[42].mxu1  ;;  %v2373_v60 = vld [vmem:[#allocation2 + $0x90] sm:$0xff] }
 0x155   : > { %v2770_v50 = vmax.f32 %v2642_v40, 0.0  ;;  %3410 = vst.msk [vmem:[%s4955_s28 + $0x40] sm:$0xf] %vm3393_vm4, %v4012_v48  ;;  %v2437_v61 = vld [vmem:[#allocation2 + $0x290] sm:$0xff]  ;;  %v2116_v62 = vadd.f32 %v1667_v56, %v463_v46  ;;  %v2180_v63 = vadd.f32 %v1923_v57, %v527_v47  ;;  %v1669_v0 = vpop.f32.mrb[43].mxu0  ;;  %v1925_v1 = vpop.f32.mrb[43].mxu1  ;;  %v2509_v2 = vmul.f32 %v4926_v20, %v2373_v60 }
 0x156   : > { %v2834_v51 = vmax.f32 %v2706_v41, 0.0  ;;  %3474 = vst.msk [vmem:[%s4955_s28 + $0x140] sm:$0xf] %vm3393_vm4, %v4076_v49  ;;  %v2573_v3 = vmul.f32 %v4926_v20, %v2437_v61  ;;  %v466_v48 = vld [vmem:[#allocation2 + $0xc0] sm:$0xff]  ;;  %v467_v61 = vld [vmem:[#allocation2 + $0xc8] sm:$0xff] }
 0x157   : > { %v4013_v58 = vpack.c.bf16 %v2770_v50, %v2770_v50  ;;  %2244 = vst.msk [vmem:[#allocation2 + $0xa0] sm:$0xff] %vm313_vm3, %v2115_v54  ;;  %2308 = vst.msk [vmem:[#allocation2 + $0x2a0] sm:$0xff] %vm313_vm3, %v2179_v55  ;;  %v2643_v6 = vadd.f32 %v4931_v21, %v2509_v2  ;;  %v530_v49 = vld [vmem:[#allocation2 + $0x2c0] sm:$0xff] }
 0x158   : > { %v4077_v59 = vpack.c.bf16 %v2834_v51, %v2834_v51  ;;  %2245 = vst.msk [vmem:[#allocation2 + $0xa8] sm:$0xff] %vm313_vm3, %v2116_v62  ;;  %2309 = vst.msk [vmem:[#allocation2 + $0x2a8] sm:$0xff] %vm313_vm3, %v2180_v63  ;;  %v2707_v7 = vadd.f32 %v4931_v21, %v2573_v3  ;;  %v531_v62 = vld [vmem:[#allocation2 + $0x2c8] sm:$0xff] }
 0x159   : > { %3411 = vst.msk [vmem:[%s4955_s28 + $0x44] sm:$0xf] %vm3393_vm4, %v4013_v58  ;;  %v2374_v4 = vld [vmem:[#allocation2 + $0x98] sm:$0xff]  ;;  %v2771_v12 = vmax.f32 %v2643_v6, 0.0  ;;  %v5174_v6 = vld [vmem:[%s5626_s2] ss:$0 sm:$0xff] }
 0x15a   : > { %3475 = vst.msk [vmem:[%s4955_s28 + $0x144] sm:$0xf] %vm3393_vm4, %v4077_v59  ;;  %v2438_v5 = vld [vmem:[#allocation2 + $0x298] sm:$0xff]  ;;  %v2510_v8 = vmul.f32 %v4926_v20, %v2374_v4  ;;  %v2835_v13 = vmax.f32 %v2707_v7, 0.0  ;;  %v1672_v16 = vpop.f32.mrb[44].mxu0  ;;  %v1928_v17 = vpop.f32.mrb[44].mxu1 }
 0x15b   : > { %v2574_v9 = vmul.f32 %v4926_v20, %v2438_v5  ;;  %v2117_v22 = vadd.f32 %v1672_v16, %v464_v10  ;;  %v2181_v23 = vadd.f32 %v1928_v17, %v528_v11  ;;  %v1674_v24 = vpop.f32.mrb[45].mxu0  ;;  %v1930_v25 = vpop.f32.mrb[45].mxu1  ;;  %v4014_v26 = vpack.c.bf16 %v2771_v12, %v2771_v12 }
 0x15c   : > { %v2644_v14 = vadd.f32 %v4931_v21, %v2510_v8  ;;  %v4078_v27 = vpack.c.bf16 %v2835_v13, %v2835_v13  ;;  %v1675_v30 = vpop.f32.mrb[46].mxu0  ;;  %v1931_v31 = vpop.f32.mrb[46].mxu1 }
 0x15d   : > { %v2708_v15 = vadd.f32 %v4931_v21, %v2574_v9  ;;  %2246 = vst.msk [vmem:[#allocation2 + $0xb0] sm:$0xff] %vm313_vm3, %v2117_v22  ;;  %2310 = vst.msk [vmem:[#allocation2 + $0x2b0] sm:$0xff] %vm313_vm3, %v2181_v23  ;;  %v2118_v34 = vadd.f32 %v1675_v30, %v465_v18  ;;  %v2182_v35 = vadd.f32 %v1931_v31, %v529_v19  ;;  %v1677_v36 = vpop.f32.mrb[47].mxu0  ;;  %v1933_v37 = vpop.f32.mrb[47].mxu1 }
 0x15e   : > { %v2772_v28 = vmax.f32 %v2644_v14, 0.0  ;;  %v2375_v32 = vld [vmem:[#allocation2 + $0xa0] sm:$0xff]  ;;  %3412 = vst.msk [vmem:[%s4955_s28 + $0x48] sm:$0xf] %vm3393_vm4, %v4014_v26  ;;  %3476 = vst.msk [vmem:[%s4955_s28 + $0x148] sm:$0xf] %vm3393_vm4, %v4078_v27 }
 0x15f   : > { %v2836_v29 = vmax.f32 %v2708_v15, 0.0  ;;  %v2439_v33 = vld [vmem:[#allocation2 + $0x2a0] sm:$0xff]  ;;  %v2511_v40 = vmul.f32 %v4926_v20, %v2375_v32  ;;  %v2376_v42 = vld [vmem:[#allocation2 + $0xa8] sm:$0xff]  ;;  %2247 = vst.msk [vmem:[#allocation2 + $0xb8] sm:$0xff] %vm313_vm3, %v2118_v34  ;;  %2311 = vst.msk [vmem:[#allocation2 + $0x2b8] sm:$0xff] %vm313_vm3, %v2182_v35 }
 0x160   : > { %v4015_v38 = vpack.c.bf16 %v2772_v28, %v2772_v28  ;;  %v2575_v41 = vmul.f32 %v4926_v20, %v2439_v33  ;;  %v2440_v43 = vld [vmem:[#allocation2 + $0x2a8] sm:$0xff]  ;;  %v2512_v44 = vmul.f32 %v4926_v20, %v2376_v42  ;;  %v5191_v15 = vld [vmem:[%s5627_s3] ss:$0 sm:$0xff]  ;;  %v468_v26 = vld [vmem:[#allocation2 + $0xd0] sm:$0xff] }
 0x161   : > { %v4079_v39 = vpack.c.bf16 %v2836_v29, %v2836_v29  ;;  %v2576_v45 = vmul.f32 %v4926_v20, %v2440_v43  ;;  %v2645_v46 = vadd.f32 %v4931_v21, %v2511_v40  ;;  %v532_v27 = vld [vmem:[#allocation2 + $0x2d0] sm:$0xff]  ;;  %v469_v36 = vld [vmem:[#allocation2 + $0xd8] sm:$0xff] }
 0x162   : > { %3413 = vst.msk [vmem:[%s4955_s28 + $0x4c] sm:$0xf] %vm3393_vm4, %v4015_v38  ;;  %v2709_v47 = vadd.f32 %v4931_v21, %v2575_v41  ;;  %v2646_v50 = vadd.f32 %v4931_v21, %v2512_v44  ;;  %v1680_v53 = vpop.f32.mrb[48].mxu0  ;;  %v1936_v54 = vpop.f32.mrb[48].mxu1  ;;  %v533_v37 = vld [vmem:[#allocation2 + $0x2d8] sm:$0xff] }
 0x163   : > { %3477 = vst.msk [vmem:[%s4955_s28 + $0x14c] sm:$0xf] %vm3393_vm4, %v4079_v39  ;;  %v2710_v51 = vadd.f32 %v4931_v21, %v2576_v45  ;;  %v2773_v52 = vmax.f32 %v2645_v46, 0.0  ;;  %v2119_v57 = vadd.f32 %v1680_v53, %v466_v48  ;;  %v2183_v58 = vadd.f32 %v1936_v54, %v530_v49  ;;  %v1682_v59 = vpop.f32.mrb[49].mxu0  ;;  %v1938_v60 = vpop.f32.mrb[49].mxu1 }
 0x164   : > { %v2837_v20 = vmax.f32 %v2709_v47, 0.0  ;;  %v2774_v55 = vmax.f32 %v2646_v50, 0.0  ;;  %v2377_v1 = vld [vmem:[#allocation2 + $0xb0] sm:$0xff]  ;;  %v1683_v3 = vpop.f32.mrb[50].mxu0  ;;  %v1939_v21 = vpop.f32.mrb[50].mxu1 }
 0x165   : > { %v2838_v56 = vmax.f32 %v2710_v51, 0.0  ;;  %v4016_v63 = vpack.c.bf16 %v2773_v52, %v2773_v52  ;;  %v2441_v2 = vld [vmem:[#allocation2 + $0x2b0] sm:$0xff]  ;;  %v2513_v7 = vmul.f32 %v5174_v6, %v2377_v1  ;;  %2248 = vst.msk [vmem:[#allocation2 + $0xc0] sm:$0xff] %vm313_vm3, %v2119_v57  ;;  %2312 = vst.msk [vmem:[#allocation2 + $0x2c0] sm:$0xff] %vm313_vm3, %v2183_v58  ;;  %v1685_v9 = vpop.f32.mrb[51].mxu0  ;;  %v1941_v10 = vpop.f32.mrb[51].mxu1  ;;  %v2120_v13 = vadd.f32 %v1683_v3, %v467_v61 }
 0x166   : > { %v4080_v0 = vpack.c.bf16 %v2837_v20, %v2837_v20  ;;  %v4017_v4 = vpack.c.bf16 %v2774_v55, %v2774_v55  ;;  %v2577_v8 = vmul.f32 %v5174_v6, %v2441_v2  ;;  %v2378_v11 = vld [vmem:[#allocation2 + $0xb8] sm:$0xff]  ;;  %v2184_v14 = vadd.f32 %v1939_v21, %v531_v62  ;;  %v470_v57 = vld [vmem:[#allocation2 + $0xe0] sm:$0xff]  ;;  %v471_v1 = vld [vmem:[#allocation2 + $0xe8] sm:$0xff] }
 0x167   : > { %v4081_v5 = vpack.c.bf16 %v2838_v56, %v2838_v56  ;;  %3414 = vst.msk [vmem:[%s4955_s28 + $0x50] sm:$0xf] %vm3393_vm4, %v4016_v63  ;;  %v2442_v12 = vld [vmem:[#allocation2 + $0x2b8] sm:$0xff]  ;;  %v2647_v16 = vadd.f32 %v5191_v15, %v2513_v7  ;;  %v2514_v18 = vmul.f32 %v5174_v6, %v2378_v11  ;;  %v534_v58 = vld [vmem:[#allocation2 + $0x2e0] sm:$0xff]  ;;  %v535_v2 = vld [vmem:[#allocation2 + $0x2e8] sm:$0xff] }
 0x168   : > { %3478 = vst.msk [vmem:[%s4955_s28 + $0x150] sm:$0xf] %vm3393_vm4, %v4080_v0  ;;  %3415 = vst.msk [vmem:[%s4955_s28 + $0x54] sm:$0xf] %vm3393_vm4, %v4017_v4  ;;  %v2711_v17 = vadd.f32 %v5191_v15, %v2577_v8  ;;  %v2578_v19 = vmul.f32 %v5174_v6, %v2442_v12 }
 0x169   : > { %3479 = vst.msk [vmem:[%s4955_s28 + $0x154] sm:$0xf] %vm3393_vm4, %v4081_v5  ;;  %v2775_v22 = vmax.f32 %v2647_v16, 0.0  ;;  %v2648_v24 = vadd.f32 %v5191_v15, %v2514_v18 }
 0x16a   : > { %2249 = vst.msk [vmem:[#allocation2 + $0xc8] sm:$0xff] %vm313_vm3, %v2120_v13  ;;  %2313 = vst.msk [vmem:[#allocation2 + $0x2c8] sm:$0xff] %vm313_vm3, %v2184_v14  ;;  %v2839_v23 = vmax.f32 %v2711_v17, 0.0  ;;  %v2712_v25 = vadd.f32 %v5191_v15, %v2578_v19  ;;  %v1688_v28 = vpop.f32.mrb[52].mxu0  ;;  %v1944_v29 = vpop.f32.mrb[52].mxu1 }
 0x16b   : > { %v4018_v30 = vpack.c.bf16 %v2775_v22, %v2775_v22  ;;  %v2776_v32 = vmax.f32 %v2648_v24, 0.0  ;;  %v1690_v34 = vpop.f32.mrb[53].mxu0  ;;  %v1946_v35 = vpop.f32.mrb[53].mxu1  ;;  %v2121_v40 = vadd.f32 %v1688_v28, %v468_v26  ;;  %v2185_v41 = vadd.f32 %v1944_v29, %v532_v27 }
 0x16c   : > { %v4082_v31 = vpack.c.bf16 %v2839_v23, %v2839_v23  ;;  %v2840_v33 = vmax.f32 %v2712_v25, 0.0  ;;  %v2379_v38 = vld [vmem:[#allocation2 + $0xc0] sm:$0xff]  ;;  %v1691_v42 = vpop.f32.mrb[54].mxu0  ;;  %v1947_v43 = vpop.f32.mrb[54].mxu1 }
 0x16d   : > { %v2443_v39 = vld [vmem:[#allocation2 + $0x2c0] sm:$0xff]  ;;  %3416 = vst.msk [vmem:[%s4955_s28 + $0x58] sm:$0xf] %vm3393_vm4, %v4018_v30  ;;  %v4019_v44 = vpack.c.bf16 %v2776_v32, %v2776_v32  ;;  %v2515_v46 = vmul.f32 %v5174_v6, %v2379_v38  ;;  %v1693_v48 = vpop.f32.mrb[55].mxu0  ;;  %v1949_v49 = vpop.f32.mrb[55].mxu1  ;;  %v2122_v50 = vadd.f32 %v1691_v42, %v469_v36  ;;  %v2186_v51 = vadd.f32 %v1947_v43, %v533_v37  ;;  %v472_v32 = vld [vmem:[#allocation2 + $0xf0] sm:$0xff] }
 0x16e   : > { %3480 = vst.msk [vmem:[%s4955_s28 + $0x158] sm:$0xf] %vm3393_vm4, %v4082_v31  ;;  %v4083_v45 = vpack.c.bf16 %v2840_v33, %v2840_v33  ;;  %v2579_v47 = vmul.f32 %v5174_v6, %v2443_v39  ;;  %v536_v33 = vld [vmem:[#allocation2 + $0x2f0] sm:$0xff] }
 0x16f   : > { %2250 = vst.msk [vmem:[#allocation2 + $0xd0] sm:$0xff] %vm313_vm3, %v2121_v40  ;;  %2314 = vst.msk [vmem:[#allocation2 + $0x2d0] sm:$0xff] %vm313_vm3, %v2185_v41  ;;  %v2649_v52 = vadd.f32 %v5191_v15, %v2515_v46  ;;  %v473_v40 = vld [vmem:[#allocation2 + $0xf8] sm:$0xff] }
 0x170   : > { %3417 = vst.msk [vmem:[%s4955_s28 + $0x5c] sm:$0xf] %vm3393_vm4, %v4019_v44  ;;  %3481 = vst.msk [vmem:[%s4955_s28 + $0x15c] sm:$0xf] %vm3393_vm4, %v4083_v45  ;;  %v2713_v20 = vadd.f32 %v5191_v15, %v2579_v47  ;;  %v537_v41 = vld [vmem:[#allocation2 + $0x2f8] sm:$0xff] }
 0x171   : > { %v2380_v53 = vld [vmem:[#allocation2 + $0xc8] sm:$0xff]  ;;  %2251 = vst.msk [vmem:[#allocation2 + $0xd8] sm:$0xff] %vm313_vm3, %v2122_v50  ;;  %2315 = vst.msk [vmem:[#allocation2 + $0x2d8] sm:$0xff] %vm313_vm3, %v2186_v51  ;;  %v2777_v59 = vmax.f32 %v2649_v52, 0.0 }
 0x172   : > { %v2444_v54 = vld [vmem:[#allocation2 + $0x2c8] sm:$0xff]  ;;  %v2516_v55 = vmul.f32 %v5174_v6, %v2380_v53  ;;  %v2841_v60 = vmax.f32 %v2713_v20, 0.0  ;;  %v1696_v63 = vpop.f32.mrb[56].mxu0  ;;  %v1952_v0 = vpop.f32.mrb[56].mxu1 }
 0x173   : > { %v2580_v56 = vmul.f32 %v5174_v6, %v2444_v54  ;;  %v4020_v3 = vpack.c.bf16 %v2777_v59, %v2777_v59  ;;  %v2123_v4 = vadd.f32 %v1696_v63, %v470_v57  ;;  %v2187_v5 = vadd.f32 %v1952_v0, %v534_v58  ;;  %v1698_v7 = vpop.f32.mrb[57].mxu0  ;;  %v1954_v8 = vpop.f32.mrb[57].mxu1 }
 0x174   : > { %v2650_v61 = vadd.f32 %v5191_v15, %v2516_v55  ;;  %v4084_v21 = vpack.c.bf16 %v2841_v60, %v2841_v60  ;;  %v1699_v11 = vpop.f32.mrb[58].mxu0  ;;  %v1955_v12 = vpop.f32.mrb[58].mxu1  ;;  %v474_v7 = vld [vmem:[#allocation2 + $0x100] sm:$0xff] }
 0x175   : > { %v2714_v62 = vadd.f32 %v5191_v15, %v2580_v56  ;;  %3418 = vst.msk [vmem:[%s4955_s28 + $0x60] sm:$0xf] %vm3393_vm4, %v4020_v3  ;;  %v2124_v16 = vadd.f32 %v1699_v11, %v471_v1  ;;  %v2188_v17 = vadd.f32 %v1955_v12, %v535_v2  ;;  %v1701_v18 = vpop.f32.mrb[59].mxu0  ;;  %v1957_v19 = vpop.f32.mrb[59].mxu1  ;;  %v538_v8 = vld [vmem:[#allocation2 + $0x300] sm:$0xff] }
 0x176   : > { %v2778_v9 = vmax.f32 %v2650_v61, 0.0  ;;  %3482 = vst.msk [vmem:[%s4955_s28 + $0x160] sm:$0xf] %vm3393_vm4, %v4084_v21  ;;  %v2381_v13 = vld [vmem:[#allocation2 + $0xd0] sm:$0xff]  ;;  %v475_v18 = vld [vmem:[#allocation2 + $0x108] sm:$0xff] }
 0x177   : > { %v2842_v10 = vmax.f32 %v2714_v62, 0.0  ;;  %v2445_v14 = vld [vmem:[#allocation2 + $0x2d0] sm:$0xff]  ;;  %2252 = vst.msk [vmem:[#allocation2 + $0xe0] sm:$0xff] %vm313_vm3, %v2123_v4  ;;  %2316 = vst.msk [vmem:[#allocation2 + $0x2e0] sm:$0xff] %vm313_vm3, %v2187_v5  ;;  %v2517_v24 = vmul.f32 %v5174_v6, %v2381_v13  ;;  %v539_v19 = vld [vmem:[#allocation2 + $0x308] sm:$0xff] }
 0x178   : > { %v4021_v22 = vpack.c.bf16 %v2778_v9, %v2778_v9  ;;  %v2581_v25 = vmul.f32 %v5174_v6, %v2445_v14  ;;  %v2382_v26 = vld [vmem:[#allocation2 + $0xd8] sm:$0xff]  ;;  %2253 = vst.msk [vmem:[#allocation2 + $0xe8] sm:$0xff] %vm313_vm3, %v2124_v16  ;;  %2317 = vst.msk [vmem:[#allocation2 + $0x2e8] sm:$0xff] %vm313_vm3, %v2188_v17 }
 0x179   : > { %v4085_v23 = vpack.c.bf16 %v2842_v10, %v2842_v10  ;;  %v2446_v27 = vld [vmem:[#allocation2 + $0x2d8] sm:$0xff]  ;;  %v2651_v28 = vadd.f32 %v5191_v15, %v2517_v24  ;;  %v2518_v30 = vmul.f32 %v5174_v6, %v2382_v26 }
 0x17a   : > { %3419 = vst.msk [vmem:[%s4955_s28 + $0x64] sm:$0xf] %vm3393_vm4, %v4021_v22  ;;  %v2715_v29 = vadd.f32 %v5191_v15, %v2581_v25  ;;  %v2582_v31 = vmul.f32 %v5174_v6, %v2446_v27  ;;  %v1704_v38 = vpop.f32.mrb[60].mxu0  ;;  %v1960_v39 = vpop.f32.mrb[60].mxu1 }
 0x17b   : > { %3483 = vst.msk [vmem:[%s4955_s28 + $0x164] sm:$0xf] %vm3393_vm4, %v4085_v23  ;;  %v2779_v34 = vmax.f32 %v2651_v28, 0.0  ;;  %v2652_v36 = vadd.f32 %v5191_v15, %v2518_v30  ;;  %v2125_v42 = vadd.f32 %v1704_v38, %v472_v32  ;;  %v2189_v43 = vadd.f32 %v1960_v39, %v536_v33  ;;  %v1706_v44 = vpop.f32.mrb[61].mxu0  ;;  %v1962_v45 = vpop.f32.mrb[61].mxu1 }
 0x17c   : > { %v2843_v35 = vmax.f32 %v2715_v29, 0.0  ;;  %v2716_v37 = vadd.f32 %v5191_v15, %v2582_v31  ;;  %v1707_v52 = vpop.f32.mrb[62].mxu0  ;;  %v1963_v20 = vpop.f32.mrb[62].mxu1 }
 0x17d   : > { %v4022_v46 = vpack.c.bf16 %v2779_v34, %v2779_v34  ;;  %v2780_v48 = vmax.f32 %v2652_v36, 0.0  ;;  %2254 = vst.msk [vmem:[#allocation2 + $0xf0] sm:$0xff] %vm313_vm3, %v2125_v42  ;;  %2318 = vst.msk [vmem:[#allocation2 + $0x2f0] sm:$0xff] %vm313_vm3, %v2189_v43  ;;  %v2126_v55 = vadd.f32 %v1707_v52, %v473_v40  ;;  %v2190_v56 = vadd.f32 %v1963_v20, %v537_v41  ;;  %v1709_v57 = vpop.f32.mrb[63].mxu0  ;;  %v1965_v58 = vpop.f32.mrb[63].mxu1 }
 0x17e   : > { %v4086_v47 = vpack.c.bf16 %v2843_v35, %v2843_v35  ;;  %v2844_v49 = vmax.f32 %v2716_v37, 0.0  ;;  %v2383_v50 = vld [vmem:[#allocation2 + $0xe0] sm:$0xff] }
 0x17f   : > { %v2447_v51 = vld [vmem:[#allocation2 + $0x2e0] sm:$0xff]  ;;  %v2519_v53 = vmul.f32 %v5174_v6, %v2383_v50  ;;  %3420 = vst.msk [vmem:[%s4955_s28 + $0x68] sm:$0xf] %vm3393_vm4, %v4022_v46  ;;  %v4023_v59 = vpack.c.bf16 %v2780_v48, %v2780_v48  ;;  %v2384_v61 = vld [vmem:[#allocation2 + $0xe8] sm:$0xff]  ;;  %v476_v46 = vld [vmem:[#allocation2 + $0x110] sm:$0xff] }
 0x180   : > { %v2583_v54 = vmul.f32 %v5174_v6, %v2447_v51  ;;  %3484 = vst.msk [vmem:[%s4955_s28 + $0x168] sm:$0xf] %vm3393_vm4, %v4086_v47  ;;  %v4087_v60 = vpack.c.bf16 %v2844_v49, %v2844_v49  ;;  %v2448_v62 = vld [vmem:[#allocation2 + $0x2e8] sm:$0xff]  ;;  %v2520_v1 = vmul.f32 %v5174_v6, %v2384_v61  ;;  %v540_v47 = vld [vmem:[#allocation2 + $0x310] sm:$0xff]  ;;  %v477_v50 = vld [vmem:[#allocation2 + $0x118] sm:$0xff] }
 0x181   : > { %v2653_v63 = vadd.f32 %v5191_v15, %v2519_v53  ;;  %v2584_v2 = vmul.f32 %v5174_v6, %v2448_v62  ;;  %2255 = vst.msk [vmem:[#allocation2 + $0xf8] sm:$0xff] %vm313_vm3, %v2126_v55  ;;  %2319 = vst.msk [vmem:[#allocation2 + $0x2f8] sm:$0xff] %vm313_vm3, %v2190_v56  ;;  %v541_v51 = vld [vmem:[#allocation2 + $0x318] sm:$0xff] }
 0x182   : > { %v2717_v0 = vadd.f32 %v5191_v15, %v2583_v54  ;;  %3421 = vst.msk [vmem:[%s4955_s28 + $0x6c] sm:$0xf] %vm3393_vm4, %v4023_v59  ;;  %3485 = vst.msk [vmem:[%s4955_s28 + $0x16c] sm:$0xf] %vm3393_vm4, %v4087_v60  ;;  %v2654_v4 = vadd.f32 %v5191_v15, %v2520_v1  ;;  %v1712_v9 = vpop.f32.mrb[64].mxu0  ;;  %v1968_v10 = vpop.f32.mrb[64].mxu1 }
 0x183   : > { %v2781_v3 = vmax.f32 %v2653_v63, 0.0  ;;  %v2718_v5 = vadd.f32 %v5191_v15, %v2584_v2  ;;  %v1714_v16 = vpop.f32.mrb[65].mxu0  ;;  %v1970_v17 = vpop.f32.mrb[65].mxu1  ;;  %v2127_v24 = vadd.f32 %v1712_v9, %v474_v7  ;;  %v2191_v25 = vadd.f32 %v1968_v10, %v538_v8 }
 0x184   : > { %v2845_v21 = vmax.f32 %v2717_v0, 0.0  ;;  %v2782_v13 = vmax.f32 %v2654_v4, 0.0  ;;  %v2385_v22 = vld [vmem:[#allocation2 + $0xf0] sm:$0xff]  ;;  %v1715_v26 = vpop.f32.mrb[66].mxu0  ;;  %v1971_v27 = vpop.f32.mrb[66].mxu1 }
 0x185   : > { %v4024_v11 = vpack.c.bf16 %v2781_v3, %v2781_v3  ;;  %v2846_v14 = vmax.f32 %v2718_v5, 0.0  ;;  %v2449_v23 = vld [vmem:[#allocation2 + $0x2f0] sm:$0xff]  ;;  %v2521_v30 = vmul.f32 %v5174_v6, %v2385_v22  ;;  %v1717_v32 = vpop.f32.mrb[67].mxu0  ;;  %v1973_v33 = vpop.f32.mrb[67].mxu1  ;;  %2256 = vst.msk [vmem:[#allocation2 + $0x100] sm:$0xff] %vm313_vm3, %v2127_v24  ;;  %2320 = vst.msk [vmem:[#allocation2 + $0x300] sm:$0xff] %vm313_vm3, %v2191_v25  ;;  %v2128_v36 = vadd.f32 %v1715_v26, %v475_v18 }
 0x186   : > { %v4088_v12 = vpack.c.bf16 %v2845_v21, %v2845_v21  ;;  %v4025_v28 = vpack.c.bf16 %v2782_v13, %v2782_v13  ;;  %v2585_v31 = vmul.f32 %v5174_v6, %v2449_v23  ;;  %v2192_v37 = vadd.f32 %v1971_v27, %v539_v19  ;;  %v478_v13 = vld [vmem:[#allocation2 + $0x120] sm:$0xff]  ;;  %v479_v24 = vld [vmem:[#allocation2 + $0x128] sm:$0xff] }
 0x187   : > { %3422 = vst.msk [vmem:[%s4955_s28 + $0x70] sm:$0xf] %vm3393_vm4, %v4024_v11  ;;  %v4089_v29 = vpack.c.bf16 %v2846_v14, %v2846_v14  ;;  %v2655_v38 = vadd.f32 %v5191_v15, %v2521_v30  ;;  %v542_v14 = vld [vmem:[#allocation2 + $0x320] sm:$0xff]  ;;  %v543_v25 = vld [vmem:[#allocation2 + $0x328] sm:$0xff] }
 0x188   : > { %3486 = vst.msk [vmem:[%s4955_s28 + $0x170] sm:$0xf] %vm3393_vm4, %v4088_v12  ;;  %v2386_v34 = vld [vmem:[#allocation2 + $0xf8] sm:$0xff]  ;;  %3423 = vst.msk [vmem:[%s4955_s28 + $0x74] sm:$0xf] %vm3393_vm4, %v4025_v28  ;;  %v2719_v39 = vadd.f32 %v5191_v15, %v2585_v31 }
 0x189   : > { %v2450_v35 = vld [vmem:[#allocation2 + $0x2f8] sm:$0xff]  ;;  %3487 = vst.msk [vmem:[%s4955_s28 + $0x174] sm:$0xf] %vm3393_vm4, %v4089_v29  ;;  %v2522_v40 = vmul.f32 %v5174_v6, %v2386_v34  ;;  %v2783_v42 = vmax.f32 %v2655_v38, 0.0 }
 0x18a   : > { %v2586_v41 = vmul.f32 %v5174_v6, %v2450_v35  ;;  %2257 = vst.msk [vmem:[#allocation2 + $0x108] sm:$0xff] %vm313_vm3, %v2128_v36  ;;  %2321 = vst.msk [vmem:[#allocation2 + $0x308] sm:$0xff] %vm313_vm3, %v2192_v37  ;;  %v2847_v43 = vmax.f32 %v2719_v39, 0.0  ;;  %v1720_v48 = vpop.f32.mrb[68].mxu0  ;;  %v1976_v49 = vpop.f32.mrb[68].mxu1 }
 0x18b   : > { %v2656_v44 = vadd.f32 %v5191_v15, %v2522_v40  ;;  %v4026_v52 = vpack.c.bf16 %v2783_v42, %v2783_v42  ;;  %v1722_v55 = vpop.f32.mrb[69].mxu0  ;;  %v1978_v56 = vpop.f32.mrb[69].mxu1  ;;  %v2129_v57 = vadd.f32 %v1720_v48, %v476_v46  ;;  %v2193_v58 = vadd.f32 %v1976_v49, %v540_v47 }
 0x18c   : > { %v2720_v45 = vadd.f32 %v5191_v15, %v2586_v41  ;;  %v4090_v20 = vpack.c.bf16 %v2847_v43, %v2847_v43  ;;  %v1723_v59 = vpop.f32.mrb[70].mxu0  ;;  %v1979_v60 = vpop.f32.mrb[70].mxu1  ;;  %v2387_v63 = vld [vmem:[#allocation2 + $0x100] sm:$0xff] }
 0x18d   : > { %v2784_v53 = vmax.f32 %v2656_v44, 0.0  ;;  %3424 = vst.msk [vmem:[%s4955_s28 + $0x78] sm:$0xf] %vm3393_vm4, %v4026_v52  ;;  %v2451_v0 = vld [vmem:[#allocation2 + $0x300] sm:$0xff]  ;;  %v2130_v1 = vadd.f32 %v1723_v59, %v477_v50  ;;  %v2194_v2 = vadd.f32 %v1979_v60, %v541_v51  ;;  %v1725_v3 = vpop.f32.mrb[71].mxu0  ;;  %v1981_v21 = vpop.f32.mrb[71].mxu1  ;;  %v2523_v4 = vmul.f32 %v5174_v6, %v2387_v63 }
 0x18e   : > { %v2848_v54 = vmax.f32 %v2720_v45, 0.0  ;;  %3488 = vst.msk [vmem:[%s4955_s28 + $0x178] sm:$0xf] %vm3393_vm4, %v4090_v20  ;;  %v2587_v5 = vmul.f32 %v5174_v6, %v2451_v0  ;;  %v480_v52 = vld [vmem:[#allocation2 + $0x130] sm:$0xff] }
 0x18f   : > { %v4027_v61 = vpack.c.bf16 %v2784_v53, %v2784_v53  ;;  %2258 = vst.msk [vmem:[#allocation2 + $0x110] sm:$0xff] %vm313_vm3, %v2129_v57  ;;  %2322 = vst.msk [vmem:[#allocation2 + $0x310] sm:$0xff] %vm313_vm3, %v2193_v58  ;;  %v2657_v9 = vadd.f32 %v5191_v15, %v2523_v4  ;;  %v544_v20 = vld [vmem:[#allocation2 + $0x330] sm:$0xff] }
 0x190   : > { %v4091_v62 = vpack.c.bf16 %v2848_v54, %v2848_v54  ;;  %2259 = vst.msk [vmem:[#allocation2 + $0x118] sm:$0xff] %vm313_vm3, %v2130_v1  ;;  %2323 = vst.msk [vmem:[#allocation2 + $0x318] sm:$0xff] %vm313_vm3, %v2194_v2  ;;  %v2721_v10 = vadd.f32 %v5191_v15, %v2587_v5  ;;  %v481_v1 = vld [vmem:[#allocation2 + $0x138] sm:$0xff] }
 0x191   : > { %3425 = vst.msk [vmem:[%s4955_s28 + $0x7c] sm:$0xf] %vm3393_vm4, %v4027_v61  ;;  %v2388_v7 = vld [vmem:[#allocation2 + $0x108] sm:$0xff]  ;;  %v2785_v16 = vmax.f32 %v2657_v9, 0.0  ;;  %v545_v2 = vld [vmem:[#allocation2 + $0x338] sm:$0xff] }
 0x192   : > { %3489 = vst.msk [vmem:[%s4955_s28 + $0x17c] sm:$0xf] %vm3393_vm4, %v4091_v62  ;;  %v2452_v8 = vld [vmem:[#allocation2 + $0x308] sm:$0xff]  ;;  %v2524_v11 = vmul.f32 %v5174_v6, %v2388_v7  ;;  %v2849_v17 = vmax.f32 %v2721_v10, 0.0  ;;  %v1728_v22 = vpop.f32.mrb[72].mxu0  ;;  %v1984_v23 = vpop.f32.mrb[72].mxu1 }
 0x193   : > { %v2588_v12 = vmul.f32 %v5174_v6, %v2452_v8  ;;  %v2131_v26 = vadd.f32 %v1728_v22, %v478_v13  ;;  %v2195_v27 = vadd.f32 %v1984_v23, %v542_v14  ;;  %v1730_v28 = vpop.f32.mrb[73].mxu0  ;;  %v1986_v29 = vpop.f32.mrb[73].mxu1  ;;  %v4028_v30 = vpack.c.bf16 %v2785_v16, %v2785_v16 }
 0x194   : > { %v2658_v18 = vadd.f32 %v5191_v15, %v2524_v11  ;;  %v4092_v31 = vpack.c.bf16 %v2849_v17, %v2849_v17  ;;  %v1731_v34 = vpop.f32.mrb[74].mxu0  ;;  %v1987_v35 = vpop.f32.mrb[74].mxu1 }
 0x195   : > { %v2722_v19 = vadd.f32 %v5191_v15, %v2588_v12  ;;  %2260 = vst.msk [vmem:[#allocation2 + $0x120] sm:$0xff] %vm313_vm3, %v2131_v26  ;;  %2324 = vst.msk [vmem:[#allocation2 + $0x320] sm:$0xff] %vm313_vm3, %v2195_v27  ;;  %v2132_v38 = vadd.f32 %v1731_v34, %v479_v24  ;;  %v2196_v39 = vadd.f32 %v1987_v35, %v543_v25  ;;  %v1733_v40 = vpop.f32.mrb[75].mxu0  ;;  %v1989_v41 = vpop.f32.mrb[75].mxu1 }
 0x196   : > { %v2786_v32 = vmax.f32 %v2658_v18, 0.0  ;;  %v2389_v36 = vld [vmem:[#allocation2 + $0x110] sm:$0xff]  ;;  %3426 = vst.msk [vmem:[%s4955_s28 + $0x80] sm:$0xf] %vm3393_vm4, %v4028_v30  ;;  %3490 = vst.msk [vmem:[%s4955_s28 + $0x180] sm:$0xf] %vm3393_vm4, %v4092_v31 }
 0x197   : > { %v2850_v33 = vmax.f32 %v2722_v19, 0.0  ;;  %v2453_v37 = vld [vmem:[#allocation2 + $0x310] sm:$0xff]  ;;  %v2525_v44 = vmul.f32 %v5174_v6, %v2389_v36  ;;  %v2390_v46 = vld [vmem:[#allocation2 + $0x118] sm:$0xff]  ;;  %2261 = vst.msk [vmem:[#allocation2 + $0x128] sm:$0xff] %vm313_vm3, %v2132_v38  ;;  %2325 = vst.msk [vmem:[#allocation2 + $0x328] sm:$0xff] %vm313_vm3, %v2196_v39 }
 0x198   : > { %v4029_v42 = vpack.c.bf16 %v2786_v32, %v2786_v32  ;;  %v2589_v45 = vmul.f32 %v5174_v6, %v2453_v37  ;;  %v2454_v47 = vld [vmem:[#allocation2 + $0x318] sm:$0xff]  ;;  %v2526_v48 = vmul.f32 %v5174_v6, %v2390_v46  ;;  %v482_v30 = vld [vmem:[#allocation2 + $0x140] sm:$0xff]  ;;  %v483_v40 = vld [vmem:[#allocation2 + $0x148] sm:$0xff] }
 0x199   : > { %v4093_v43 = vpack.c.bf16 %v2850_v33, %v2850_v33  ;;  %v2590_v49 = vmul.f32 %v5174_v6, %v2454_v47  ;;  %v2659_v50 = vadd.f32 %v5191_v15, %v2525_v44  ;;  %v546_v31 = vld [vmem:[#allocation2 + $0x340] sm:$0xff]  ;;  %v547_v41 = vld [vmem:[#allocation2 + $0x348] sm:$0xff] }
 0x19a   : > { %3427 = vst.msk [vmem:[%s4955_s28 + $0x84] sm:$0xf] %vm3393_vm4, %v4029_v42  ;;  %v2723_v51 = vadd.f32 %v5191_v15, %v2589_v45  ;;  %v2660_v53 = vadd.f32 %v5191_v15, %v2526_v48  ;;  %v1736_v57 = vpop.f32.mrb[76].mxu0  ;;  %v1992_v58 = vpop.f32.mrb[76].mxu1 }
 0x19b   : > { %3491 = vst.msk [vmem:[%s4955_s28 + $0x184] sm:$0xf] %vm3393_vm4, %v4093_v43  ;;  %v2724_v54 = vadd.f32 %v5191_v15, %v2590_v49  ;;  %v2787_v55 = vmax.f32 %v2659_v50, 0.0  ;;  %v2133_v61 = vadd.f32 %v1736_v57, %v480_v52  ;;  %v2197_v62 = vadd.f32 %v1992_v58, %v544_v20  ;;  %v1738_v63 = vpop.f32.mrb[77].mxu0  ;;  %v1994_v0 = vpop.f32.mrb[77].mxu1 }
 0x19c   : > { %v2851_v56 = vmax.f32 %v2723_v51, 0.0  ;;  %v2788_v59 = vmax.f32 %v2660_v53, 0.0  ;;  %v2391_v4 = vld [vmem:[#allocation2 + $0x120] sm:$0xff]  ;;  %v1739_v7 = vpop.f32.mrb[78].mxu0  ;;  %v1995_v8 = vpop.f32.mrb[78].mxu1 }
 0x19d   : > { %v2852_v60 = vmax.f32 %v2724_v54, 0.0  ;;  %v4030_v3 = vpack.c.bf16 %v2787_v55, %v2787_v55  ;;  %v2455_v5 = vld [vmem:[#allocation2 + $0x320] sm:$0xff]  ;;  %v2527_v11 = vmul.f32 %v5174_v6, %v2391_v4  ;;  %2262 = vst.msk [vmem:[#allocation2 + $0x130] sm:$0xff] %vm313_vm3, %v2133_v61  ;;  %2326 = vst.msk [vmem:[#allocation2 + $0x330] sm:$0xff] %vm313_vm3, %v2197_v62  ;;  %v1741_v13 = vpop.f32.mrb[79].mxu0  ;;  %v1997_v14 = vpop.f32.mrb[79].mxu1  ;;  %v2134_v18 = vadd.f32 %v1739_v7, %v481_v1 }
 0x19e   : > { %v4094_v21 = vpack.c.bf16 %v2851_v56, %v2851_v56  ;;  %v4031_v9 = vpack.c.bf16 %v2788_v59, %v2788_v59  ;;  %v2591_v12 = vmul.f32 %v5174_v6, %v2455_v5  ;;  %v2392_v16 = vld [vmem:[#allocation2 + $0x128] sm:$0xff]  ;;  %v2198_v19 = vadd.f32 %v1995_v8, %v545_v2  ;;  %v484_v61 = vld [vmem:[#allocation2 + $0x150] sm:$0xff]  ;;  %v485_v4 = vld [vmem:[#allocation2 + $0x158] sm:$0xff] }
 0x19f   : > { %v4095_v10 = vpack.c.bf16 %v2852_v60, %v2852_v60  ;;  %3428 = vst.msk [vmem:[%s4955_s28 + $0x88] sm:$0xf] %vm3393_vm4, %v4030_v3  ;;  %v2456_v17 = vld [vmem:[#allocation2 + $0x328] sm:$0xff]  ;;  %v2661_v22 = vadd.f32 %v5191_v15, %v2527_v11  ;;  %v2528_v24 = vmul.f32 %v5174_v6, %v2392_v16  ;;  %v548_v62 = vld [vmem:[#allocation2 + $0x350] sm:$0xff]  ;;  %v549_v5 = vld [vmem:[#allocation2 + $0x358] sm:$0xff] }
 0x1a0   : > { %3492 = vst.msk [vmem:[%s4955_s28 + $0x188] sm:$0xf] %vm3393_vm4, %v4094_v21  ;;  %3429 = vst.msk [vmem:[%s4955_s28 + $0x8c] sm:$0xf] %vm3393_vm4, %v4031_v9  ;;  %v2725_v23 = vadd.f32 %v5191_v15, %v2591_v12  ;;  %v2592_v25 = vmul.f32 %v5174_v6, %v2456_v17 }
 0x1a1   : > { %3493 = vst.msk [vmem:[%s4955_s28 + $0x18c] sm:$0xf] %vm3393_vm4, %v4095_v10  ;;  %v2789_v26 = vmax.f32 %v2661_v22, 0.0  ;;  %v2662_v28 = vadd.f32 %v5191_v15, %v2528_v24 }
 0x1a2   : > { %2263 = vst.msk [vmem:[#allocation2 + $0x138] sm:$0xff] %vm313_vm3, %v2134_v18  ;;  %2327 = vst.msk [vmem:[#allocation2 + $0x338] sm:$0xff] %vm313_vm3, %v2198_v19  ;;  %v2853_v27 = vmax.f32 %v2725_v23, 0.0  ;;  %v2726_v29 = vadd.f32 %v5191_v15, %v2592_v25  ;;  %v1744_v32 = vpop.f32.mrb[80].mxu0  ;;  %v2000_v33 = vpop.f32.mrb[80].mxu1 }
 0x1a3   : > { %v4032_v34 = vpack.c.bf16 %v2789_v26, %v2789_v26  ;;  %v2790_v36 = vmax.f32 %v2662_v28, 0.0  ;;  %v1746_v38 = vpop.f32.mrb[81].mxu0  ;;  %v2002_v39 = vpop.f32.mrb[81].mxu1  ;;  %v2135_v44 = vadd.f32 %v1744_v32, %v482_v30  ;;  %v2199_v45 = vadd.f32 %v2000_v33, %v546_v31 }
 0x1a4   : > { %v4096_v35 = vpack.c.bf16 %v2853_v27, %v2853_v27  ;;  %v2854_v37 = vmax.f32 %v2726_v29, 0.0  ;;  %v2393_v42 = vld [vmem:[#allocation2 + $0x130] sm:$0xff]  ;;  %v1747_v46 = vpop.f32.mrb[82].mxu0  ;;  %v2003_v47 = vpop.f32.mrb[82].mxu1 }
 0x1a5   : > { %v2457_v43 = vld [vmem:[#allocation2 + $0x330] sm:$0xff]  ;;  %3430 = vst.msk [vmem:[%s4955_s28 + $0x90] sm:$0xf] %vm3393_vm4, %v4032_v34  ;;  %v4033_v48 = vpack.c.bf16 %v2790_v36, %v2790_v36  ;;  %v2529_v50 = vmul.f32 %v5174_v6, %v2393_v42  ;;  %v1749_v52 = vpop.f32.mrb[83].mxu0  ;;  %v2005_v20 = vpop.f32.mrb[83].mxu1  ;;  %v2136_v53 = vadd.f32 %v1747_v46, %v483_v40  ;;  %v2200_v54 = vadd.f32 %v2003_v47, %v547_v41  ;;  %v486_v36 = vld [vmem:[#allocation2 + $0x160] sm:$0xff] }
 0x1a6   : > { %3494 = vst.msk [vmem:[%s4955_s28 + $0x190] sm:$0xf] %vm3393_vm4, %v4096_v35  ;;  %v4097_v49 = vpack.c.bf16 %v2854_v37, %v2854_v37  ;;  %v2593_v51 = vmul.f32 %v5174_v6, %v2457_v43  ;;  %v550_v37 = vld [vmem:[#allocation2 + $0x360] sm:$0xff] }
 0x1a7   : > { %2264 = vst.msk [vmem:[#allocation2 + $0x140] sm:$0xff] %vm313_vm3, %v2135_v44  ;;  %2328 = vst.msk [vmem:[#allocation2 + $0x340] sm:$0xff] %vm313_vm3, %v2199_v45  ;;  %v2663_v55 = vadd.f32 %v5191_v15, %v2529_v50  ;;  %v487_v44 = vld [vmem:[#allocation2 + $0x168] sm:$0xff] }
 0x1a8   : > { %3431 = vst.msk [vmem:[%s4955_s28 + $0x94] sm:$0xf] %vm3393_vm4, %v4033_v48  ;;  %3495 = vst.msk [vmem:[%s4955_s28 + $0x194] sm:$0xf] %vm3393_vm4, %v4097_v49  ;;  %v2727_v56 = vadd.f32 %v5191_v15, %v2593_v51  ;;  %v551_v45 = vld [vmem:[#allocation2 + $0x368] sm:$0xff] }
 0x1a9   : > { %v2394_v57 = vld [vmem:[#allocation2 + $0x138] sm:$0xff]  ;;  %2265 = vst.msk [vmem:[#allocation2 + $0x148] sm:$0xff] %vm313_vm3, %v2136_v53  ;;  %2329 = vst.msk [vmem:[#allocation2 + $0x348] sm:$0xff] %vm313_vm3, %v2200_v54  ;;  %v2791_v63 = vmax.f32 %v2663_v55, 0.0 }
 0x1aa   : > { %v2458_v58 = vld [vmem:[#allocation2 + $0x338] sm:$0xff]  ;;  %v2530_v59 = vmul.f32 %v5174_v6, %v2394_v57  ;;  %v2855_v0 = vmax.f32 %v2727_v56, 0.0  ;;  %v1752_v3 = vpop.f32.mrb[84].mxu0  ;;  %v2008_v21 = vpop.f32.mrb[84].mxu1 }
 0x1ab   : > { %v2594_v60 = vmul.f32 %v5174_v6, %v2458_v58  ;;  %v4034_v7 = vpack.c.bf16 %v2791_v63, %v2791_v63  ;;  %v2137_v9 = vadd.f32 %v1752_v3, %v484_v61  ;;  %v2201_v10 = vadd.f32 %v2008_v21, %v548_v62  ;;  %v1754_v11 = vpop.f32.mrb[85].mxu0  ;;  %v2010_v12 = vpop.f32.mrb[85].mxu1 }
 0x1ac   : > { %v2664_v1 = vadd.f32 %v5191_v15, %v2530_v59  ;;  %v4098_v8 = vpack.c.bf16 %v2855_v0, %v2855_v0  ;;  %v1755_v16 = vpop.f32.mrb[86].mxu0  ;;  %v2011_v17 = vpop.f32.mrb[86].mxu1  ;;  %v488_v11 = vld [vmem:[#allocation2 + $0x170] sm:$0xff] }
 0x1ad   : > { %v2728_v2 = vadd.f32 %v5191_v15, %v2594_v60  ;;  %3432 = vst.msk [vmem:[%s4955_s28 + $0x98] sm:$0xf] %vm3393_vm4, %v4034_v7  ;;  %v2138_v22 = vadd.f32 %v1755_v16, %v485_v4  ;;  %v2202_v23 = vadd.f32 %v2011_v17, %v549_v5  ;;  %v1757_v24 = vpop.f32.mrb[87].mxu0  ;;  %v2013_v25 = vpop.f32.mrb[87].mxu1  ;;  %v552_v12 = vld [vmem:[#allocation2 + $0x370] sm:$0xff] }
 0x1ae   : > { %v2792_v13 = vmax.f32 %v2664_v1, 0.0  ;;  %3496 = vst.msk [vmem:[%s4955_s28 + $0x198] sm:$0xf] %vm3393_vm4, %v4098_v8  ;;  %v2395_v18 = vld [vmem:[#allocation2 + $0x140] sm:$0xff]  ;;  %v489_v24 = vld [vmem:[#allocation2 + $0x178] sm:$0xff] }
 0x1af   : > { %v2856_v14 = vmax.f32 %v2728_v2, 0.0  ;;  %v2459_v19 = vld [vmem:[#allocation2 + $0x340] sm:$0xff]  ;;  %2266 = vst.msk [vmem:[#allocation2 + $0x150] sm:$0xff] %vm313_vm3, %v2137_v9  ;;  %2330 = vst.msk [vmem:[#allocation2 + $0x350] sm:$0xff] %vm313_vm3, %v2201_v10  ;;  %v2531_v28 = vmul.f32 %v5174_v6, %v2395_v18  ;;  %v553_v25 = vld [vmem:[#allocation2 + $0x378] sm:$0xff] }
 0x1b0   : > { %v4035_v26 = vpack.c.bf16 %v2792_v13, %v2792_v13  ;;  %v2595_v29 = vmul.f32 %v5174_v6, %v2459_v19  ;;  %v2396_v30 = vld [vmem:[#allocation2 + $0x148] sm:$0xff]  ;;  %2267 = vst.msk [vmem:[#allocation2 + $0x158] sm:$0xff] %vm313_vm3, %v2138_v22  ;;  %2331 = vst.msk [vmem:[#allocation2 + $0x358] sm:$0xff] %vm313_vm3, %v2202_v23 }
 0x1b1   : > { %v4099_v27 = vpack.c.bf16 %v2856_v14, %v2856_v14  ;;  %v2460_v31 = vld [vmem:[#allocation2 + $0x348] sm:$0xff]  ;;  %v2665_v32 = vadd.f32 %v5191_v15, %v2531_v28  ;;  %v2532_v34 = vmul.f32 %v5174_v6, %v2396_v30 }
 0x1b2   : > { %3433 = vst.msk [vmem:[%s4955_s28 + $0x9c] sm:$0xf] %vm3393_vm4, %v4035_v26  ;;  %v2729_v33 = vadd.f32 %v5191_v15, %v2595_v29  ;;  %v2596_v35 = vmul.f32 %v5174_v6, %v2460_v31  ;;  %v1760_v42 = vpop.f32.mrb[88].mxu0  ;;  %v2016_v43 = vpop.f32.mrb[88].mxu1 }
 0x1b3   : > { %3497 = vst.msk [vmem:[%s4955_s28 + $0x19c] sm:$0xf] %vm3393_vm4, %v4099_v27  ;;  %v2793_v38 = vmax.f32 %v2665_v32, 0.0  ;;  %v2666_v40 = vadd.f32 %v5191_v15, %v2532_v34  ;;  %v2139_v46 = vadd.f32 %v1760_v42, %v486_v36  ;;  %v2203_v47 = vadd.f32 %v2016_v43, %v550_v37  ;;  %v1762_v48 = vpop.f32.mrb[89].mxu0  ;;  %v2018_v49 = vpop.f32.mrb[89].mxu1 }
 0x1b4   : > { %v2857_v39 = vmax.f32 %v2729_v33, 0.0  ;;  %v2730_v41 = vadd.f32 %v5191_v15, %v2596_v35  ;;  %v1763_v55 = vpop.f32.mrb[90].mxu0  ;;  %v2019_v56 = vpop.f32.mrb[90].mxu1 }
 0x1b5   : > { %v4036_v50 = vpack.c.bf16 %v2793_v38, %v2793_v38  ;;  %v2794_v52 = vmax.f32 %v2666_v40, 0.0  ;;  %2268 = vst.msk [vmem:[#allocation2 + $0x160] sm:$0xff] %vm313_vm3, %v2139_v46  ;;  %2332 = vst.msk [vmem:[#allocation2 + $0x360] sm:$0xff] %vm313_vm3, %v2203_v47  ;;  %v2140_v59 = vadd.f32 %v1763_v55, %v487_v44  ;;  %v2204_v60 = vadd.f32 %v2019_v56, %v551_v45  ;;  %v1765_v61 = vpop.f32.mrb[91].mxu0  ;;  %v2021_v62 = vpop.f32.mrb[91].mxu1 }
 0x1b6   : > { %v4100_v51 = vpack.c.bf16 %v2857_v39, %v2857_v39  ;;  %v2858_v20 = vmax.f32 %v2730_v41, 0.0  ;;  %v2397_v53 = vld [vmem:[#allocation2 + $0x150] sm:$0xff] }
 0x1b7   : > { %v2461_v54 = vld [vmem:[#allocation2 + $0x350] sm:$0xff]  ;;  %v2533_v57 = vmul.f32 %v5174_v6, %v2397_v53  ;;  %3434 = vst.msk [vmem:[%s4955_s28 + $0xa0] sm:$0xf] %vm3393_vm4, %v4036_v50  ;;  %v4037_v63 = vpack.c.bf16 %v2794_v52, %v2794_v52  ;;  %v2398_v1 = vld [vmem:[#allocation2 + $0x158] sm:$0xff]  ;;  %v490_v50 = vld [vmem:[#allocation2 + $0x180] sm:$0xff] }
 0x1b8   : > { %v2597_v58 = vmul.f32 %v5174_v6, %v2461_v54  ;;  %3498 = vst.msk [vmem:[%s4955_s28 + $0x1a0] sm:$0xf] %vm3393_vm4, %v4100_v51  ;;  %v4101_v0 = vpack.c.bf16 %v2858_v20, %v2858_v20  ;;  %v2462_v2 = vld [vmem:[#allocation2 + $0x358] sm:$0xff]  ;;  %v2534_v4 = vmul.f32 %v5174_v6, %v2398_v1  ;;  %v554_v51 = vld [vmem:[#allocation2 + $0x380] sm:$0xff]  ;;  %v491_v53 = vld [vmem:[#allocation2 + $0x188] sm:$0xff] }
 0x1b9   : > { %v2667_v3 = vadd.f32 %v5191_v15, %v2533_v57  ;;  %v2598_v5 = vmul.f32 %v5174_v6, %v2462_v2  ;;  %2269 = vst.msk [vmem:[#allocation2 + $0x168] sm:$0xff] %vm313_vm3, %v2140_v59  ;;  %2333 = vst.msk [vmem:[#allocation2 + $0x368] sm:$0xff] %vm313_vm3, %v2204_v60  ;;  %v555_v54 = vld [vmem:[#allocation2 + $0x388] sm:$0xff] }
 0x1ba   : > { %v2731_v21 = vadd.f32 %v5191_v15, %v2597_v58  ;;  %3435 = vst.msk [vmem:[%s4955_s28 + $0xa4] sm:$0xf] %vm3393_vm4, %v4037_v63  ;;  %3499 = vst.msk [vmem:[%s4955_s28 + $0x1a4] sm:$0xf] %vm3393_vm4, %v4101_v0  ;;  %v2668_v9 = vadd.f32 %v5191_v15, %v2534_v4  ;;  %v1768_v13 = vpop.f32.mrb[92].mxu0  ;;  %v2024_v14 = vpop.f32.mrb[92].mxu1 }
 0x1bb   : > { %v2795_v7 = vmax.f32 %v2667_v3, 0.0  ;;  %v2732_v10 = vadd.f32 %v5191_v15, %v2598_v5  ;;  %v1770_v22 = vpop.f32.mrb[93].mxu0  ;;  %v2026_v23 = vpop.f32.mrb[93].mxu1  ;;  %v2141_v28 = vadd.f32 %v1768_v13, %v488_v11  ;;  %v2205_v29 = vadd.f32 %v2024_v14, %v552_v12  ;;  %v5443_v12 = vld [vmem:[%s5627_s3] ss:$0 sm:$0xff] }
 0x1bc   : > { %v2859_v8 = vmax.f32 %v2731_v21, 0.0  ;;  %v2796_v18 = vmax.f32 %v2668_v9, 0.0  ;;  %v2399_v26 = vld [vmem:[#allocation2 + $0x160] sm:$0xff]  ;;  %v1771_v30 = vpop.f32.mrb[94].mxu0  ;;  %v2027_v31 = vpop.f32.mrb[94].mxu1 }
 0x1bd   : > { %v4038_v16 = vpack.c.bf16 %v2795_v7, %v2795_v7  ;;  %v2860_v19 = vmax.f32 %v2732_v10, 0.0  ;;  %v2463_v27 = vld [vmem:[#allocation2 + $0x360] sm:$0xff]  ;;  %v2535_v34 = vmul.f32 %v5174_v6, %v2399_v26  ;;  %v1773_v36 = vpop.f32.mrb[95].mxu0  ;;  %v2029_v37 = vpop.f32.mrb[95].mxu1  ;;  %2270 = vst.msk [vmem:[#allocation2 + $0x170] sm:$0xff] %vm313_vm3, %v2141_v28  ;;  %2334 = vst.msk [vmem:[#allocation2 + $0x370] sm:$0xff] %vm313_vm3, %v2205_v29  ;;  %v2142_v40 = vadd.f32 %v1771_v30, %v489_v24 }
 0x1be   : > { %v4102_v17 = vpack.c.bf16 %v2859_v8, %v2859_v8  ;;  %v4039_v32 = vpack.c.bf16 %v2796_v18, %v2796_v18  ;;  %v2599_v35 = vmul.f32 %v5174_v6, %v2463_v27  ;;  %v2206_v41 = vadd.f32 %v2027_v31, %v553_v25  ;;  %v5428_v7 = vld [vmem:[%s5626_s2] ss:$0 sm:$0xff]  ;;  %v492_v18 = vld [vmem:[#allocation2 + $0x190] sm:$0xff]  ;;  %v493_v28 = vld [vmem:[#allocation2 + $0x198] sm:$0xff] }
 0x1bf   : > { %3436 = vst.msk [vmem:[%s4955_s28 + $0xa8] sm:$0xf] %vm3393_vm4, %v4038_v16  ;;  %v4103_v33 = vpack.c.bf16 %v2860_v19, %v2860_v19  ;;  %v2669_v42 = vadd.f32 %v5191_v15, %v2535_v34  ;;  %v556_v19 = vld [vmem:[#allocation2 + $0x390] sm:$0xff]  ;;  %v557_v29 = vld [vmem:[#allocation2 + $0x398] sm:$0xff] }
 0x1c0   : > { %3500 = vst.msk [vmem:[%s4955_s28 + $0x1a8] sm:$0xf] %vm3393_vm4, %v4102_v17  ;;  %v2400_v38 = vld [vmem:[#allocation2 + $0x168] sm:$0xff]  ;;  %3437 = vst.msk [vmem:[%s4955_s28 + $0xac] sm:$0xf] %vm3393_vm4, %v4039_v32  ;;  %v2733_v43 = vadd.f32 %v5191_v15, %v2599_v35 }
 0x1c1   : > { %v2464_v39 = vld [vmem:[#allocation2 + $0x368] sm:$0xff]  ;;  %3501 = vst.msk [vmem:[%s4955_s28 + $0x1ac] sm:$0xf] %vm3393_vm4, %v4103_v33  ;;  %v2536_v44 = vmul.f32 %v5174_v6, %v2400_v38  ;;  %v2797_v46 = vmax.f32 %v2669_v42, 0.0 }
 0x1c2   : > { %v2600_v45 = vmul.f32 %v5174_v6, %v2464_v39  ;;  %2271 = vst.msk [vmem:[#allocation2 + $0x178] sm:$0xff] %vm313_vm3, %v2142_v40  ;;  %2335 = vst.msk [vmem:[#allocation2 + $0x378] sm:$0xff] %vm313_vm3, %v2206_v41  ;;  %v2861_v47 = vmax.f32 %v2733_v43, 0.0  ;;  %v1776_v52 = vpop.f32.mrb[96].mxu0  ;;  %v2032_v20 = vpop.f32.mrb[96].mxu1 }
 0x1c3   : > { %v2670_v48 = vadd.f32 %v5191_v15, %v2536_v44  ;;  %v4040_v55 = vpack.c.bf16 %v2797_v46, %v2797_v46  ;;  %v1778_v58 = vpop.f32.mrb[97].mxu0  ;;  %v2034_v59 = vpop.f32.mrb[97].mxu1  ;;  %v2143_v60 = vadd.f32 %v1776_v52, %v490_v50  ;;  %v2207_v61 = vadd.f32 %v2032_v20, %v554_v51 }
 0x1c4   : > { %v2734_v49 = vadd.f32 %v5191_v15, %v2600_v45  ;;  %v4104_v6 = vpack.c.bf16 %v2861_v47, %v2861_v47  ;;  %v1779_v62 = vpop.f32.mrb[98].mxu0  ;;  %v2035_v63 = vpop.f32.mrb[98].mxu1  ;;  %v2401_v1 = vld [vmem:[#allocation2 + $0x170] sm:$0xff] }
 0x1c5   : > { %v2798_v56 = vmax.f32 %v2670_v48, 0.0  ;;  %3438 = vst.msk [vmem:[%s4955_s28 + $0xb0] sm:$0xf] %vm3393_vm4, %v4040_v55  ;;  %v2465_v2 = vld [vmem:[#allocation2 + $0x370] sm:$0xff]  ;;  %v2144_v3 = vadd.f32 %v1779_v62, %v491_v53  ;;  %v2208_v21 = vadd.f32 %v2035_v63, %v555_v54  ;;  %v1781_v4 = vpop.f32.mrb[99].mxu0  ;;  %v2037_v5 = vpop.f32.mrb[99].mxu1  ;;  %v2537_v8 = vmul.f32 %v5428_v7, %v2401_v1 }
 0x1c6   : > { %v2862_v57 = vmax.f32 %v2734_v49, 0.0  ;;  %3502 = vst.msk [vmem:[%s4955_s28 + $0x1b0] sm:$0xf] %vm3393_vm4, %v4104_v6  ;;  %v2601_v9 = vmul.f32 %v5428_v7, %v2465_v2  ;;  %v494_v55 = vld [vmem:[#allocation2 + $0x1a0] sm:$0xff] }
 0x1c7   : > { %v4041_v15 = vpack.c.bf16 %v2798_v56, %v2798_v56  ;;  %2272 = vst.msk [vmem:[#allocation2 + $0x180] sm:$0xff] %vm313_vm3, %v2143_v60  ;;  %2336 = vst.msk [vmem:[#allocation2 + $0x380] sm:$0xff] %vm313_vm3, %v2207_v61  ;;  %v2671_v13 = vadd.f32 %v5443_v12, %v2537_v8  ;;  %v558_v6 = vld [vmem:[#allocation2 + $0x3a0] sm:$0xff] }
 0x1c8   : > { %v4105_v0 = vpack.c.bf16 %v2862_v57, %v2862_v57  ;;  %2273 = vst.msk [vmem:[#allocation2 + $0x188] sm:$0xff] %vm313_vm3, %v2144_v3  ;;  %2337 = vst.msk [vmem:[#allocation2 + $0x388] sm:$0xff] %vm313_vm3, %v2208_v21  ;;  %v2735_v14 = vadd.f32 %v5443_v12, %v2601_v9  ;;  %v495_v3 = vld [vmem:[#allocation2 + $0x1a8] sm:$0xff] }
 0x1c9   : > { %3439 = vst.msk [vmem:[%s4955_s28 + $0xb4] sm:$0xf] %vm3393_vm4, %v4041_v15  ;;  %v2402_v10 = vld [vmem:[#allocation2 + $0x178] sm:$0xff]  ;;  %v2799_v22 = vmax.f32 %v2671_v13, 0.0  ;;  %v559_v21 = vld [vmem:[#allocation2 + $0x3a8] sm:$0xff] }
 0x1ca   : > { %3503 = vst.msk [vmem:[%s4955_s28 + $0x1b4] sm:$0xf] %vm3393_vm4, %v4105_v0  ;;  %v2466_v11 = vld [vmem:[#allocation2 + $0x378] sm:$0xff]  ;;  %v2538_v16 = vmul.f32 %v5428_v7, %v2402_v10  ;;  %v2863_v23 = vmax.f32 %v2735_v14, 0.0  ;;  %v1784_v26 = vpop.f32.mrb[100].mxu0  ;;  %v2040_v27 = vpop.f32.mrb[100].mxu1 }
 0x1cb   : > { %v2602_v17 = vmul.f32 %v5428_v7, %v2466_v11  ;;  %v2145_v30 = vadd.f32 %v1784_v26, %v492_v18  ;;  %v2209_v31 = vadd.f32 %v2040_v27, %v556_v19  ;;  %v1786_v32 = vpop.f32.mrb[101].mxu0  ;;  %v2042_v33 = vpop.f32.mrb[101].mxu1  ;;  %v4042_v34 = vpack.c.bf16 %v2799_v22, %v2799_v22 }
 0x1cc   : > { %v2672_v24 = vadd.f32 %v5443_v12, %v2538_v16  ;;  %v4106_v35 = vpack.c.bf16 %v2863_v23, %v2863_v23  ;;  %v1787_v38 = vpop.f32.mrb[102].mxu0  ;;  %v2043_v39 = vpop.f32.mrb[102].mxu1 }
 0x1cd   : > { %v2736_v25 = vadd.f32 %v5443_v12, %v2602_v17  ;;  %2274 = vst.msk [vmem:[#allocation2 + $0x190] sm:$0xff] %vm313_vm3, %v2145_v30  ;;  %2338 = vst.msk [vmem:[#allocation2 + $0x390] sm:$0xff] %vm313_vm3, %v2209_v31  ;;  %v2146_v42 = vadd.f32 %v1787_v38, %v493_v28  ;;  %v2210_v43 = vadd.f32 %v2043_v39, %v557_v29  ;;  %v1789_v44 = vpop.f32.mrb[103].mxu0  ;;  %v2045_v45 = vpop.f32.mrb[103].mxu1 }
 0x1ce   : > { %v2800_v36 = vmax.f32 %v2672_v24, 0.0  ;;  %v2403_v40 = vld [vmem:[#allocation2 + $0x180] sm:$0xff]  ;;  %3440 = vst.msk [vmem:[%s4955_s28 + $0xb8] sm:$0xf] %vm3393_vm4, %v4042_v34  ;;  %3504 = vst.msk [vmem:[%s4955_s28 + $0x1b8] sm:$0xf] %vm3393_vm4, %v4106_v35 }
 0x1cf   : > { %v2864_v37 = vmax.f32 %v2736_v25, 0.0  ;;  %v2467_v41 = vld [vmem:[#allocation2 + $0x380] sm:$0xff]  ;;  %v2539_v48 = vmul.f32 %v5428_v7, %v2403_v40  ;;  %v2404_v50 = vld [vmem:[#allocation2 + $0x188] sm:$0xff]  ;;  %2275 = vst.msk [vmem:[#allocation2 + $0x198] sm:$0xff] %vm313_vm3, %v2146_v42  ;;  %2339 = vst.msk [vmem:[#allocation2 + $0x398] sm:$0xff] %vm313_vm3, %v2210_v43 }
 0x1d0   : > { %v4043_v46 = vpack.c.bf16 %v2800_v36, %v2800_v36  ;;  %v2603_v49 = vmul.f32 %v5428_v7, %v2467_v41  ;;  %v2468_v51 = vld [vmem:[#allocation2 + $0x388] sm:$0xff]  ;;  %v2540_v52 = vmul.f32 %v5428_v7, %v2404_v50  ;;  %v496_v34 = vld [vmem:[#allocation2 + $0x1b0] sm:$0xff]  ;;  %v497_v44 = vld [vmem:[#allocation2 + $0x1b8] sm:$0xff] }
 0x1d1   : > { %v4107_v47 = vpack.c.bf16 %v2864_v37, %v2864_v37  ;;  %v2604_v20 = vmul.f32 %v5428_v7, %v2468_v51  ;;  %v2673_v53 = vadd.f32 %v5443_v12, %v2539_v48  ;;  %v560_v35 = vld [vmem:[#allocation2 + $0x3b0] sm:$0xff]  ;;  %v561_v45 = vld [vmem:[#allocation2 + $0x3b8] sm:$0xff] }
 0x1d2   : > { %3441 = vst.msk [vmem:[%s4955_s28 + $0xbc] sm:$0xf] %vm3393_vm4, %v4043_v46  ;;  %v2737_v54 = vadd.f32 %v5443_v12, %v2603_v49  ;;  %v2674_v56 = vadd.f32 %v5443_v12, %v2540_v52  ;;  %v1792_v60 = vpop.f32.mrb[104].mxu0  ;;  %v2048_v61 = vpop.f32.mrb[104].mxu1 }
 0x1d3   : > { %3505 = vst.msk [vmem:[%s4955_s28 + $0x1bc] sm:$0xf] %vm3393_vm4, %v4107_v47  ;;  %v2738_v57 = vadd.f32 %v5443_v12, %v2604_v20  ;;  %v2801_v58 = vmax.f32 %v2673_v53, 0.0  ;;  %v2147_v15 = vadd.f32 %v1792_v60, %v494_v55  ;;  %v2211_v0 = vadd.f32 %v2048_v61, %v558_v6  ;;  %v1794_v1 = vpop.f32.mrb[105].mxu0  ;;  %v2050_v2 = vpop.f32.mrb[105].mxu1 }
 0x1d4   : > { %v2865_v59 = vmax.f32 %v2737_v54, 0.0  ;;  %v2802_v62 = vmax.f32 %v2674_v56, 0.0  ;;  %v2405_v8 = vld [vmem:[#allocation2 + $0x190] sm:$0xff]  ;;  %v1795_v10 = vpop.f32.mrb[106].mxu0  ;;  %v2051_v11 = vpop.f32.mrb[106].mxu1  ;;  %v562_v2 = vld [vmem:[#allocation2 + $0x3c0] sm:$0xff] }
 0x1d5   : > { %v2866_v63 = vmax.f32 %v2738_v57, 0.0  ;;  %v4044_v4 = vpack.c.bf16 %v2801_v58, %v2801_v58  ;;  %v2469_v9 = vld [vmem:[#allocation2 + $0x390] sm:$0xff]  ;;  %v2541_v16 = vmul.f32 %v5428_v7, %v2405_v8  ;;  %2276 = vst.msk [vmem:[#allocation2 + $0x1a0] sm:$0xff] %vm313_vm3, %v2147_v15  ;;  %2340 = vst.msk [vmem:[#allocation2 + $0x3a0] sm:$0xff] %vm313_vm3, %v2211_v0  ;;  %v1797_v18 = vpop.f32.mrb[107].mxu0  ;;  %v2053_v19 = vpop.f32.mrb[107].mxu1  ;;  %v2148_v24 = vadd.f32 %v1795_v10, %v495_v3 }
 0x1d6   : > { %v4108_v5 = vpack.c.bf16 %v2865_v59, %v2865_v59  ;;  %v4045_v13 = vpack.c.bf16 %v2802_v62, %v2802_v62  ;;  %v2605_v17 = vmul.f32 %v5428_v7, %v2469_v9  ;;  %v2406_v22 = vld [vmem:[#allocation2 + $0x198] sm:$0xff]  ;;  %v2212_v25 = vadd.f32 %v2051_v11, %v559_v21  ;;  %v498_v15 = vld [vmem:[#allocation2 + $0x1c0] sm:$0xff] }
 0x1d7   : > { %v4109_v14 = vpack.c.bf16 %v2866_v63, %v2866_v63  ;;  %3442 = vst.msk [vmem:[%s4955_s28 + $0xc0] sm:$0xf] %vm3393_vm4, %v4044_v4  ;;  %v2470_v23 = vld [vmem:[#allocation2 + $0x398] sm:$0xff]  ;;  %v2675_v26 = vadd.f32 %v5443_v12, %v2541_v16  ;;  %v2542_v28 = vmul.f32 %v5428_v7, %v2406_v22  ;;  %v563_v22 = vld [vmem:[#allocation2 + $0x3c8] sm:$0xff] }
 0x1d8   : > { %3506 = vst.msk [vmem:[%s4955_s28 + $0x1c0] sm:$0xf] %vm3393_vm4, %v4108_v5  ;;  %3443 = vst.msk [vmem:[%s4955_s28 + $0xc4] sm:$0xf] %vm3393_vm4, %v4045_v13  ;;  %v2739_v27 = vadd.f32 %v5443_v12, %v2605_v17  ;;  %v2606_v29 = vmul.f32 %v5428_v7, %v2470_v23  ;;  %v499_v5 = vld [vmem:[#allocation2 + $0x1c8] sm:$0xff] }
 0x1d9   : > { %3507 = vst.msk [vmem:[%s4955_s28 + $0x1c4] sm:$0xf] %vm3393_vm4, %v4109_v14  ;;  %v2803_v30 = vmax.f32 %v2675_v26, 0.0  ;;  %v2676_v32 = vadd.f32 %v5443_v12, %v2542_v28 }
 0x1da   : > { %2277 = vst.msk [vmem:[#allocation2 + $0x1a8] sm:$0xff] %vm313_vm3, %v2148_v24  ;;  %2341 = vst.msk [vmem:[#allocation2 + $0x3a8] sm:$0xff] %vm313_vm3, %v2212_v25  ;;  %v2867_v31 = vmax.f32 %v2739_v27, 0.0  ;;  %v2740_v33 = vadd.f32 %v5443_v12, %v2606_v29  ;;  %v1800_v36 = vpop.f32.mrb[108].mxu0  ;;  %v2056_v37 = vpop.f32.mrb[108].mxu1 }
 0x1db   : > { %v4046_v38 = vpack.c.bf16 %v2803_v30, %v2803_v30  ;;  %v2804_v40 = vmax.f32 %v2676_v32, 0.0  ;;  %v1802_v42 = vpop.f32.mrb[109].mxu0  ;;  %v2058_v43 = vpop.f32.mrb[109].mxu1  ;;  %v2149_v48 = vadd.f32 %v1800_v36, %v496_v34  ;;  %v2213_v49 = vadd.f32 %v2056_v37, %v560_v35 }
 0x1dc   : > { %v4110_v39 = vpack.c.bf16 %v2867_v31, %v2867_v31  ;;  %v2868_v41 = vmax.f32 %v2740_v33, 0.0  ;;  %v2407_v46 = vld [vmem:[#allocation2 + $0x1a0] sm:$0xff]  ;;  %v1803_v50 = vpop.f32.mrb[110].mxu0  ;;  %v2059_v51 = vpop.f32.mrb[110].mxu1 }
 0x1dd   : > { %v2471_v47 = vld [vmem:[#allocation2 + $0x3a0] sm:$0xff]  ;;  %3444 = vst.msk [vmem:[%s4955_s28 + $0xc8] sm:$0xf] %vm3393_vm4, %v4046_v38  ;;  %v4047_v52 = vpack.c.bf16 %v2804_v40, %v2804_v40  ;;  %v2543_v53 = vmul.f32 %v5428_v7, %v2407_v46  ;;  %v1805_v55 = vpop.f32.mrb[111].mxu0  ;;  %v2061_v6 = vpop.f32.mrb[111].mxu1  ;;  %v2150_v56 = vadd.f32 %v1803_v50, %v497_v44  ;;  %v2214_v57 = vadd.f32 %v2059_v51, %v561_v45  ;;  %v500_v40 = vld [vmem:[#allocation2 + $0x1d0] sm:$0xff] }
 0x1de   : > { %3508 = vst.msk [vmem:[%s4955_s28 + $0x1c8] sm:$0xf] %vm3393_vm4, %v4110_v39  ;;  %v4111_v20 = vpack.c.bf16 %v2868_v41, %v2868_v41  ;;  %v2607_v54 = vmul.f32 %v5428_v7, %v2471_v47  ;;  %v564_v46 = vld [vmem:[#allocation2 + $0x3d0] sm:$0xff]  ;;  %v501_v47 = vld [vmem:[#allocation2 + $0x1d8] sm:$0xff] }
 0x1df   : > { %2278 = vst.msk [vmem:[#allocation2 + $0x1b0] sm:$0xff] %vm313_vm3, %v2149_v48  ;;  %2342 = vst.msk [vmem:[#allocation2 + $0x3b0] sm:$0xff] %vm313_vm3, %v2213_v49  ;;  %v2677_v58 = vadd.f32 %v5443_v12, %v2543_v53  ;;  %v565_v51 = vld [vmem:[#allocation2 + $0x3d8] sm:$0xff] }
 0x1e0   : > { %3445 = vst.msk [vmem:[%s4955_s28 + $0xcc] sm:$0xf] %vm3393_vm4, %v4047_v52  ;;  %3509 = vst.msk [vmem:[%s4955_s28 + $0x1cc] sm:$0xf] %vm3393_vm4, %v4111_v20  ;;  %v2741_v59 = vadd.f32 %v5443_v12, %v2607_v54 }
 0x1e1   : > { %v2408_v60 = vld [vmem:[#allocation2 + $0x1a8] sm:$0xff]  ;;  %2279 = vst.msk [vmem:[#allocation2 + $0x1b8] sm:$0xff] %vm313_vm3, %v2150_v56  ;;  %2343 = vst.msk [vmem:[#allocation2 + $0x3b8] sm:$0xff] %vm313_vm3, %v2214_v57  ;;  %v2805_v0 = vmax.f32 %v2677_v58, 0.0 }
 0x1e2   : > { %v2472_v61 = vld [vmem:[#allocation2 + $0x3a8] sm:$0xff]  ;;  %v2544_v62 = vmul.f32 %v5428_v7, %v2408_v60  ;;  %v2869_v1 = vmax.f32 %v2741_v59, 0.0  ;;  %v1808_v4 = vpop.f32.mrb[112].mxu0  ;;  %v2064_v11 = vpop.f32.mrb[112].mxu1 }
 0x1e3   : > { %v2608_v63 = vmul.f32 %v5428_v7, %v2472_v61  ;;  %v4048_v8 = vpack.c.bf16 %v2805_v0, %v2805_v0  ;;  %v2151_v10 = vadd.f32 %v1808_v4, %v498_v15  ;;  %v1810_v13 = vpop.f32.mrb[113].mxu0  ;;  %v2215_v17 = vadd.f32 %v2064_v11, %v562_v2  ;;  %v2066_v18 = vpop.f32.mrb[113].mxu1 }
 0x1e4   : > { %v2678_v3 = vadd.f32 %v5443_v12, %v2544_v62  ;;  %v4112_v9 = vpack.c.bf16 %v2869_v1, %v2869_v1  ;;  %v1811_v19 = vpop.f32.mrb[114].mxu0  ;;  %v2067_v26 = vpop.f32.mrb[114].mxu1  ;;  %v503_v18 = vld [vmem:[#allocation2 + $0x1e8] sm:$0xff] }
 0x1e5   : > { %v2742_v21 = vadd.f32 %v5443_v12, %v2608_v63  ;;  %3446 = vst.msk [vmem:[%s4955_s28 + $0xd0] sm:$0xf] %vm3393_vm4, %v4048_v8  ;;  %v2152_v25 = vadd.f32 %v1811_v19, %v499_v5  ;;  %v1813_v27 = vpop.f32.mrb[115].mxu0  ;;  %v2069_v32 = vpop.f32.mrb[115].mxu1  ;;  %v2216_v35 = vadd.f32 %v2067_v26, %v563_v22 }
 0x1e6   : > { %v2806_v14 = vmax.f32 %v2678_v3, 0.0  ;;  %3510 = vst.msk [vmem:[%s4955_s28 + $0x1d0] sm:$0xf] %vm3393_vm4, %v4112_v9  ;;  %v2409_v23 = vld [vmem:[#allocation2 + $0x1b0] sm:$0xff]  ;;  %v502_v9 = vld [vmem:[#allocation2 + $0x1e0] sm:$0xff]  ;;  %v567_v27 = vld [vmem:[#allocation2 + $0x3e8] sm:$0xff] }
 0x1e7   : > { %v2870_v16 = vmax.f32 %v2742_v21, 0.0  ;;  %v2473_v24 = vld [vmem:[#allocation2 + $0x3b0] sm:$0xff]  ;;  %2280 = vst.msk [vmem:[#allocation2 + $0x1c0] sm:$0xff] %vm313_vm3, %v2151_v10  ;;  %v2545_v30 = vmul.f32 %v5428_v7, %v2409_v23  ;;  %2344 = vst.msk [vmem:[#allocation2 + $0x3c0] sm:$0xff] %vm313_vm3, %v2215_v17 }
 0x1e8   : > { %v4049_v28 = vpack.c.bf16 %v2806_v14, %v2806_v14  ;;  %v2609_v31 = vmul.f32 %v5428_v7, %v2473_v24  ;;  %v2410_v33 = vld [vmem:[#allocation2 + $0x1b8] sm:$0xff]  ;;  %2281 = vst.msk [vmem:[#allocation2 + $0x1c8] sm:$0xff] %vm313_vm3, %v2152_v25  ;;  %2345 = vst.msk [vmem:[#allocation2 + $0x3c8] sm:$0xff] %vm313_vm3, %v2216_v35  ;;  %v566_v14 = vld [vmem:[#allocation2 + $0x3e0] sm:$0xff] }
 0x1e9   : > { %v4113_v29 = vpack.c.bf16 %v2870_v16, %v2870_v16  ;;  %v2474_v34 = vld [vmem:[#allocation2 + $0x3b8] sm:$0xff]  ;;  %v2679_v36 = vadd.f32 %v5443_v12, %v2545_v30  ;;  %v2546_v38 = vmul.f32 %v5428_v7, %v2410_v33 }
 0x1ea   : > { %3447 = vst.msk [vmem:[%s4955_s28 + $0xd4] sm:$0xf] %vm3393_vm4, %v4049_v28  ;;  %v2743_v37 = vadd.f32 %v5443_v12, %v2609_v31  ;;  %v2610_v39 = vmul.f32 %v5428_v7, %v2474_v34  ;;  %v1816_v45 = vpop.f32.mrb[116].mxu0  ;;  %v2072_v49 = vpop.f32.mrb[116].mxu1 }
 0x1eb   : > { %3511 = vst.msk [vmem:[%s4955_s28 + $0x1d4] sm:$0xf] %vm3393_vm4, %v4113_v29  ;;  %v2807_v41 = vmax.f32 %v2679_v36, 0.0  ;;  %v2680_v43 = vadd.f32 %v5443_v12, %v2546_v38  ;;  %v2153_v48 = vadd.f32 %v1816_v45, %v500_v40  ;;  %v1818_v50 = vpop.f32.mrb[117].mxu0  ;;  %v2074_v6 = vpop.f32.mrb[117].mxu1  ;;  %v2217_v59 = vadd.f32 %v2072_v49, %v564_v46  ;;  %v504_v49 = vld [vmem:[#allocation2 + $0x1f0] sm:$0xff] }
 0x1ec   : > { %v2871_v42 = vmax.f32 %v2743_v37, 0.0  ;;  %v2744_v44 = vadd.f32 %v5443_v12, %v2610_v39  ;;  %v1819_v56 = vpop.f32.mrb[118].mxu0  ;;  %v2075_v61 = vpop.f32.mrb[118].mxu1 }
 0x1ed   : > { %v4050_v52 = vpack.c.bf16 %v2807_v41, %v2807_v41  ;;  %v2808_v53 = vmax.f32 %v2680_v43, 0.0  ;;  %2282 = vst.msk [vmem:[#allocation2 + $0x1d0] sm:$0xff] %vm313_vm3, %v2153_v48  ;;  %v2154_v60 = vadd.f32 %v1819_v56, %v501_v47  ;;  %v1821_v62 = vpop.f32.mrb[119].mxu0  ;;  %v2218_v2 = vadd.f32 %v2075_v61, %v565_v51  ;;  %v2077_v3 = vpop.f32.mrb[119].mxu1  ;;  %2346 = vst.msk [vmem:[#allocation2 + $0x3d0] sm:$0xff] %vm313_vm3, %v2217_v59  ;;  %v569_v61 = vld [vmem:[#allocation2 + $0x3f8] sm:$0xff] }
 0x1ee   : > { %v4114_v20 = vpack.c.bf16 %v2871_v42, %v2871_v42  ;;  %v2872_v54 = vmax.f32 %v2744_v44, 0.0  ;;  %v2411_v55 = vld [vmem:[#allocation2 + $0x1c0] sm:$0xff] }
 0x1ef   : > { %v2547_v57 = vmul.f32 %v5428_v7, %v2411_v55  ;;  %v2475_v58 = vld [vmem:[#allocation2 + $0x3c0] sm:$0xff]  ;;  %3448 = vst.msk [vmem:[%s4955_s28 + $0xd8] sm:$0xf] %vm3393_vm4, %v4050_v52  ;;  %v4051_v63 = vpack.c.bf16 %v2808_v53, %v2808_v53  ;;  %v2412_v1 = vld [vmem:[#allocation2 + $0x1c8] sm:$0xff]  ;;  %v505_v55 = vld [vmem:[#allocation2 + $0x1f8] sm:$0xff] }
 0x1f0   : > { %3512 = vst.msk [vmem:[%s4955_s28 + $0x1d8] sm:$0xf] %vm3393_vm4, %v4114_v20  ;;  %v4115_v15 = vpack.c.bf16 %v2872_v54, %v2872_v54  ;;  %v2611_v0 = vmul.f32 %v5428_v7, %v2475_v58  ;;  %v2548_v4 = vmul.f32 %v5428_v7, %v2412_v1  ;;  %v2476_v8 = vld [vmem:[#allocation2 + $0x3c8] sm:$0xff]  ;;  %v568_v20 = vld [vmem:[#allocation2 + $0x3f0] sm:$0xff] }
 0x1f1   : > { %v2681_v21 = vadd.f32 %v5443_v12, %v2547_v57  ;;  %2283 = vst.msk [vmem:[#allocation2 + $0x1d8] sm:$0xff] %vm313_vm3, %v2154_v60  ;;  %2347 = vst.msk [vmem:[#allocation2 + $0x3d8] sm:$0xff] %vm313_vm3, %v2218_v2  ;;  %v2612_v13 = vmul.f32 %v5428_v7, %v2476_v8 }
 0x1f2   : > { %3449 = vst.msk [vmem:[%s4955_s28 + $0xdc] sm:$0xf] %vm3393_vm4, %v4051_v63  ;;  %3513 = vst.msk [vmem:[%s4955_s28 + $0x1dc] sm:$0xf] %vm3393_vm4, %v4115_v15  ;;  %v2745_v5 = vadd.f32 %v5443_v12, %v2611_v0  ;;  %v2682_v11 = vadd.f32 %v5443_v12, %v2548_v4  ;;  %v1824_v17 = vpop.f32.mrb[120].mxu0  ;;  %v2080_v25 = vpop.f32.mrb[120].mxu1 }
 0x1f3   : > { %v2809_v10 = vmax.f32 %v2681_v21, 0.0  ;;  %v2746_v23 = vadd.f32 %v5443_v12, %v2612_v13  ;;  %v2155_v24 = vadd.f32 %v1824_v17, %v502_v9  ;;  %v1826_v26 = vpop.f32.mrb[121].mxu0  ;;  %v2219_v30 = vadd.f32 %v2080_v25, %v566_v14  ;;  %v2082_v31 = vpop.f32.mrb[121].mxu1 }
 0x1f4   : > { %v2873_v16 = vmax.f32 %v2745_v5, 0.0  ;;  %v2810_v22 = vmax.f32 %v2682_v11, 0.0  ;;  %v2413_v29 = vld [vmem:[#allocation2 + $0x1d0] sm:$0xff]  ;;  %v1827_v32 = vpop.f32.mrb[122].mxu0  ;;  %v2083_v37 = vpop.f32.mrb[122].mxu1 }
 0x1f5   : > { %v4052_v19 = vpack.c.bf16 %v2809_v10, %v2809_v10  ;;  %v2874_v34 = vmax.f32 %v2746_v23, 0.0  ;;  %v2549_v35 = vmul.f32 %v5428_v7, %v2413_v29  ;;  %2284 = vst.msk [vmem:[#allocation2 + $0x1e0] sm:$0xff] %vm313_vm3, %v2155_v24  ;;  %v2156_v36 = vadd.f32 %v1827_v32, %v503_v18  ;;  %v1829_v38 = vpop.f32.mrb[123].mxu0  ;;  %v2477_v39 = vld [vmem:[#allocation2 + $0x3d0] sm:$0xff]  ;;  %2348 = vst.msk [vmem:[#allocation2 + $0x3e0] sm:$0xff] %vm313_vm3, %v2219_v30  ;;  %v2085_v42 = vpop.f32.mrb[123].mxu1 }
 0x1f6   : > { %v4116_v28 = vpack.c.bf16 %v2873_v16, %v2873_v16  ;;  %v4053_v33 = vpack.c.bf16 %v2810_v22, %v2810_v22  ;;  %v2220_v41 = vadd.f32 %v2083_v37, %v567_v27  ;;  %v2613_v45 = vmul.f32 %v5428_v7, %v2477_v39 }
 0x1f7   : > { %3450 = vst.msk [vmem:[%s4955_s28 + $0xe0] sm:$0xf] %vm3393_vm4, %v4052_v19  ;;  %v4117_v43 = vpack.c.bf16 %v2874_v34, %v2874_v34  ;;  %v2683_v44 = vadd.f32 %v5443_v12, %v2549_v35 }
 0x1f8   : > { %3514 = vst.msk [vmem:[%s4955_s28 + $0x1e0] sm:$0xf] %vm3393_vm4, %v4116_v28  ;;  %v2414_v40 = vld [vmem:[#allocation2 + $0x1d8] sm:$0xff]  ;;  %3451 = vst.msk [vmem:[%s4955_s28 + $0xe4] sm:$0xf] %vm3393_vm4, %v4053_v33  ;;  %v2747_v51 = vadd.f32 %v5443_v12, %v2613_v45 }
 0x1f9   : > { %v2550_v46 = vmul.f32 %v5428_v7, %v2414_v40  ;;  %v2478_v47 = vld [vmem:[#allocation2 + $0x3d8] sm:$0xff]  ;;  %2285 = vst.msk [vmem:[#allocation2 + $0x1e8] sm:$0xff] %vm313_vm3, %v2156_v36  ;;  %2349 = vst.msk [vmem:[#allocation2 + $0x3e8] sm:$0xff] %vm313_vm3, %v2220_v41  ;;  %v2811_v50 = vmax.f32 %v2683_v44, 0.0 }
 0x1fa   : > { %v2614_v48 = vmul.f32 %v5428_v7, %v2478_v47  ;;  %3515 = vst.msk [vmem:[%s4955_s28 + $0x1e4] sm:$0xf] %vm3393_vm4, %v4117_v43  ;;  %v1832_v54 = vpop.f32.mrb[124].mxu0  ;;  %v2875_v56 = vmax.f32 %v2747_v51, 0.0  ;;  %v2088_v59 = vpop.f32.mrb[124].mxu1 }
 0x1fb   : > { %v2684_v52 = vadd.f32 %v5443_v12, %v2550_v46  ;;  %v4054_v6 = vpack.c.bf16 %v2811_v50, %v2811_v50  ;;  %v2157_v58 = vadd.f32 %v1832_v54, %v504_v49  ;;  %v1834_v60 = vpop.f32.mrb[125].mxu0  ;;  %v2221_v15 = vadd.f32 %v2088_v59, %v568_v20  ;;  %v2090_v0 = vpop.f32.mrb[125].mxu1 }
 0x1fc   : > { %v2748_v53 = vadd.f32 %v5443_v12, %v2614_v48  ;;  %v2415_v63 = vld [vmem:[#allocation2 + $0x1e0] sm:$0xff]  ;;  %v1835_v1 = vpop.f32.mrb[126].mxu0  ;;  %v4118_v2 = vpack.c.bf16 %v2875_v56, %v2875_v56  ;;  %v2091_v8 = vpop.f32.mrb[126].mxu1 }
 0x1fd   : > { %v2812_v57 = vmax.f32 %v2684_v52, 0.0  ;;  %3452 = vst.msk [vmem:[%s4955_s28 + $0xe8] sm:$0xf] %vm3393_vm4, %v4054_v6  ;;  %v2551_v21 = vmul.f32 %v5428_v7, %v2415_v63  ;;  %v2479_v4 = vld [vmem:[#allocation2 + $0x3e0] sm:$0xff]  ;;  %v2158_v5 = vadd.f32 %v1835_v1, %v505_v55  ;;  %v1837_v9 = vpop.f32.mrb[127].mxu0  ;;  %v2222_v14 = vadd.f32 %v2091_v8, %v569_v61  ;;  %v2093_v16 = vpop.f32.mrb[127].mxu1 }
 0x1fe   : > { %v2876_v62 = vmax.f32 %v2748_v53, 0.0  ;;  %2286 = vst.msk [vmem:[#allocation2 + $0x1f0] sm:$0xff] %vm313_vm3, %v2157_v58  ;;  %v2615_v11 = vmul.f32 %v5428_v7, %v2479_v4  ;;  %2350 = vst.msk [vmem:[#allocation2 + $0x3f0] sm:$0xff] %vm313_vm3, %v2221_v15 }
 0x1ff   : > { %v4055_v3 = vpack.c.bf16 %v2812_v57, %v2812_v57  ;;  %3516 = vst.msk [vmem:[%s4955_s28 + $0x1e8] sm:$0xf] %vm3393_vm4, %v4118_v2  ;;  %v2685_v17 = vadd.f32 %v5443_v12, %v2551_v21 }
 0x200   : > { %v4119_v10 = vpack.c.bf16 %v2876_v62, %v2876_v62  ;;  %v2416_v13 = vld [vmem:[#allocation2 + $0x1e8] sm:$0xff]  ;;  %2287 = vst.msk [vmem:[#allocation2 + $0x1f8] sm:$0xff] %vm313_vm3, %v2158_v5  ;;  %v2749_v22 = vadd.f32 %v5443_v12, %v2615_v11  ;;  %2351 = vst.msk [vmem:[#allocation2 + $0x3f8] sm:$0xff] %vm313_vm3, %v2222_v14 }
 0x201   : > { %3453 = vst.msk [vmem:[%s4955_s28 + $0xec] sm:$0xf] %vm3393_vm4, %v4055_v3  ;;  %v2552_v18 = vmul.f32 %v5428_v7, %v2416_v13  ;;  %v2480_v19 = vld [vmem:[#allocation2 + $0x3e8] sm:$0xff]  ;;  %v2813_v24 = vmax.f32 %v2685_v17, 0.0 }
 0x202   : > { %3517 = vst.msk [vmem:[%s4955_s28 + $0x1ec] sm:$0xf] %vm3393_vm4, %v4119_v10  ;;  %v2616_v23 = vmul.f32 %v5428_v7, %v2480_v19  ;;  %v2877_v26 = vmax.f32 %v2749_v22, 0.0 }
 0x203   : > { %v2686_v25 = vadd.f32 %v5443_v12, %v2552_v18  ;;  %v4056_v28 = vpack.c.bf16 %v2813_v24, %v2813_v24 }
 0x204   : > { %v2750_v27 = vadd.f32 %v5443_v12, %v2616_v23  ;;  %v4120_v30 = vpack.c.bf16 %v2877_v26, %v2877_v26 }
 0x205   : > { %v2814_v29 = vmax.f32 %v2686_v25, 0.0  ;;  %v2417_v32 = vld [vmem:[#allocation2 + $0x1f0] sm:$0xff]  ;;  %3454 = vst.msk [vmem:[%s4955_s28 + $0xf0] sm:$0xf] %vm3393_vm4, %v4056_v28 }
 0x206   : > { %v2878_v31 = vmax.f32 %v2750_v27, 0.0  ;;  %v2553_v34 = vmul.f32 %v5428_v7, %v2417_v32  ;;  %v2481_v35 = vld [vmem:[#allocation2 + $0x3f0] sm:$0xff]  ;;  %3518 = vst.msk [vmem:[%s4955_s28 + $0x1f0] sm:$0xf] %vm3393_vm4, %v4120_v30 }
 0x207   : > { %v4057_v33 = vpack.c.bf16 %v2814_v29, %v2814_v29  ;;  %v2617_v37 = vmul.f32 %v5428_v7, %v2481_v35  ;;  %v2418_v38 = vld [vmem:[#allocation2 + $0x1f8] sm:$0xff] }
 0x208   : > { %v4121_v36 = vpack.c.bf16 %v2878_v31, %v2878_v31  ;;  %v2687_v39 = vadd.f32 %v5443_v12, %v2553_v34  ;;  %v2554_v40 = vmul.f32 %v5428_v7, %v2418_v38  ;;  %v2482_v41 = vld [vmem:[#allocation2 + $0x3f8] sm:$0xff] }
 0x209   : > { %3455 = vst.msk [vmem:[%s4955_s28 + $0xf4] sm:$0xf] %vm3393_vm4, %v4057_v33  ;;  %v2751_v42 = vadd.f32 %v5443_v12, %v2617_v37  ;;  %v2618_v43 = vmul.f32 %v5428_v7, %v2482_v41 }
 0x20a   : > { %3519 = vst.msk [vmem:[%s4955_s28 + $0x1f4] sm:$0xf] %vm3393_vm4, %v4121_v36  ;;  %v2815_v44 = vmax.f32 %v2687_v39, 0.0  ;;  %v2688_v45 = vadd.f32 %v5443_v12, %v2554_v40 }
 0x20b   : > { %v2879_v46 = vmax.f32 %v2751_v42, 0.0  ;;  %v2752_v47 = vadd.f32 %v5443_v12, %v2618_v43 }
 0x20c   : > { %v4058_v48 = vpack.c.bf16 %v2815_v44, %v2815_v44  ;;  %v2816_v49 = vmax.f32 %v2688_v45, 0.0 }
 0x20d   : > { %v4122_v50 = vpack.c.bf16 %v2879_v46, %v2879_v46  ;;  %v2880_v51 = vmax.f32 %v2752_v47, 0.0 }
 0x20e   : > { %3456 = vst.msk [vmem:[%s4955_s28 + $0xf8] sm:$0xf] %vm3393_vm4, %v4058_v48  ;;  %v4059_v52 = vpack.c.bf16 %v2816_v49, %v2816_v49 }
 0x20f   : > { %3520 = vst.msk [vmem:[%s4955_s28 + $0x1f8] sm:$0xf] %vm3393_vm4, %v4122_v50  ;;  %v4123_v20 = vpack.c.bf16 %v2880_v51, %v2880_v51 }
 0x210   : > { %3457 = vst.msk [vmem:[%s4955_s28 + $0xfc] sm:$0xf] %vm3393_vm4, %v4059_v52 }
 0x211   : > { %3521 = vst.msk [vmem:[%s4955_s28 + $0x1fc] sm:$0xf] %vm3393_vm4, %v4123_v20 }
 0x212 PF: > { %s14_s17 = sadd.s32 1, %s4399_s17   ;;  %s5629_s15 = smov %s4395_s16 }
 0x213   : > { %p11_p5 = scmp.ge.s32.totalorder %s14_s17, 4   ;;  %s5630_s16 = smov %s5632_s18 }
 0x215   :  { %13 = sbr.rel (!%p11_p5) target bundleno = 2 (0x2), region = 83 }

</bundles_post_ra>
